<compile_context>
chip_gen: v7x
topology: tpu7x:2x2x1
jax: 0.10.0
libtpu: 0.0.40
codegen_flags: <defaults>
</compile_context>

<pallas_src>
import jax
import jax.numpy as jnp
from jax.experimental import pallas as pl
from jax.experimental.pallas import tpu as pltpu

# ------------------------- tiny T5 config -------------------------
B = 2        # batch
S_ENC = 8    # encoder (question) length
S_DEC = 8    # decoder (answer/labels) length
D = 32       # d_model
H = 4        # num heads
DK = 8       # head dim (H * DK == D)
HDK = H * DK
DFF = 64     # FFN inner dim
V = 128      # vocab size (lane-dense logits)
NB = 32      # relative-attention num buckets
MAXD = 128   # relative-attention max distance
EPS = 1e-6

NE = B * S_ENC           # encoder tokens
ND = B * S_DEC           # decoder tokens
BH = B * H               # fused (batch, head) axis
assert S_ENC == S_DEC    # bias-slab packing assumes equal toy lengths

_VMEM = pl.BlockSpec(memory_space=pltpu.MemorySpace.VMEM)
_SMEM = pl.BlockSpec(memory_space=pltpu.MemorySpace.SMEM)

# ---------------- weight-slab layout (static row offsets, 128 lanes) ----------------
_W_SHAPES = (
    ('e_qkv',   (D, 3 * HDK)),
    ('e_o',     (HDK, D)),
    ('e_wi',    (D, DFF)),
    ('e_wo',    (DFF, D)),
    ('d_sqkv',  (D, 3 * HDK)),
    ('d_so',    (HDK, D)),
    ('d_cq',    (D, HDK)),
    ('d_ckv',   (D, 2 * HDK)),
    ('d_co',    (HDK, D)),
    ('d_wi',    (D, DFF)),
    ('d_wo',    (DFF, D)),
    ('lm_head', (D, V)),
)
W_LANES = 128
_W_OFF = {}
_row = 0
for _name, (_r, _c) in _W_SHAPES:
    assert _c <= W_LANES
    _W_OFF[_name] = (_row, _r, _c)
    _row += _r
W_ROWS = _row            # 448 rows x 128 lanes, bf16 (~112 KiB)


# ----------------- in-kernel helpers (operate on VALUES, traced once) -----------------

def _mxu(a, b):
    """MXU matmul: bf16 operands, f32 accumulation (weights arrive bf16 already)."""
    return jnp.dot(a.astype(jnp.bfloat16), b.astype(jnp.bfloat16),
                   preferred_element_type=jnp.float32)


def _rmsnorm(x, w):
    # T5 LayerNorm: no mean subtraction, no bias; all-f32 elementwise.
    var = jnp.mean(x * x, axis=-1, keepdims=True)
    return x * jax.lax.rsqrt(var + EPS) * w


def _softmax(s):
    # Exact normalization (approx reciprocal avoided for parity with torch ref).
    m = jnp.max(s, axis=-1, keepdims=True)
    p = jnp.exp(s - m)
    return p / jnp.sum(p, axis=-1, keepdims=True)


def _split_heads(x, s):
    """[B*s, H*DK] f32 -> [B*H, s, DK] bf16 (one cast after stacking)."""
    x3 = jnp.stack([x[bi * s:(bi + 1) * s, h * DK:(h + 1) * DK]
                    for bi in range(B) for h in range(H)], axis=0)
    return x3.astype(jnp.bfloat16)


def _merge_heads(ctx, s):
    """[B*H, s, DK] f32 -> [B*s, H*DK] f32."""
    rows = [jnp.concatenate([ctx[bi * H + h] for h in range(H)], axis=-1)
            for bi in range(B)]
    return jnp.concatenate(rows, axis=0)


def _mha(q, k, v, sq, sk, bias):
    """Batched multi-head attention over the fused (batch*head) axis.

    q: [B*sq, HDK] f32, k/v: [B*sk, HDK] f32, bias: [B*H, sq, sk] f32
    (bias = rel-pos + padding/causal mask, fully precombined on the host).
    T5 attention has NO 1/sqrt(dk) scaling.
    """
    q3 = _split_heads(q, sq)
    k3 = _split_heads(k, sk)
    v3 = _split_heads(v, sk)
    s = jnp.einsum('nqd,nkd->nqk', q3, k3,
                   preferred_element_type=jnp.float32) + bias
    p = _softmax(s)
    ctx = jnp.einsum('nqk,nkd->nqd', p.astype(jnp.bfloat16), v3,
                     preferred_element_type=jnp.float32)
    return _merge_heads(ctx, sq)


# ------------------------- the single fused kernel -------------------------

def _t5_forward_kernel(acts_ref, bias_ref, labels_ref, w_ref, ln_ref,
                       logits_ref, loss_ref, loss_tmp):
    def w(name):                       # static slice of the packed bf16 weight slab
        off, r, c = _W_OFF[name]
        return w_ref[off:off + r, 0:c]

    def ln(i):                         # [1, D] f32 LayerNorm weight row
        return ln_ref[i:i + 1, :]

    # ---------------- encoder (1 layer) ----------------
    x = acts_ref[0:NE, :]                                  # [NE, D] f32
    h = _rmsnorm(x, ln(0))
    qkv = _mxu(h, w('e_qkv'))                              # fused QKV: [NE, 3*HDK]
    a = _mha(qkv[:, 0:HDK], qkv[:, HDK:2 * HDK], qkv[:, 2 * HDK:3 * HDK],
             S_ENC, S_ENC, bias_ref[0])
    x = x + _mxu(a, w('e_o'))
    h = _rmsnorm(x, ln(1))
    ff = jnp.maximum(_mxu(h, w('e_wi')), 0.0)              # T5 ReLU FFN
    x = x + _mxu(ff, w('e_wo'))
    enc_out = _rmsnorm(x, ln(2))

    # ---------------- decoder (1 layer) ----------------
    y = acts_ref[NE:NE + ND, :]                            # [ND, D] f32
    h = _rmsnorm(y, ln(3))
    sqkv = _mxu(h, w('d_sqkv'))                            # fused self QKV
    a = _mha(sqkv[:, 0:HDK], sqkv[:, HDK:2 * HDK], sqkv[:, 2 * HDK:3 * HDK],
             S_DEC, S_DEC, bias_ref[1])
    y = y + _mxu(a, w('d_so'))

    h = _rmsnorm(y, ln(4))
    cq = _mxu(h, w('d_cq'))                                # [ND, HDK]
    ckv = _mxu(enc_out, w('d_ckv'))                        # fused cross K/V: [NE, 2*HDK]
    a = _mha(cq, ckv[:, 0:HDK], ckv[:, HDK:2 * HDK], S_DEC, S_ENC, bias_ref[2])
    y = y + _mxu(a, w('d_co'))

    h = _rmsnorm(y, ln(5))
    ff = jnp.maximum(_mxu(h, w('d_wi')), 0.0)
    y = y + _mxu(ff, w('d_wo'))
    y = _rmsnorm(y, ln(6))          # d_model**-0.5 tied-head rescale folded into ln(6)

    # ---------------- tied LM head + masked cross-entropy ----------------
    logits = _mxu(y, w('lm_head'))                         # [ND, V=128] lane-dense
    logits_ref[...] = logits

    lbl = labels_ref[...]                                  # [ND, 1] int32
    m = jnp.max(logits, axis=-1, keepdims=True)
    z = logits - m
    lse = jnp.log(jnp.sum(jnp.exp(z), axis=-1, keepdims=True))
    logp = z - lse
    col = jax.lax.broadcasted_iota(jnp.int32, logits.shape, 1)
    picked = jnp.where(col == lbl, logp, 0.0)              # masked where-sum (no one-hot mul)
    nll = -jnp.sum(picked, axis=-1, keepdims=True)         # [ND, 1]
    valid = (lbl != -100).astype(jnp.float32)              # ignore_index = -100
    num = jnp.sum(nll * valid, axis=0, keepdims=True)      # [1, 1]
    den = jnp.maximum(jnp.sum(valid, axis=0, keepdims=True), 1.0)
    loss_tmp[...] = num / den                  # keepdims throughout (Mosaic dislikes rank-0)
    loss_ref[0, 0] = loss_tmp[0, 0]            # scalar loss out via SMEM (no padded VMEM tile)


def _cost_estimate():
    mm = lambda m, k, n: 2 * m * k * n
    flops = (mm(NE, D, 3 * HDK) + mm(NE, HDK, D) + mm(NE, D, DFF) + mm(NE, DFF, D)
             + mm(ND, D, 3 * HDK) + mm(ND, HDK, D)
             + mm(ND, D, HDK) + mm(NE, D, 2 * HDK) + mm(ND, HDK, D)
             + mm(ND, D, DFF) + mm(ND, DFF, D)
             + mm(ND, D, V)
             + BH * (mm(S_ENC, DK, S_ENC) + mm(S_ENC, S_ENC, DK))
             + BH * (mm(S_DEC, DK, S_DEC) + mm(S_DEC, S_DEC, DK))
             + BH * (mm(S_DEC, DK, S_ENC) + mm(S_DEC, S_ENC, DK)))
    transcendentals = (BH * (S_ENC * S_ENC + S_DEC * S_DEC + S_DEC * S_ENC)   # softmax exp
                       + ND * V + ND                                          # CE exp / log
                       + 7 * (NE + ND))                                       # rmsnorm rsqrt
    bytes_accessed = ((NE + ND) * D * 4 + 3 * BH * S_DEC * S_ENC * 4 + ND * 4
                      + W_ROWS * W_LANES * 2 + 8 * D * 4
                      + ND * V * 4 + 4)
    return pl.CostEstimate(flops=flops, transcendentals=transcendentals,
                           bytes_accessed=bytes_accessed)


def t5_fused_forward(acts, biases, labels, w_slab, ln_slab):
    # TODO(synk): on v7x, add a grid over batch (dimension_semantics=("parallel",))
    # or pl.core_map over the 2-TC mesh to use the second TensorCore; at these toy
    # dims the per-step overhead would cancel the gain, so the call stays gridless.
    logits, loss = pl.pallas_call(
        _t5_forward_kernel,
        out_shape=(jax.ShapeDtypeStruct((ND, V), jnp.float32),
                   jax.ShapeDtypeStruct((1, 1), jnp.float32)),
        in_specs=[_VMEM, _VMEM, _VMEM, _VMEM, _VMEM],
        out_specs=(_VMEM, _SMEM),
        scratch_shapes=[pltpu.VMEM((1, 1), jnp.float32)],
        cost_estimate=_cost_estimate(),
    )(acts, biases, labels, w_slab, ln_slab)
    return logits, loss


# ------------------------- JAX glue (index math only) -------------------------

def _rel_pos_bucket(rel, bidirectional, num_buckets=NB, max_distance=MAXD):
    buckets = jnp.zeros_like(rel)
    if bidirectional:
        num_buckets //= 2
        buckets = buckets + (rel > 0).astype(jnp.int32) * num_buckets
        rel = jnp.abs(rel)
    else:
        rel = -jnp.minimum(rel, 0)
    max_exact = num_buckets // 2
    is_small = rel < max_exact
    relf = jnp.maximum(rel, 1).astype(jnp.float32)
    val_large = max_exact + (
        jnp.log(relf / max_exact) / jnp.log(max_distance / max_exact)
        * (num_buckets - max_exact)).astype(jnp.int32)
    val_large = jnp.minimum(val_large, num_buckets - 1)
    return buckets + jnp.where(is_small, rel, val_large)


def position_bias(qlen, klen, table, bidirectional):
    ctx = jnp.arange(qlen)[:, None]
    mem = jnp.arange(klen)[None, :]
    buckets = _rel_pos_bucket(mem - ctx, bidirectional)      # [q, k]
    bias = jnp.take(table, buckets, axis=0)                  # [q, k, H]
    return jnp.transpose(bias, (2, 0, 1))                    # [H, q, k]


def pack_params(params):
    """Host-side, once: pack all weights into one bf16 [W_ROWS,128] slab + f32 LN slab."""
    mats = {
        'e_qkv': jnp.concatenate(
            [params['enc_q'], params['enc_k'], params['enc_v']], axis=1),
        'e_o': params['enc_o'],
        'e_wi': params['enc_wi'],
        'e_wo': params['enc_wo'],
        'd_sqkv': jnp.concatenate(
            [params['dec_sq'], params['dec_sk'], params['dec_sv']], axis=1),
        'd_so': params['dec_so'],
        'd_cq': params['dec_cq'],
        'd_ckv': jnp.concatenate([params['dec_ck'], params['dec_cv']], axis=1),
        'd_co': params['dec_co'],
        'd_wi': params['dec_wi'],
        'd_wo': params['dec_wo'],
        # T5 default tie_word_embeddings=True: LM head is the shared embedding^T
        'lm_head': params['shared'].T,
    }
    slab = jnp.zeros((W_ROWS, W_LANES), jnp.bfloat16)
    for name, _ in _W_SHAPES:
        off, r, c = _W_OFF[name]
        slab = slab.at[off:off + r, 0:c].set(mats[name].astype(jnp.bfloat16))

    ln = jnp.zeros((8, D), jnp.float32)
    order = ('enc_ln_sa', 'enc_ln_ff', 'enc_ln_f',
             'dec_ln_sa', 'dec_ln_ca', 'dec_ln_ff', 'dec_ln_f')
    for i, nm in enumerate(order):
        v = params[nm]
        if nm == 'dec_ln_f':
            v = v * (D ** -0.5)   # fold tied-embedding d_model**-0.5 rescale (free)
        ln = ln.at[i, :].set(v)

    return {'shared': params['shared'], 'enc_rel': params['enc_rel'],
            'dec_rel': params['dec_rel'], 'w_slab': slab, 'ln_slab': ln}


def qa_model_forward(packed, input_ids, attention_mask, labels):
    """Mirrors QAModel.forward -> (loss, logits) of T5ForConditionalGeneration."""
    b, se = input_ids.shape
    sd = labels.shape[1]
    assert (b, se, sd) == (B, S_ENC, S_DEC)
    shared = packed['shared']

    # embedding gather (glue)
    x_enc = jnp.take(shared, input_ids, axis=0).reshape(b * se, D)

    # decoder teacher-forcing input: shift labels right (T5 convention), -100 -> pad(0)
    dec_in = jnp.concatenate(
        [jnp.zeros((b, 1), labels.dtype), labels[:, :-1]], axis=1)
    dec_in = jnp.where(dec_in == -100, 0, dec_in)
    y_dec = jnp.take(shared, dec_in, axis=0).reshape(b * sd, D)
    acts = jnp.concatenate([x_enc, y_dec], axis=0)           # one [NE+ND, D] slab

    # attention biases, fully precombined per (batch, head): [3, B*H, S, S]
    enc_mask_add = (1.0 - attention_mask.astype(jnp.float32)) * -1e9
    enc_rel = position_bias(se, se, packed['enc_rel'], bidirectional=True)
    causal = jnp.where(jnp.arange(sd)[None, :] > jnp.arange(sd)[:, None],
                       -1e9, 0.0)[None]
    dec_rel = position_bias(sd, sd, packed['dec_rel'], bidirectional=False) + causal

    bias_enc = (enc_rel[None] + enc_mask_add[:, None, None, :]).reshape(BH, se, se)
    bias_dec = jnp.broadcast_to(dec_rel[None], (b, H, sd, sd)).reshape(BH, sd, sd)
    bias_crs = jnp.broadcast_to(enc_mask_add[:, None, None, :],
                                (b, H, sd, se)).reshape(BH, sd, se)
    biases = jnp.stack([bias_enc, bias_dec, bias_crs], axis=0)

    labels_k = labels.reshape(b * sd, 1).astype(jnp.int32)
    logits_flat, loss = t5_fused_forward(acts, biases, labels_k,
                                         packed['w_slab'], packed['ln_slab'])
    return loss[0, 0], logits_flat.reshape(b, sd, V)


def init_params(key):
    ks = jax.random.split(key, 20)
    idx = iter(range(20))

    def nrm(shape, scale=0.05):
        return jax.random.normal(ks[next(idx)], shape, jnp.float32) * scale

    ones = lambda: jnp.ones((D,), jnp.float32)
    p = {}
    p['shared'] = nrm((V, D), 1.0)
    # encoder layer
    p['enc_ln_sa'] = ones()
    p['enc_q'] = nrm((D, HDK)); p['enc_k'] = nrm((D, HDK))
    p['enc_v'] = nrm((D, HDK)); p['enc_o'] = nrm((HDK, D))
    p['enc_rel'] = nrm((NB, H))
    p['enc_ln_ff'] = ones()
    p['enc_wi'] = nrm((D, DFF)); p['enc_wo'] = nrm((DFF, D))
    p['enc_ln_f'] = ones()
    # decoder layer
    p['dec_ln_sa'] = ones()
    p['dec_sq'] = nrm((D, HDK)); p['dec_sk'] = nrm((D, HDK))
    p['dec_sv'] = nrm((D, HDK)); p['dec_so'] = nrm((HDK, D))
    p['dec_rel'] = nrm((NB, H))
    p['dec_ln_ca'] = ones()
    p['dec_cq'] = nrm((D, HDK)); p['dec_ck'] = nrm((D, HDK))
    p['dec_cv'] = nrm((D, HDK)); p['dec_co'] = nrm((HDK, D))
    p['dec_ln_ff'] = ones()
    p['dec_wi'] = nrm((D, DFF)); p['dec_wo'] = nrm((DFF, D))
    p['dec_ln_f'] = ones()
    return p


# TODO(synk): QAModel.generate (autoregressive greedy/beam decoding with KV cache)
# is not implemented; only the teacher-forced forward pass is.
# TODO(synk): at real T5 dims (D>=512, V~32k) the fused call must be split with a
# grid + BlockSpec tiling: vocab axis of lm_head tiled (2-4k lanes, "arbitrary"),
# batch/seq axes "parallel" (dual TC on v7x), tiles sized for v7x's 64 MiB VMEM
# with vmem_limit_bytes set, and >=256-aligned operand shapes for the v6e/v7x MXU.
# The D=32 toy config leaves activation lanes 4x under-packed by construction.

if __name__ == "__main__":
    key = jax.random.PRNGKey(0)
    kp, ki, kl = jax.random.split(key, 3)
    params = init_params(kp)
    packed = pack_params(params)          # one-time host-side bf16 slab packing

    input_ids = jax.random.randint(ki, (B, S_ENC), 1, V, dtype=jnp.int32)
    attention_mask = jnp.ones((B, S_ENC), jnp.int32).at[:, -2:].set(0)  # some padding
    labels = jax.random.randint(kl, (B, S_DEC), 1, V, dtype=jnp.int32)
    labels = labels.at[:, -1].set(-100)   # exercise ignore_index path

    loss, logits = jax.jit(qa_model_forward)(packed, input_ids, attention_mask, labels)
    jax.block_until_ready((loss, logits))
    assert logits.shape == (B, S_DEC, V)
    assert jnp.isfinite(loss)
    print("KERNEL_OK")
</pallas_src>

<mosaic_0001>
module attributes {stable_mosaic.version = 11 : i64} {
  func.func @_t5_forward_kernel(%arg0: memref<32x32xf32, #tpu.memory_space<vmem>>, %arg1: memref<3x8x8x8xf32, #tpu.memory_space<vmem>>, %arg2: memref<16x1xi32, #tpu.memory_space<vmem>>, %arg3: memref<448x128xbf16, #tpu.memory_space<vmem>>, %arg4: memref<8x32xf32, #tpu.memory_space<vmem>>, %arg5: memref<16x128xf32, #tpu.memory_space<vmem>>, %arg6: memref<1x1xf32, #tpu.memory_space<smem>>, %arg7: memref<1x1xf32, #tpu.memory_space<vmem>>) attributes {dimension_semantics = [], scalar_prefetch = 0 : i64, scratch_operands = 1 : i64, tpu.core_type = #tpu.core_type<tc>} {
    %c0 = arith.constant 0 : index
    %c0_0 = arith.constant 0 : index
    %0 = vector.load %arg0[%c0, %c0_0] : memref<32x32xf32, #tpu.memory_space<vmem>>, vector<16x32xf32>
    %c0_1 = arith.constant 0 : index
    %c0_2 = arith.constant 0 : index
    %1 = vector.load %arg4[%c0_1, %c0_2] : memref<8x32xf32, #tpu.memory_space<vmem>>, vector<1x32xf32>
    %2 = arith.mulf %0, %0 : vector<16x32xf32>
    %cst = arith.constant dense<0.000000e+00> : vector<16xf32>
    %3 = vector.multi_reduction <add>, %2, %cst [1] : vector<16x32xf32> to vector<16xf32>
    %4 = vector.shape_cast %3 : vector<16xf32> to vector<16x1xf32>
    %cst_3 = arith.constant 3.200000e+01 : f32
    %5 = vector.broadcast %cst_3 : f32 to vector<16x1xf32>
    %6 = arith.divf %4, %5 : vector<16x1xf32>
    %cst_4 = arith.constant 9.99999997E-7 : f32
    %7 = vector.broadcast %cst_4 : f32 to vector<16x1xf32>
    %8 = arith.addf %6, %7 : vector<16x1xf32>
    %9 = math.rsqrt %8 : vector<16x1xf32>
    %10 = vector.broadcast %9 : vector<16x1xf32> to vector<16x32xf32>
    %11 = arith.mulf %0, %10 : vector<16x32xf32>
    %12 = vector.broadcast %1 : vector<1x32xf32> to vector<16x32xf32>
    %13 = arith.mulf %11, %12 : vector<16x32xf32>
    %c0_5 = arith.constant 0 : index
    %c0_6 = arith.constant 0 : index
    %14 = vector.load %arg3[%c0_5, %c0_6] : memref<448x128xbf16, #tpu.memory_space<vmem>>, vector<32x96xbf16>
    %15 = arith.truncf %13 : vector<16x32xf32> to vector<16x32xbf16>
    %cst_7 = arith.constant dense<0.000000e+00> : vector<16x96xf32>
    %16 = tpu.matmul %15, %14, %cst_7 {dimension_numbers = #tpu.dot_dimension_numbers<[1], [0], [0], [1], [0, 0, 1, 1], [], []>} : vector<16x32xbf16>, vector<32x96xbf16>, vector<16x96xf32> -> vector<16x96xf32>
    %17 = vector.extract_strided_slice %16 {offsets = [0, 0], sizes = [16, 32], strides = [1, 1]} : vector<16x96xf32> to vector<16x32xf32>
    %18 = vector.extract_strided_slice %16 {offsets = [0, 32], sizes = [16, 32], strides = [1, 1]} : vector<16x96xf32> to vector<16x32xf32>
    %19 = vector.extract_strided_slice %16 {offsets = [0, 64], sizes = [16, 32], strides = [1, 1]} : vector<16x96xf32> to vector<16x32xf32>
    %c0_8 = arith.constant 0 : index
    %c0_9 = arith.constant 0 : index
    %c0_10 = arith.constant 0 : index
    %c0_11 = arith.constant 0 : index
    %20 = vector.load %arg1[%c0_8, %c0_9, %c0_10, %c0_11] : memref<3x8x8x8xf32, #tpu.memory_space<vmem>>, vector<1x8x8x8xf32>
    %21 = vector.shape_cast %20 : vector<1x8x8x8xf32> to vector<8x8x8xf32>
    %22 = vector.extract_strided_slice %17 {offsets = [0, 0], sizes = [8, 8], strides = [1, 1]} : vector<16x32xf32> to vector<8x8xf32>
    %23 = vector.extract_strided_slice %17 {offsets = [0, 8], sizes = [8, 8], strides = [1, 1]} : vector<16x32xf32> to vector<8x8xf32>
    %24 = vector.extract_strided_slice %17 {offsets = [0, 16], sizes = [8, 8], strides = [1, 1]} : vector<16x32xf32> to vector<8x8xf32>
    %25 = vector.extract_strided_slice %17 {offsets = [0, 24], sizes = [8, 8], strides = [1, 1]} : vector<16x32xf32> to vector<8x8xf32>
    %26 = vector.extract_strided_slice %17 {offsets = [8, 0], sizes = [8, 8], strides = [1, 1]} : vector<16x32xf32> to vector<8x8xf32>
    %27 = vector.extract_strided_slice %17 {offsets = [8, 8], sizes = [8, 8], strides = [1, 1]} : vector<16x32xf32> to vector<8x8xf32>
    %28 = vector.extract_strided_slice %17 {offsets = [8, 16], sizes = [8, 8], strides = [1, 1]} : vector<16x32xf32> to vector<8x8xf32>
    %29 = vector.extract_strided_slice %17 {offsets = [8, 24], sizes = [8, 8], strides = [1, 1]} : vector<16x32xf32> to vector<8x8xf32>
    %30 = vector.shape_cast %22 : vector<8x8xf32> to vector<1x8x8xf32>
    %31 = vector.shape_cast %23 : vector<8x8xf32> to vector<1x8x8xf32>
    %32 = vector.shape_cast %24 : vector<8x8xf32> to vector<1x8x8xf32>
    %33 = vector.shape_cast %25 : vector<8x8xf32> to vector<1x8x8xf32>
    %34 = vector.shape_cast %26 : vector<8x8xf32> to vector<1x8x8xf32>
    %35 = vector.shape_cast %27 : vector<8x8xf32> to vector<1x8x8xf32>
    %36 = vector.shape_cast %28 : vector<8x8xf32> to vector<1x8x8xf32>
    %37 = vector.shape_cast %29 : vector<8x8xf32> to vector<1x8x8xf32>
    %38 = tpu.concatenate %30, %31, %32, %33, %34, %35, %36, %37 in 0 : vector<1x8x8xf32>, vector<1x8x8xf32>, vector<1x8x8xf32>, vector<1x8x8xf32>, vector<1x8x8xf32>, vector<1x8x8xf32>, vector<1x8x8xf32>, vector<1x8x8xf32> -> vector<8x8x8xf32>
    %39 = arith.truncf %38 : vector<8x8x8xf32> to vector<8x8x8xbf16>
    %40 = vector.extract_strided_slice %18 {offsets = [0, 0], sizes = [8, 8], strides = [1, 1]} : vector<16x32xf32> to vector<8x8xf32>
    %41 = vector.extract_strided_slice %18 {offsets = [0, 8], sizes = [8, 8], strides = [1, 1]} : vector<16x32xf32> to vector<8x8xf32>
    %42 = vector.extract_strided_slice %18 {offsets = [0, 16], sizes = [8, 8], strides = [1, 1]} : vector<16x32xf32> to vector<8x8xf32>
    %43 = vector.extract_strided_slice %18 {offsets = [0, 24], sizes = [8, 8], strides = [1, 1]} : vector<16x32xf32> to vector<8x8xf32>
    %44 = vector.extract_strided_slice %18 {offsets = [8, 0], sizes = [8, 8], strides = [1, 1]} : vector<16x32xf32> to vector<8x8xf32>
    %45 = vector.extract_strided_slice %18 {offsets = [8, 8], sizes = [8, 8], strides = [1, 1]} : vector<16x32xf32> to vector<8x8xf32>
    %46 = vector.extract_strided_slice %18 {offsets = [8, 16], sizes = [8, 8], strides = [1, 1]} : vector<16x32xf32> to vector<8x8xf32>
    %47 = vector.extract_strided_slice %18 {offsets = [8, 24], sizes = [8, 8], strides = [1, 1]} : vector<16x32xf32> to vector<8x8xf32>
    %48 = vector.shape_cast %40 : vector<8x8xf32> to vector<1x8x8xf32>
    %49 = vector.shape_cast %41 : vector<8x8xf32> to vector<1x8x8xf32>
    %50 = vector.shape_cast %42 : vector<8x8xf32> to vector<1x8x8xf32>
    %51 = vector.shape_cast %43 : vector<8x8xf32> to vector<1x8x8xf32>
    %52 = vector.shape_cast %44 : vector<8x8xf32> to vector<1x8x8xf32>
    %53 = vector.shape_cast %45 : vector<8x8xf32> to vector<1x8x8xf32>
    %54 = vector.shape_cast %46 : vector<8x8xf32> to vector<1x8x8xf32>
    %55 = vector.shape_cast %47 : vector<8x8xf32> to vector<1x8x8xf32>
    %56 = tpu.concatenate %48, %49, %50, %51, %52, %53, %54, %55 in 0 : vector<1x8x8xf32>, vector<1x8x8xf32>, vector<1x8x8xf32>, vector<1x8x8xf32>, vector<1x8x8xf32>, vector<1x8x8xf32>, vector<1x8x8xf32>, vector<1x8x8xf32> -> vector<8x8x8xf32>
    %57 = arith.truncf %56 : vector<8x8x8xf32> to vector<8x8x8xbf16>
    %58 = vector.extract_strided_slice %19 {offsets = [0, 0], sizes = [8, 8], strides = [1, 1]} : vector<16x32xf32> to vector<8x8xf32>
    %59 = vector.extract_strided_slice %19 {offsets = [0, 8], sizes = [8, 8], strides = [1, 1]} : vector<16x32xf32> to vector<8x8xf32>
    %60 = vector.extract_strided_slice %19 {offsets = [0, 16], sizes = [8, 8], strides = [1, 1]} : vector<16x32xf32> to vector<8x8xf32>
    %61 = vector.extract_strided_slice %19 {offsets = [0, 24], sizes = [8, 8], strides = [1, 1]} : vector<16x32xf32> to vector<8x8xf32>
    %62 = vector.extract_strided_slice %19 {offsets = [8, 0], sizes = [8, 8], strides = [1, 1]} : vector<16x32xf32> to vector<8x8xf32>
    %63 = vector.extract_strided_slice %19 {offsets = [8, 8], sizes = [8, 8], strides = [1, 1]} : vector<16x32xf32> to vector<8x8xf32>
    %64 = vector.extract_strided_slice %19 {offsets = [8, 16], sizes = [8, 8], strides = [1, 1]} : vector<16x32xf32> to vector<8x8xf32>
    %65 = vector.extract_strided_slice %19 {offsets = [8, 24], sizes = [8, 8], strides = [1, 1]} : vector<16x32xf32> to vector<8x8xf32>
    %66 = vector.shape_cast %58 : vector<8x8xf32> to vector<1x8x8xf32>
    %67 = vector.shape_cast %59 : vector<8x8xf32> to vector<1x8x8xf32>
    %68 = vector.shape_cast %60 : vector<8x8xf32> to vector<1x8x8xf32>
    %69 = vector.shape_cast %61 : vector<8x8xf32> to vector<1x8x8xf32>
    %70 = vector.shape_cast %62 : vector<8x8xf32> to vector<1x8x8xf32>
    %71 = vector.shape_cast %63 : vector<8x8xf32> to vector<1x8x8xf32>
    %72 = vector.shape_cast %64 : vector<8x8xf32> to vector<1x8x8xf32>
    %73 = vector.shape_cast %65 : vector<8x8xf32> to vector<1x8x8xf32>
    %74 = tpu.concatenate %66, %67, %68, %69, %70, %71, %72, %73 in 0 : vector<1x8x8xf32>, vector<1x8x8xf32>, vector<1x8x8xf32>, vector<1x8x8xf32>, vector<1x8x8xf32>, vector<1x8x8xf32>, vector<1x8x8xf32>, vector<1x8x8xf32> -> vector<8x8x8xf32>
    %75 = arith.truncf %74 : vector<8x8x8xf32> to vector<8x8x8xbf16>
    "tpu.trace_start"() <{level = 10 : i32, message = "nqd,nkd->nqk"}> : () -> ()
    %cst_12 = arith.constant dense<0.000000e+00> : vector<8x8x8xf32>
    %76 = tpu.matmul %39, %57, %cst_12 {dimension_numbers = #tpu.dot_dimension_numbers<[2], [2], [1], [1], [0, 0, 0, 1, 1, 1], [0], [0]>} : vector<8x8x8xbf16>, vector<8x8x8xbf16>, vector<8x8x8xf32> -> vector<8x8x8xf32>
    "tpu.trace_stop"() : () -> ()
    %77 = arith.addf %76, %21 : vector<8x8x8xf32>
    %cst_13 = arith.constant dense<0xFF800000> : vector<8x8xf32>
    %78 = vector.multi_reduction <maximumf>, %77, %cst_13 [2] : vector<8x8x8xf32> to vector<8x8xf32>
    %79 = vector.shape_cast %78 : vector<8x8xf32> to vector<8x8x1xf32>
    %80 = vector.broadcast %79 : vector<8x8x1xf32> to vector<8x8x8xf32>
    %81 = arith.subf %77, %80 : vector<8x8x8xf32>
    %82 = math.exp %81 : vector<8x8x8xf32>
    %cst_14 = arith.constant dense<0.000000e+00> : vector<8x8xf32>
    %83 = vector.multi_reduction <add>, %82, %cst_14 [2] : vector<8x8x8xf32> to vector<8x8xf32>
    %84 = vector.shape_cast %83 : vector<8x8xf32> to vector<8x8x1xf32>
    %85 = vector.broadcast %84 : vector<8x8x1xf32> to vector<8x8x8xf32>
    %86 = arith.divf %82, %85 : vector<8x8x8xf32>
    %87 = arith.truncf %86 : vector<8x8x8xf32> to vector<8x8x8xbf16>
    "tpu.trace_start"() <{level = 10 : i32, message = "nqk,nkd->nqd"}> : () -> ()
    %cst_15 = arith.constant dense<0.000000e+00> : vector<8x8x8xf32>
    %88 = tpu.matmul %87, %75, %cst_15 {dimension_numbers = #tpu.dot_dimension_numbers<[2], [1], [1], [2], [0, 0, 0, 1, 1, 2], [0], [0]>} : vector<8x8x8xbf16>, vector<8x8x8xbf16>, vector<8x8x8xf32> -> vector<8x8x8xf32>
    "tpu.trace_stop"() : () -> ()
    %89 = vector.extract_strided_slice %88 {offsets = [0, 0, 0], sizes = [1, 8, 8], strides = [1, 1, 1]} : vector<8x8x8xf32> to vector<1x8x8xf32>
    %90 = vector.shape_cast %89 : vector<1x8x8xf32> to vector<8x8xf32>
    %91 = vector.extract_strided_slice %88 {offsets = [1, 0, 0], sizes = [1, 8, 8], strides = [1, 1, 1]} : vector<8x8x8xf32> to vector<1x8x8xf32>
    %92 = vector.shape_cast %91 : vector<1x8x8xf32> to vector<8x8xf32>
    %93 = vector.extract_strided_slice %88 {offsets = [2, 0, 0], sizes = [1, 8, 8], strides = [1, 1, 1]} : vector<8x8x8xf32> to vector<1x8x8xf32>
    %94 = vector.shape_cast %93 : vector<1x8x8xf32> to vector<8x8xf32>
    %95 = vector.extract_strided_slice %88 {offsets = [3, 0, 0], sizes = [1, 8, 8], strides = [1, 1, 1]} : vector<8x8x8xf32> to vector<1x8x8xf32>
    %96 = vector.shape_cast %95 : vector<1x8x8xf32> to vector<8x8xf32>
    %97 = tpu.concatenate %90, %92, %94, %96 in 1 : vector<8x8xf32>, vector<8x8xf32>, vector<8x8xf32>, vector<8x8xf32> -> vector<8x32xf32>
    %98 = vector.extract_strided_slice %88 {offsets = [4, 0, 0], sizes = [1, 8, 8], strides = [1, 1, 1]} : vector<8x8x8xf32> to vector<1x8x8xf32>
    %99 = vector.shape_cast %98 : vector<1x8x8xf32> to vector<8x8xf32>
    %100 = vector.extract_strided_slice %88 {offsets = [5, 0, 0], sizes = [1, 8, 8], strides = [1, 1, 1]} : vector<8x8x8xf32> to vector<1x8x8xf32>
    %101 = vector.shape_cast %100 : vector<1x8x8xf32> to vector<8x8xf32>
    %102 = vector.extract_strided_slice %88 {offsets = [6, 0, 0], sizes = [1, 8, 8], strides = [1, 1, 1]} : vector<8x8x8xf32> to vector<1x8x8xf32>
    %103 = vector.shape_cast %102 : vector<1x8x8xf32> to vector<8x8xf32>
    %104 = vector.extract_strided_slice %88 {offsets = [7, 0, 0], sizes = [1, 8, 8], strides = [1, 1, 1]} : vector<8x8x8xf32> to vector<1x8x8xf32>
    %105 = vector.shape_cast %104 : vector<1x8x8xf32> to vector<8x8xf32>
    %106 = tpu.concatenate %99, %101, %103, %105 in 1 : vector<8x8xf32>, vector<8x8xf32>, vector<8x8xf32>, vector<8x8xf32> -> vector<8x32xf32>
    %107 = tpu.concatenate %97, %106 in 0 : vector<8x32xf32>, vector<8x32xf32> -> vector<16x32xf32>
    %c32 = arith.constant 32 : index
    %c0_16 = arith.constant 0 : index
    %108 = vector.load %arg3[%c32, %c0_16] : memref<448x128xbf16, #tpu.memory_space<vmem>>, vector<32x32xbf16>
    %109 = arith.truncf %107 : vector<16x32xf32> to vector<16x32xbf16>
    %cst_17 = arith.constant dense<0.000000e+00> : vector<16x32xf32>
    %110 = tpu.matmul %109, %108, %cst_17 {dimension_numbers = #tpu.dot_dimension_numbers<[1], [0], [0], [1], [0, 0, 1, 1], [], []>} : vector<16x32xbf16>, vector<32x32xbf16>, vector<16x32xf32> -> vector<16x32xf32>
    %111 = arith.addf %0, %110 : vector<16x32xf32>
    %c1 = arith.constant 1 : index
    %c0_18 = arith.constant 0 : index
    %112 = vector.load %arg4[%c1, %c0_18] : memref<8x32xf32, #tpu.memory_space<vmem>>, vector<1x32xf32>
    %113 = arith.mulf %111, %111 : vector<16x32xf32>
    %cst_19 = arith.constant dense<0.000000e+00> : vector<16xf32>
    %114 = vector.multi_reduction <add>, %113, %cst_19 [1] : vector<16x32xf32> to vector<16xf32>
    %115 = vector.shape_cast %114 : vector<16xf32> to vector<16x1xf32>
    %cst_20 = arith.constant 3.200000e+01 : f32
    %116 = vector.broadcast %cst_20 : f32 to vector<16x1xf32>
    %117 = arith.divf %115, %116 : vector<16x1xf32>
    %cst_21 = arith.constant 9.99999997E-7 : f32
    %118 = vector.broadcast %cst_21 : f32 to vector<16x1xf32>
    %119 = arith.addf %117, %118 : vector<16x1xf32>
    %120 = math.rsqrt %119 : vector<16x1xf32>
    %121 = vector.broadcast %120 : vector<16x1xf32> to vector<16x32xf32>
    %122 = arith.mulf %111, %121 : vector<16x32xf32>
    %123 = vector.broadcast %112 : vector<1x32xf32> to vector<16x32xf32>
    %124 = arith.mulf %122, %123 : vector<16x32xf32>
    %c64 = arith.constant 64 : index
    %c0_22 = arith.constant 0 : index
    %125 = vector.load %arg3[%c64, %c0_22] : memref<448x128xbf16, #tpu.memory_space<vmem>>, vector<32x64xbf16>
    %126 = arith.truncf %124 : vector<16x32xf32> to vector<16x32xbf16>
    %cst_23 = arith.constant dense<0.000000e+00> : vector<16x64xf32>
    %127 = tpu.matmul %126, %125, %cst_23 {dimension_numbers = #tpu.dot_dimension_numbers<[1], [0], [0], [1], [0, 0, 1, 1], [], []>} : vector<16x32xbf16>, vector<32x64xbf16>, vector<16x64xf32> -> vector<16x64xf32>
    %cst_24 = arith.constant 0.000000e+00 : f32
    %128 = vector.broadcast %cst_24 : f32 to vector<16x64xf32>
    %129 = arith.maximumf %127, %128 : vector<16x64xf32>
    %c96 = arith.constant 96 : index
    %c0_25 = arith.constant 0 : index
    %130 = vector.load %arg3[%c96, %c0_25] : memref<448x128xbf16, #tpu.memory_space<vmem>>, vector<64x32xbf16>
    %131 = arith.truncf %129 : vector<16x64xf32> to vector<16x64xbf16>
    %cst_26 = arith.constant dense<0.000000e+00> : vector<16x32xf32>
    %132 = tpu.matmul %131, %130, %cst_26 {dimension_numbers = #tpu.dot_dimension_numbers<[1], [0], [0], [1], [0, 0, 1, 1], [], []>} : vector<16x64xbf16>, vector<64x32xbf16>, vector<16x32xf32> -> vector<16x32xf32>
    %133 = arith.addf %111, %132 : vector<16x32xf32>
    %c2 = arith.constant 2 : index
    %c0_27 = arith.constant 0 : index
    %134 = vector.load %arg4[%c2, %c0_27] : memref<8x32xf32, #tpu.memory_space<vmem>>, vector<1x32xf32>
    %135 = arith.mulf %133, %133 : vector<16x32xf32>
    %cst_28 = arith.constant dense<0.000000e+00> : vector<16xf32>
    %136 = vector.multi_reduction <add>, %135, %cst_28 [1] : vector<16x32xf32> to vector<16xf32>
    %137 = vector.shape_cast %136 : vector<16xf32> to vector<16x1xf32>
    %cst_29 = arith.constant 3.200000e+01 : f32
    %138 = vector.broadcast %cst_29 : f32 to vector<16x1xf32>
    %139 = arith.divf %137, %138 : vector<16x1xf32>
    %cst_30 = arith.constant 9.99999997E-7 : f32
    %140 = vector.broadcast %cst_30 : f32 to vector<16x1xf32>
    %141 = arith.addf %139, %140 : vector<16x1xf32>
    %142 = math.rsqrt %141 : vector<16x1xf32>
    %143 = vector.broadcast %142 : vector<16x1xf32> to vector<16x32xf32>
    %144 = arith.mulf %133, %143 : vector<16x32xf32>
    %145 = vector.broadcast %134 : vector<1x32xf32> to vector<16x32xf32>
    %146 = arith.mulf %144, %145 : vector<16x32xf32>
    %c16 = arith.constant 16 : index
    %c0_31 = arith.constant 0 : index
    %147 = vector.load %arg0[%c16, %c0_31] : memref<32x32xf32, #tpu.memory_space<vmem>>, vector<16x32xf32>
    %c3 = arith.constant 3 : index
    %c0_32 = arith.constant 0 : index
    %148 = vector.load %arg4[%c3, %c0_32] : memref<8x32xf32, #tpu.memory_space<vmem>>, vector<1x32xf32>
    %149 = arith.mulf %147, %147 : vector<16x32xf32>
    %cst_33 = arith.constant dense<0.000000e+00> : vector<16xf32>
    %150 = vector.multi_reduction <add>, %149, %cst_33 [1] : vector<16x32xf32> to vector<16xf32>
    %151 = vector.shape_cast %150 : vector<16xf32> to vector<16x1xf32>
    %cst_34 = arith.constant 3.200000e+01 : f32
    %152 = vector.broadcast %cst_34 : f32 to vector<16x1xf32>
    %153 = arith.divf %151, %152 : vector<16x1xf32>
    %cst_35 = arith.constant 9.99999997E-7 : f32
    %154 = vector.broadcast %cst_35 : f32 to vector<16x1xf32>
    %155 = arith.addf %153, %154 : vector<16x1xf32>
    %156 = math.rsqrt %155 : vector<16x1xf32>
    %157 = vector.broadcast %156 : vector<16x1xf32> to vector<16x32xf32>
    %158 = arith.mulf %147, %157 : vector<16x32xf32>
    %159 = vector.broadcast %148 : vector<1x32xf32> to vector<16x32xf32>
    %160 = arith.mulf %158, %159 : vector<16x32xf32>
    %c160 = arith.constant 160 : index
    %c0_36 = arith.constant 0 : index
    %161 = vector.load %arg3[%c160, %c0_36] : memref<448x128xbf16, #tpu.memory_space<vmem>>, vector<32x96xbf16>
    %162 = arith.truncf %160 : vector<16x32xf32> to vector<16x32xbf16>
    %cst_37 = arith.constant dense<0.000000e+00> : vector<16x96xf32>
    %163 = tpu.matmul %162, %161, %cst_37 {dimension_numbers = #tpu.dot_dimension_numbers<[1], [0], [0], [1], [0, 0, 1, 1], [], []>} : vector<16x32xbf16>, vector<32x96xbf16>, vector<16x96xf32> -> vector<16x96xf32>
    %164 = vector.extract_strided_slice %163 {offsets = [0, 0], sizes = [16, 32], strides = [1, 1]} : vector<16x96xf32> to vector<16x32xf32>
    %165 = vector.extract_strided_slice %163 {offsets = [0, 32], sizes = [16, 32], strides = [1, 1]} : vector<16x96xf32> to vector<16x32xf32>
    %166 = vector.extract_strided_slice %163 {offsets = [0, 64], sizes = [16, 32], strides = [1, 1]} : vector<16x96xf32> to vector<16x32xf32>
    %c1_38 = arith.constant 1 : index
    %c0_39 = arith.constant 0 : index
    %c0_40 = arith.constant 0 : index
    %c0_41 = arith.constant 0 : index
    %167 = vector.load %arg1[%c1_38, %c0_39, %c0_40, %c0_41] : memref<3x8x8x8xf32, #tpu.memory_space<vmem>>, vector<1x8x8x8xf32>
    %168 = vector.shape_cast %167 : vector<1x8x8x8xf32> to vector<8x8x8xf32>
    %169 = vector.extract_strided_slice %164 {offsets = [0, 0], sizes = [8, 8], strides = [1, 1]} : vector<16x32xf32> to vector<8x8xf32>
    %170 = vector.extract_strided_slice %164 {offsets = [0, 8], sizes = [8, 8], strides = [1, 1]} : vector<16x32xf32> to vector<8x8xf32>
    %171 = vector.extract_strided_slice %164 {offsets = [0, 16], sizes = [8, 8], strides = [1, 1]} : vector<16x32xf32> to vector<8x8xf32>
    %172 = vector.extract_strided_slice %164 {offsets = [0, 24], sizes = [8, 8], strides = [1, 1]} : vector<16x32xf32> to vector<8x8xf32>
    %173 = vector.extract_strided_slice %164 {offsets = [8, 0], sizes = [8, 8], strides = [1, 1]} : vector<16x32xf32> to vector<8x8xf32>
    %174 = vector.extract_strided_slice %164 {offsets = [8, 8], sizes = [8, 8], strides = [1, 1]} : vector<16x32xf32> to vector<8x8xf32>
    %175 = vector.extract_strided_slice %164 {offsets = [8, 16], sizes = [8, 8], strides = [1, 1]} : vector<16x32xf32> to vector<8x8xf32>
    %176 = vector.extract_strided_slice %164 {offsets = [8, 24], sizes = [8, 8], strides = [1, 1]} : vector<16x32xf32> to vector<8x8xf32>
    %177 = vector.shape_cast %169 : vector<8x8xf32> to vector<1x8x8xf32>
    %178 = vector.shape_cast %170 : vector<8x8xf32> to vector<1x8x8xf32>
    %179 = vector.shape_cast %171 : vector<8x8xf32> to vector<1x8x8xf32>
    %180 = vector.shape_cast %172 : vector<8x8xf32> to vector<1x8x8xf32>
    %181 = vector.shape_cast %173 : vector<8x8xf32> to vector<1x8x8xf32>
    %182 = vector.shape_cast %174 : vector<8x8xf32> to vector<1x8x8xf32>
    %183 = vector.shape_cast %175 : vector<8x8xf32> to vector<1x8x8xf32>
    %184 = vector.shape_cast %176 : vector<8x8xf32> to vector<1x8x8xf32>
    %185 = tpu.concatenate %177, %178, %179, %180, %181, %182, %183, %184 in 0 : vector<1x8x8xf32>, vector<1x8x8xf32>, vector<1x8x8xf32>, vector<1x8x8xf32>, vector<1x8x8xf32>, vector<1x8x8xf32>, vector<1x8x8xf32>, vector<1x8x8xf32> -> vector<8x8x8xf32>
    %186 = arith.truncf %185 : vector<8x8x8xf32> to vector<8x8x8xbf16>
    %187 = vector.extract_strided_slice %165 {offsets = [0, 0], sizes = [8, 8], strides = [1, 1]} : vector<16x32xf32> to vector<8x8xf32>
    %188 = vector.extract_strided_slice %165 {offsets = [0, 8], sizes = [8, 8], strides = [1, 1]} : vector<16x32xf32> to vector<8x8xf32>
    %189 = vector.extract_strided_slice %165 {offsets = [0, 16], sizes = [8, 8], strides = [1, 1]} : vector<16x32xf32> to vector<8x8xf32>
    %190 = vector.extract_strided_slice %165 {offsets = [0, 24], sizes = [8, 8], strides = [1, 1]} : vector<16x32xf32> to vector<8x8xf32>
    %191 = vector.extract_strided_slice %165 {offsets = [8, 0], sizes = [8, 8], strides = [1, 1]} : vector<16x32xf32> to vector<8x8xf32>
    %192 = vector.extract_strided_slice %165 {offsets = [8, 8], sizes = [8, 8], strides = [1, 1]} : vector<16x32xf32> to vector<8x8xf32>
    %193 = vector.extract_strided_slice %165 {offsets = [8, 16], sizes = [8, 8], strides = [1, 1]} : vector<16x32xf32> to vector<8x8xf32>
    %194 = vector.extract_strided_slice %165 {offsets = [8, 24], sizes = [8, 8], strides = [1, 1]} : vector<16x32xf32> to vector<8x8xf32>
    %195 = vector.shape_cast %187 : vector<8x8xf32> to vector<1x8x8xf32>
    %196 = vector.shape_cast %188 : vector<8x8xf32> to vector<1x8x8xf32>
    %197 = vector.shape_cast %189 : vector<8x8xf32> to vector<1x8x8xf32>
    %198 = vector.shape_cast %190 : vector<8x8xf32> to vector<1x8x8xf32>
    %199 = vector.shape_cast %191 : vector<8x8xf32> to vector<1x8x8xf32>
    %200 = vector.shape_cast %192 : vector<8x8xf32> to vector<1x8x8xf32>
    %201 = vector.shape_cast %193 : vector<8x8xf32> to vector<1x8x8xf32>
    %202 = vector.shape_cast %194 : vector<8x8xf32> to vector<1x8x8xf32>
    %203 = tpu.concatenate %195, %196, %197, %198, %199, %200, %201, %202 in 0 : vector<1x8x8xf32>, vector<1x8x8xf32>, vector<1x8x8xf32>, vector<1x8x8xf32>, vector<1x8x8xf32>, vector<1x8x8xf32>, vector<1x8x8xf32>, vector<1x8x8xf32> -> vector<8x8x8xf32>
    %204 = arith.truncf %203 : vector<8x8x8xf32> to vector<8x8x8xbf16>
    %205 = vector.extract_strided_slice %166 {offsets = [0, 0], sizes = [8, 8], strides = [1, 1]} : vector<16x32xf32> to vector<8x8xf32>
    %206 = vector.extract_strided_slice %166 {offsets = [0, 8], sizes = [8, 8], strides = [1, 1]} : vector<16x32xf32> to vector<8x8xf32>
    %207 = vector.extract_strided_slice %166 {offsets = [0, 16], sizes = [8, 8], strides = [1, 1]} : vector<16x32xf32> to vector<8x8xf32>
    %208 = vector.extract_strided_slice %166 {offsets = [0, 24], sizes = [8, 8], strides = [1, 1]} : vector<16x32xf32> to vector<8x8xf32>
    %209 = vector.extract_strided_slice %166 {offsets = [8, 0], sizes = [8, 8], strides = [1, 1]} : vector<16x32xf32> to vector<8x8xf32>
    %210 = vector.extract_strided_slice %166 {offsets = [8, 8], sizes = [8, 8], strides = [1, 1]} : vector<16x32xf32> to vector<8x8xf32>
    %211 = vector.extract_strided_slice %166 {offsets = [8, 16], sizes = [8, 8], strides = [1, 1]} : vector<16x32xf32> to vector<8x8xf32>
    %212 = vector.extract_strided_slice %166 {offsets = [8, 24], sizes = [8, 8], strides = [1, 1]} : vector<16x32xf32> to vector<8x8xf32>
    %213 = vector.shape_cast %205 : vector<8x8xf32> to vector<1x8x8xf32>
    %214 = vector.shape_cast %206 : vector<8x8xf32> to vector<1x8x8xf32>
    %215 = vector.shape_cast %207 : vector<8x8xf32> to vector<1x8x8xf32>
    %216 = vector.shape_cast %208 : vector<8x8xf32> to vector<1x8x8xf32>
    %217 = vector.shape_cast %209 : vector<8x8xf32> to vector<1x8x8xf32>
    %218 = vector.shape_cast %210 : vector<8x8xf32> to vector<1x8x8xf32>
    %219 = vector.shape_cast %211 : vector<8x8xf32> to vector<1x8x8xf32>
    %220 = vector.shape_cast %212 : vector<8x8xf32> to vector<1x8x8xf32>
    %221 = tpu.concatenate %213, %214, %215, %216, %217, %218, %219, %220 in 0 : vector<1x8x8xf32>, vector<1x8x8xf32>, vector<1x8x8xf32>, vector<1x8x8xf32>, vector<1x8x8xf32>, vector<1x8x8xf32>, vector<1x8x8xf32>, vector<1x8x8xf32> -> vector<8x8x8xf32>
    %222 = arith.truncf %221 : vector<8x8x8xf32> to vector<8x8x8xbf16>
    "tpu.trace_start"() <{level = 10 : i32, message = "nqd,nkd->nqk"}> : () -> ()
    %cst_42 = arith.constant dense<0.000000e+00> : vector<8x8x8xf32>
    %223 = tpu.matmul %186, %204, %cst_42 {dimension_numbers = #tpu.dot_dimension_numbers<[2], [2], [1], [1], [0, 0, 0, 1, 1, 1], [0], [0]>} : vector<8x8x8xbf16>, vector<8x8x8xbf16>, vector<8x8x8xf32> -> vector<8x8x8xf32>
    "tpu.trace_stop"() : () -> ()
    %224 = arith.addf %223, %168 : vector<8x8x8xf32>
    %cst_43 = arith.constant dense<0xFF800000> : vector<8x8xf32>
    %225 = vector.multi_reduction <maximumf>, %224, %cst_43 [2] : vector<8x8x8xf32> to vector<8x8xf32>
    %226 = vector.shape_cast %225 : vector<8x8xf32> to vector<8x8x1xf32>
    %227 = vector.broadcast %226 : vector<8x8x1xf32> to vector<8x8x8xf32>
    %228 = arith.subf %224, %227 : vector<8x8x8xf32>
    %229 = math.exp %228 : vector<8x8x8xf32>
    %cst_44 = arith.constant dense<0.000000e+00> : vector<8x8xf32>
    %230 = vector.multi_reduction <add>, %229, %cst_44 [2] : vector<8x8x8xf32> to vector<8x8xf32>
    %231 = vector.shape_cast %230 : vector<8x8xf32> to vector<8x8x1xf32>
    %232 = vector.broadcast %231 : vector<8x8x1xf32> to vector<8x8x8xf32>
    %233 = arith.divf %229, %232 : vector<8x8x8xf32>
    %234 = arith.truncf %233 : vector<8x8x8xf32> to vector<8x8x8xbf16>
    "tpu.trace_start"() <{level = 10 : i32, message = "nqk,nkd->nqd"}> : () -> ()
    %cst_45 = arith.constant dense<0.000000e+00> : vector<8x8x8xf32>
    %235 = tpu.matmul %234, %222, %cst_45 {dimension_numbers = #tpu.dot_dimension_numbers<[2], [1], [1], [2], [0, 0, 0, 1, 1, 2], [0], [0]>} : vector<8x8x8xbf16>, vector<8x8x8xbf16>, vector<8x8x8xf32> -> vector<8x8x8xf32>
    "tpu.trace_stop"() : () -> ()
    %236 = vector.extract_strided_slice %235 {offsets = [0, 0, 0], sizes = [1, 8, 8], strides = [1, 1, 1]} : vector<8x8x8xf32> to vector<1x8x8xf32>
    %237 = vector.shape_cast %236 : vector<1x8x8xf32> to vector<8x8xf32>
    %238 = vector.extract_strided_slice %235 {offsets = [1, 0, 0], sizes = [1, 8, 8], strides = [1, 1, 1]} : vector<8x8x8xf32> to vector<1x8x8xf32>
    %239 = vector.shape_cast %238 : vector<1x8x8xf32> to vector<8x8xf32>
    %240 = vector.extract_strided_slice %235 {offsets = [2, 0, 0], sizes = [1, 8, 8], strides = [1, 1, 1]} : vector<8x8x8xf32> to vector<1x8x8xf32>
    %241 = vector.shape_cast %240 : vector<1x8x8xf32> to vector<8x8xf32>
    %242 = vector.extract_strided_slice %235 {offsets = [3, 0, 0], sizes = [1, 8, 8], strides = [1, 1, 1]} : vector<8x8x8xf32> to vector<1x8x8xf32>
    %243 = vector.shape_cast %242 : vector<1x8x8xf32> to vector<8x8xf32>
    %244 = tpu.concatenate %237, %239, %241, %243 in 1 : vector<8x8xf32>, vector<8x8xf32>, vector<8x8xf32>, vector<8x8xf32> -> vector<8x32xf32>
    %245 = vector.extract_strided_slice %235 {offsets = [4, 0, 0], sizes = [1, 8, 8], strides = [1, 1, 1]} : vector<8x8x8xf32> to vector<1x8x8xf32>
    %246 = vector.shape_cast %245 : vector<1x8x8xf32> to vector<8x8xf32>
    %247 = vector.extract_strided_slice %235 {offsets = [5, 0, 0], sizes = [1, 8, 8], strides = [1, 1, 1]} : vector<8x8x8xf32> to vector<1x8x8xf32>
    %248 = vector.shape_cast %247 : vector<1x8x8xf32> to vector<8x8xf32>
    %249 = vector.extract_strided_slice %235 {offsets = [6, 0, 0], sizes = [1, 8, 8], strides = [1, 1, 1]} : vector<8x8x8xf32> to vector<1x8x8xf32>
    %250 = vector.shape_cast %249 : vector<1x8x8xf32> to vector<8x8xf32>
    %251 = vector.extract_strided_slice %235 {offsets = [7, 0, 0], sizes = [1, 8, 8], strides = [1, 1, 1]} : vector<8x8x8xf32> to vector<1x8x8xf32>
    %252 = vector.shape_cast %251 : vector<1x8x8xf32> to vector<8x8xf32>
    %253 = tpu.concatenate %246, %248, %250, %252 in 1 : vector<8x8xf32>, vector<8x8xf32>, vector<8x8xf32>, vector<8x8xf32> -> vector<8x32xf32>
    %254 = tpu.concatenate %244, %253 in 0 : vector<8x32xf32>, vector<8x32xf32> -> vector<16x32xf32>
    %c192 = arith.constant 192 : index
    %c0_46 = arith.constant 0 : index
    %255 = vector.load %arg3[%c192, %c0_46] : memref<448x128xbf16, #tpu.memory_space<vmem>>, vector<32x32xbf16>
    %256 = arith.truncf %254 : vector<16x32xf32> to vector<16x32xbf16>
    %cst_47 = arith.constant dense<0.000000e+00> : vector<16x32xf32>
    %257 = tpu.matmul %256, %255, %cst_47 {dimension_numbers = #tpu.dot_dimension_numbers<[1], [0], [0], [1], [0, 0, 1, 1], [], []>} : vector<16x32xbf16>, vector<32x32xbf16>, vector<16x32xf32> -> vector<16x32xf32>
    %258 = arith.addf %147, %257 : vector<16x32xf32>
    %c4 = arith.constant 4 : index
    %c0_48 = arith.constant 0 : index
    %259 = vector.load %arg4[%c4, %c0_48] : memref<8x32xf32, #tpu.memory_space<vmem>>, vector<1x32xf32>
    %260 = arith.mulf %258, %258 : vector<16x32xf32>
    %cst_49 = arith.constant dense<0.000000e+00> : vector<16xf32>
    %261 = vector.multi_reduction <add>, %260, %cst_49 [1] : vector<16x32xf32> to vector<16xf32>
    %262 = vector.shape_cast %261 : vector<16xf32> to vector<16x1xf32>
    %cst_50 = arith.constant 3.200000e+01 : f32
    %263 = vector.broadcast %cst_50 : f32 to vector<16x1xf32>
    %264 = arith.divf %262, %263 : vector<16x1xf32>
    %cst_51 = arith.constant 9.99999997E-7 : f32
    %265 = vector.broadcast %cst_51 : f32 to vector<16x1xf32>
    %266 = arith.addf %264, %265 : vector<16x1xf32>
    %267 = math.rsqrt %266 : vector<16x1xf32>
    %268 = vector.broadcast %267 : vector<16x1xf32> to vector<16x32xf32>
    %269 = arith.mulf %258, %268 : vector<16x32xf32>
    %270 = vector.broadcast %259 : vector<1x32xf32> to vector<16x32xf32>
    %271 = arith.mulf %269, %270 : vector<16x32xf32>
    %c224 = arith.constant 224 : index
    %c0_52 = arith.constant 0 : index
    %272 = vector.load %arg3[%c224, %c0_52] : memref<448x128xbf16, #tpu.memory_space<vmem>>, vector<32x32xbf16>
    %273 = arith.truncf %271 : vector<16x32xf32> to vector<16x32xbf16>
    %cst_53 = arith.constant dense<0.000000e+00> : vector<16x32xf32>
    %274 = tpu.matmul %273, %272, %cst_53 {dimension_numbers = #tpu.dot_dimension_numbers<[1], [0], [0], [1], [0, 0, 1, 1], [], []>} : vector<16x32xbf16>, vector<32x32xbf16>, vector<16x32xf32> -> vector<16x32xf32>
    %c256 = arith.constant 256 : index
    %c0_54 = arith.constant 0 : index
    %275 = vector.load %arg3[%c256, %c0_54] : memref<448x128xbf16, #tpu.memory_space<vmem>>, vector<32x64xbf16>
    %276 = arith.truncf %146 : vector<16x32xf32> to vector<16x32xbf16>
    %cst_55 = arith.constant dense<0.000000e+00> : vector<16x64xf32>
    %277 = tpu.matmul %276, %275, %cst_55 {dimension_numbers = #tpu.dot_dimension_numbers<[1], [0], [0], [1], [0, 0, 1, 1], [], []>} : vector<16x32xbf16>, vector<32x64xbf16>, vector<16x64xf32> -> vector<16x64xf32>
    %278 = vector.extract_strided_slice %277 {offsets = [0, 0], sizes = [16, 32], strides = [1, 1]} : vector<16x64xf32> to vector<16x32xf32>
    %279 = vector.extract_strided_slice %277 {offsets = [0, 32], sizes = [16, 32], strides = [1, 1]} : vector<16x64xf32> to vector<16x32xf32>
    %c2_56 = arith.constant 2 : index
    %c0_57 = arith.constant 0 : index
    %c0_58 = arith.constant 0 : index
    %c0_59 = arith.constant 0 : index
    %280 = vector.load %arg1[%c2_56, %c0_57, %c0_58, %c0_59] : memref<3x8x8x8xf32, #tpu.memory_space<vmem>>, vector<1x8x8x8xf32>
    %281 = vector.shape_cast %280 : vector<1x8x8x8xf32> to vector<8x8x8xf32>
    %282 = vector.extract_strided_slice %274 {offsets = [0, 0], sizes = [8, 8], strides = [1, 1]} : vector<16x32xf32> to vector<8x8xf32>
    %283 = vector.extract_strided_slice %274 {offsets = [0, 8], sizes = [8, 8], strides = [1, 1]} : vector<16x32xf32> to vector<8x8xf32>
    %284 = vector.extract_strided_slice %274 {offsets = [0, 16], sizes = [8, 8], strides = [1, 1]} : vector<16x32xf32> to vector<8x8xf32>
    %285 = vector.extract_strided_slice %274 {offsets = [0, 24], sizes = [8, 8], strides = [1, 1]} : vector<16x32xf32> to vector<8x8xf32>
    %286 = vector.extract_strided_slice %274 {offsets = [8, 0], sizes = [8, 8], strides = [1, 1]} : vector<16x32xf32> to vector<8x8xf32>
    %287 = vector.extract_strided_slice %274 {offsets = [8, 8], sizes = [8, 8], strides = [1, 1]} : vector<16x32xf32> to vector<8x8xf32>
    %288 = vector.extract_strided_slice %274 {offsets = [8, 16], sizes = [8, 8], strides = [1, 1]} : vector<16x32xf32> to vector<8x8xf32>
    %289 = vector.extract_strided_slice %274 {offsets = [8, 24], sizes = [8, 8], strides = [1, 1]} : vector<16x32xf32> to vector<8x8xf32>
    %290 = vector.shape_cast %282 : vector<8x8xf32> to vector<1x8x8xf32>
    %291 = vector.shape_cast %283 : vector<8x8xf32> to vector<1x8x8xf32>
    %292 = vector.shape_cast %284 : vector<8x8xf32> to vector<1x8x8xf32>
    %293 = vector.shape_cast %285 : vector<8x8xf32> to vector<1x8x8xf32>
    %294 = vector.shape_cast %286 : vector<8x8xf32> to vector<1x8x8xf32>
    %295 = vector.shape_cast %287 : vector<8x8xf32> to vector<1x8x8xf32>
    %296 = vector.shape_cast %288 : vector<8x8xf32> to vector<1x8x8xf32>
    %297 = vector.shape_cast %289 : vector<8x8xf32> to vector<1x8x8xf32>
    %298 = tpu.concatenate %290, %291, %292, %293, %294, %295, %296, %297 in 0 : vector<1x8x8xf32>, vector<1x8x8xf32>, vector<1x8x8xf32>, vector<1x8x8xf32>, vector<1x8x8xf32>, vector<1x8x8xf32>, vector<1x8x8xf32>, vector<1x8x8xf32> -> vector<8x8x8xf32>
    %299 = arith.truncf %298 : vector<8x8x8xf32> to vector<8x8x8xbf16>
    %300 = vector.extract_strided_slice %278 {offsets = [0, 0], sizes = [8, 8], strides = [1, 1]} : vector<16x32xf32> to vector<8x8xf32>
    %301 = vector.extract_strided_slice %278 {offsets = [0, 8], sizes = [8, 8], strides = [1, 1]} : vector<16x32xf32> to vector<8x8xf32>
    %302 = vector.extract_strided_slice %278 {offsets = [0, 16], sizes = [8, 8], strides = [1, 1]} : vector<16x32xf32> to vector<8x8xf32>
    %303 = vector.extract_strided_slice %278 {offsets = [0, 24], sizes = [8, 8], strides = [1, 1]} : vector<16x32xf32> to vector<8x8xf32>
    %304 = vector.extract_strided_slice %278 {offsets = [8, 0], sizes = [8, 8], strides = [1, 1]} : vector<16x32xf32> to vector<8x8xf32>
    %305 = vector.extract_strided_slice %278 {offsets = [8, 8], sizes = [8, 8], strides = [1, 1]} : vector<16x32xf32> to vector<8x8xf32>
    %306 = vector.extract_strided_slice %278 {offsets = [8, 16], sizes = [8, 8], strides = [1, 1]} : vector<16x32xf32> to vector<8x8xf32>
    %307 = vector.extract_strided_slice %278 {offsets = [8, 24], sizes = [8, 8], strides = [1, 1]} : vector<16x32xf32> to vector<8x8xf32>
    %308 = vector.shape_cast %300 : vector<8x8xf32> to vector<1x8x8xf32>
    %309 = vector.shape_cast %301 : vector<8x8xf32> to vector<1x8x8xf32>
    %310 = vector.shape_cast %302 : vector<8x8xf32> to vector<1x8x8xf32>
    %311 = vector.shape_cast %303 : vector<8x8xf32> to vector<1x8x8xf32>
    %312 = vector.shape_cast %304 : vector<8x8xf32> to vector<1x8x8xf32>
    %313 = vector.shape_cast %305 : vector<8x8xf32> to vector<1x8x8xf32>
    %314 = vector.shape_cast %306 : vector<8x8xf32> to vector<1x8x8xf32>
    %315 = vector.shape_cast %307 : vector<8x8xf32> to vector<1x8x8xf32>
    %316 = tpu.concatenate %308, %309, %310, %311, %312, %313, %314, %315 in 0 : vector<1x8x8xf32>, vector<1x8x8xf32>, vector<1x8x8xf32>, vector<1x8x8xf32>, vector<1x8x8xf32>, vector<1x8x8xf32>, vector<1x8x8xf32>, vector<1x8x8xf32> -> vector<8x8x8xf32>
    %317 = arith.truncf %316 : vector<8x8x8xf32> to vector<8x8x8xbf16>
    %318 = vector.extract_strided_slice %279 {offsets = [0, 0], sizes = [8, 8], strides = [1, 1]} : vector<16x32xf32> to vector<8x8xf32>
    %319 = vector.extract_strided_slice %279 {offsets = [0, 8], sizes = [8, 8], strides = [1, 1]} : vector<16x32xf32> to vector<8x8xf32>
    %320 = vector.extract_strided_slice %279 {offsets = [0, 16], sizes = [8, 8], strides = [1, 1]} : vector<16x32xf32> to vector<8x8xf32>
    %321 = vector.extract_strided_slice %279 {offsets = [0, 24], sizes = [8, 8], strides = [1, 1]} : vector<16x32xf32> to vector<8x8xf32>
    %322 = vector.extract_strided_slice %279 {offsets = [8, 0], sizes = [8, 8], strides = [1, 1]} : vector<16x32xf32> to vector<8x8xf32>
    %323 = vector.extract_strided_slice %279 {offsets = [8, 8], sizes = [8, 8], strides = [1, 1]} : vector<16x32xf32> to vector<8x8xf32>
    %324 = vector.extract_strided_slice %279 {offsets = [8, 16], sizes = [8, 8], strides = [1, 1]} : vector<16x32xf32> to vector<8x8xf32>
    %325 = vector.extract_strided_slice %279 {offsets = [8, 24], sizes = [8, 8], strides = [1, 1]} : vector<16x32xf32> to vector<8x8xf32>
    %326 = vector.shape_cast %318 : vector<8x8xf32> to vector<1x8x8xf32>
    %327 = vector.shape_cast %319 : vector<8x8xf32> to vector<1x8x8xf32>
    %328 = vector.shape_cast %320 : vector<8x8xf32> to vector<1x8x8xf32>
    %329 = vector.shape_cast %321 : vector<8x8xf32> to vector<1x8x8xf32>
    %330 = vector.shape_cast %322 : vector<8x8xf32> to vector<1x8x8xf32>
    %331 = vector.shape_cast %323 : vector<8x8xf32> to vector<1x8x8xf32>
    %332 = vector.shape_cast %324 : vector<8x8xf32> to vector<1x8x8xf32>
    %333 = vector.shape_cast %325 : vector<8x8xf32> to vector<1x8x8xf32>
    %334 = tpu.concatenate %326, %327, %328, %329, %330, %331, %332, %333 in 0 : vector<1x8x8xf32>, vector<1x8x8xf32>, vector<1x8x8xf32>, vector<1x8x8xf32>, vector<1x8x8xf32>, vector<1x8x8xf32>, vector<1x8x8xf32>, vector<1x8x8xf32> -> vector<8x8x8xf32>
    %335 = arith.truncf %334 : vector<8x8x8xf32> to vector<8x8x8xbf16>
    "tpu.trace_start"() <{level = 10 : i32, message = "nqd,nkd->nqk"}> : () -> ()
    %cst_60 = arith.constant dense<0.000000e+00> : vector<8x8x8xf32>
    %336 = tpu.matmul %299, %317, %cst_60 {dimension_numbers = #tpu.dot_dimension_numbers<[2], [2], [1], [1], [0, 0, 0, 1, 1, 1], [0], [0]>} : vector<8x8x8xbf16>, vector<8x8x8xbf16>, vector<8x8x8xf32> -> vector<8x8x8xf32>
    "tpu.trace_stop"() : () -> ()
    %337 = arith.addf %336, %281 : vector<8x8x8xf32>
    %cst_61 = arith.constant dense<0xFF800000> : vector<8x8xf32>
    %338 = vector.multi_reduction <maximumf>, %337, %cst_61 [2] : vector<8x8x8xf32> to vector<8x8xf32>
    %339 = vector.shape_cast %338 : vector<8x8xf32> to vector<8x8x1xf32>
    %340 = vector.broadcast %339 : vector<8x8x1xf32> to vector<8x8x8xf32>
    %341 = arith.subf %337, %340 : vector<8x8x8xf32>
    %342 = math.exp %341 : vector<8x8x8xf32>
    %cst_62 = arith.constant dense<0.000000e+00> : vector<8x8xf32>
    %343 = vector.multi_reduction <add>, %342, %cst_62 [2] : vector<8x8x8xf32> to vector<8x8xf32>
    %344 = vector.shape_cast %343 : vector<8x8xf32> to vector<8x8x1xf32>
    %345 = vector.broadcast %344 : vector<8x8x1xf32> to vector<8x8x8xf32>
    %346 = arith.divf %342, %345 : vector<8x8x8xf32>
    %347 = arith.truncf %346 : vector<8x8x8xf32> to vector<8x8x8xbf16>
    "tpu.trace_start"() <{level = 10 : i32, message = "nqk,nkd->nqd"}> : () -> ()
    %cst_63 = arith.constant dense<0.000000e+00> : vector<8x8x8xf32>
    %348 = tpu.matmul %347, %335, %cst_63 {dimension_numbers = #tpu.dot_dimension_numbers<[2], [1], [1], [2], [0, 0, 0, 1, 1, 2], [0], [0]>} : vector<8x8x8xbf16>, vector<8x8x8xbf16>, vector<8x8x8xf32> -> vector<8x8x8xf32>
    "tpu.trace_stop"() : () -> ()
    %349 = vector.extract_strided_slice %348 {offsets = [0, 0, 0], sizes = [1, 8, 8], strides = [1, 1, 1]} : vector<8x8x8xf32> to vector<1x8x8xf32>
    %350 = vector.shape_cast %349 : vector<1x8x8xf32> to vector<8x8xf32>
    %351 = vector.extract_strided_slice %348 {offsets = [1, 0, 0], sizes = [1, 8, 8], strides = [1, 1, 1]} : vector<8x8x8xf32> to vector<1x8x8xf32>
    %352 = vector.shape_cast %351 : vector<1x8x8xf32> to vector<8x8xf32>
    %353 = vector.extract_strided_slice %348 {offsets = [2, 0, 0], sizes = [1, 8, 8], strides = [1, 1, 1]} : vector<8x8x8xf32> to vector<1x8x8xf32>
    %354 = vector.shape_cast %353 : vector<1x8x8xf32> to vector<8x8xf32>
    %355 = vector.extract_strided_slice %348 {offsets = [3, 0, 0], sizes = [1, 8, 8], strides = [1, 1, 1]} : vector<8x8x8xf32> to vector<1x8x8xf32>
    %356 = vector.shape_cast %355 : vector<1x8x8xf32> to vector<8x8xf32>
    %357 = tpu.concatenate %350, %352, %354, %356 in 1 : vector<8x8xf32>, vector<8x8xf32>, vector<8x8xf32>, vector<8x8xf32> -> vector<8x32xf32>
    %358 = vector.extract_strided_slice %348 {offsets = [4, 0, 0], sizes = [1, 8, 8], strides = [1, 1, 1]} : vector<8x8x8xf32> to vector<1x8x8xf32>
    %359 = vector.shape_cast %358 : vector<1x8x8xf32> to vector<8x8xf32>
    %360 = vector.extract_strided_slice %348 {offsets = [5, 0, 0], sizes = [1, 8, 8], strides = [1, 1, 1]} : vector<8x8x8xf32> to vector<1x8x8xf32>
    %361 = vector.shape_cast %360 : vector<1x8x8xf32> to vector<8x8xf32>
    %362 = vector.extract_strided_slice %348 {offsets = [6, 0, 0], sizes = [1, 8, 8], strides = [1, 1, 1]} : vector<8x8x8xf32> to vector<1x8x8xf32>
    %363 = vector.shape_cast %362 : vector<1x8x8xf32> to vector<8x8xf32>
    %364 = vector.extract_strided_slice %348 {offsets = [7, 0, 0], sizes = [1, 8, 8], strides = [1, 1, 1]} : vector<8x8x8xf32> to vector<1x8x8xf32>
    %365 = vector.shape_cast %364 : vector<1x8x8xf32> to vector<8x8xf32>
    %366 = tpu.concatenate %359, %361, %363, %365 in 1 : vector<8x8xf32>, vector<8x8xf32>, vector<8x8xf32>, vector<8x8xf32> -> vector<8x32xf32>
    %367 = tpu.concatenate %357, %366 in 0 : vector<8x32xf32>, vector<8x32xf32> -> vector<16x32xf32>
    %c288 = arith.constant 288 : index
    %c0_64 = arith.constant 0 : index
    %368 = vector.load %arg3[%c288, %c0_64] : memref<448x128xbf16, #tpu.memory_space<vmem>>, vector<32x32xbf16>
    %369 = arith.truncf %367 : vector<16x32xf32> to vector<16x32xbf16>
    %cst_65 = arith.constant dense<0.000000e+00> : vector<16x32xf32>
    %370 = tpu.matmul %369, %368, %cst_65 {dimension_numbers = #tpu.dot_dimension_numbers<[1], [0], [0], [1], [0, 0, 1, 1], [], []>} : vector<16x32xbf16>, vector<32x32xbf16>, vector<16x32xf32> -> vector<16x32xf32>
    %371 = arith.addf %258, %370 : vector<16x32xf32>
    %c5 = arith.constant 5 : index
    %c0_66 = arith.constant 0 : index
    %372 = vector.load %arg4[%c5, %c0_66] : memref<8x32xf32, #tpu.memory_space<vmem>>, vector<1x32xf32>
    %373 = arith.mulf %371, %371 : vector<16x32xf32>
    %cst_67 = arith.constant dense<0.000000e+00> : vector<16xf32>
    %374 = vector.multi_reduction <add>, %373, %cst_67 [1] : vector<16x32xf32> to vector<16xf32>
    %375 = vector.shape_cast %374 : vector<16xf32> to vector<16x1xf32>
    %cst_68 = arith.constant 3.200000e+01 : f32
    %376 = vector.broadcast %cst_68 : f32 to vector<16x1xf32>
    %377 = arith.divf %375, %376 : vector<16x1xf32>
    %cst_69 = arith.constant 9.99999997E-7 : f32
    %378 = vector.broadcast %cst_69 : f32 to vector<16x1xf32>
    %379 = arith.addf %377, %378 : vector<16x1xf32>
    %380 = math.rsqrt %379 : vector<16x1xf32>
    %381 = vector.broadcast %380 : vector<16x1xf32> to vector<16x32xf32>
    %382 = arith.mulf %371, %381 : vector<16x32xf32>
    %383 = vector.broadcast %372 : vector<1x32xf32> to vector<16x32xf32>
    %384 = arith.mulf %382, %383 : vector<16x32xf32>
    %c320 = arith.constant 320 : index
    %c0_70 = arith.constant 0 : index
    %385 = vector.load %arg3[%c320, %c0_70] : memref<448x128xbf16, #tpu.memory_space<vmem>>, vector<32x64xbf16>
    %386 = arith.truncf %384 : vector<16x32xf32> to vector<16x32xbf16>
    %cst_71 = arith.constant dense<0.000000e+00> : vector<16x64xf32>
    %387 = tpu.matmul %386, %385, %cst_71 {dimension_numbers = #tpu.dot_dimension_numbers<[1], [0], [0], [1], [0, 0, 1, 1], [], []>} : vector<16x32xbf16>, vector<32x64xbf16>, vector<16x64xf32> -> vector<16x64xf32>
    %cst_72 = arith.constant 0.000000e+00 : f32
    %388 = vector.broadcast %cst_72 : f32 to vector<16x64xf32>
    %389 = arith.maximumf %387, %388 : vector<16x64xf32>
    %c352 = arith.constant 352 : index
    %c0_73 = arith.constant 0 : index
    %390 = vector.load %arg3[%c352, %c0_73] : memref<448x128xbf16, #tpu.memory_space<vmem>>, vector<64x32xbf16>
    %391 = arith.truncf %389 : vector<16x64xf32> to vector<16x64xbf16>
    %cst_74 = arith.constant dense<0.000000e+00> : vector<16x32xf32>
    %392 = tpu.matmul %391, %390, %cst_74 {dimension_numbers = #tpu.dot_dimension_numbers<[1], [0], [0], [1], [0, 0, 1, 1], [], []>} : vector<16x64xbf16>, vector<64x32xbf16>, vector<16x32xf32> -> vector<16x32xf32>
    %393 = arith.addf %371, %392 : vector<16x32xf32>
    %c6 = arith.constant 6 : index
    %c0_75 = arith.constant 0 : index
    %394 = vector.load %arg4[%c6, %c0_75] : memref<8x32xf32, #tpu.memory_space<vmem>>, vector<1x32xf32>
    %395 = arith.mulf %393, %393 : vector<16x32xf32>
    %cst_76 = arith.constant dense<0.000000e+00> : vector<16xf32>
    %396 = vector.multi_reduction <add>, %395, %cst_76 [1] : vector<16x32xf32> to vector<16xf32>
    %397 = vector.shape_cast %396 : vector<16xf32> to vector<16x1xf32>
    %cst_77 = arith.constant 3.200000e+01 : f32
    %398 = vector.broadcast %cst_77 : f32 to vector<16x1xf32>
    %399 = arith.divf %397, %398 : vector<16x1xf32>
    %cst_78 = arith.constant 9.99999997E-7 : f32
    %400 = vector.broadcast %cst_78 : f32 to vector<16x1xf32>
    %401 = arith.addf %399, %400 : vector<16x1xf32>
    %402 = math.rsqrt %401 : vector<16x1xf32>
    %403 = vector.broadcast %402 : vector<16x1xf32> to vector<16x32xf32>
    %404 = arith.mulf %393, %403 : vector<16x32xf32>
    %405 = vector.broadcast %394 : vector<1x32xf32> to vector<16x32xf32>
    %406 = arith.mulf %404, %405 : vector<16x32xf32>
    %c416 = arith.constant 416 : index
    %c0_79 = arith.constant 0 : index
    %407 = vector.load %arg3[%c416, %c0_79] : memref<448x128xbf16, #tpu.memory_space<vmem>>, vector<32x128xbf16>
    %408 = arith.truncf %406 : vector<16x32xf32> to vector<16x32xbf16>
    %cst_80 = arith.constant dense<0.000000e+00> : vector<16x128xf32>
    %409 = tpu.matmul %408, %407, %cst_80 {dimension_numbers = #tpu.dot_dimension_numbers<[1], [0], [0], [1], [0, 0, 1, 1], [], []>} : vector<16x32xbf16>, vector<32x128xbf16>, vector<16x128xf32> -> vector<16x128xf32>
    %c0_81 = arith.constant 0 : index
    %c0_82 = arith.constant 0 : index
    %410 = vector.load %arg5[%c0_81, %c0_82] : memref<16x128xf32, #tpu.memory_space<vmem>>, vector<16x128xf32>
    tpu.vector_store %arg5[%c0_81, %c0_82], %409 {strides = array<i32>} : memref<16x128xf32, #tpu.memory_space<vmem>>, vector<16x128xf32>,
    %c0_83 = arith.constant 0 : index
    %c0_84 = arith.constant 0 : index
    %411 = vector.load %arg2[%c0_83, %c0_84] : memref<16x1xi32, #tpu.memory_space<vmem>>, vector<16x1xi32>
    %cst_85 = arith.constant dense<0xFF800000> : vector<16xf32>
    %412 = vector.multi_reduction <maximumf>, %409, %cst_85 [1] : vector<16x128xf32> to vector<16xf32>
    %413 = vector.shape_cast %412 : vector<16xf32> to vector<16x1xf32>
    %414 = vector.broadcast %413 : vector<16x1xf32> to vector<16x128xf32>
    %415 = arith.subf %409, %414 : vector<16x128xf32>
    %416 = math.exp %415 : vector<16x128xf32>
    %cst_86 = arith.constant dense<0.000000e+00> : vector<16xf32>
    %417 = vector.multi_reduction <add>, %416, %cst_86 [1] : vector<16x128xf32> to vector<16xf32>
    %418 = vector.shape_cast %417 : vector<16xf32> to vector<16x1xf32>
    %419 = math.log %418 : vector<16x1xf32>
    %420 = vector.broadcast %419 : vector<16x1xf32> to vector<16x128xf32>
    %421 = arith.subf %415, %420 : vector<16x128xf32>
    %422 = tpu.iota {dimensions = array<i32: 1>} : vector<16x128xi32>
    %423 = vector.broadcast %411 : vector<16x1xi32> to vector<16x128xi32>
    %424 = arith.cmpi eq, %422, %423 : vector<16x128xi32>
    %cst_87 = arith.constant 0.000000e+00 : f32
    %425 = vector.broadcast %cst_87 : f32 to vector<16x128xf32>
    %426 = arith.select %424, %421, %425 : vector<16x128xi1>, vector<16x128xf32>
    %cst_88 = arith.constant dense<0.000000e+00> : vector<16xf32>
    %427 = vector.multi_reduction <add>, %426, %cst_88 [1] : vector<16x128xf32> to vector<16xf32>
    %428 = vector.shape_cast %427 : vector<16xf32> to vector<16x1xf32>
    %cst_89 = arith.constant 0.000000e+00 : f32
    %429 = vector.broadcast %cst_89 : f32 to vector<16x1xf32>
    %430 = arith.subf %429, %428 : vector<16x1xf32>
    %c-100_i32 = arith.constant -100 : i32
    %431 = vector.broadcast %c-100_i32 : i32 to vector<16x1xi32>
    %432 = arith.cmpi ne, %411, %431 : vector<16x1xi32>
    %433 = arith.extui %432 : vector<16x1xi1> to vector<16x1xi32>
    %434 = arith.sitofp %433 : vector<16x1xi32> to vector<16x1xf32>
    %435 = arith.mulf %430, %434 : vector<16x1xf32>
    %cst_90 = arith.constant dense<0.000000e+00> : vector<1xf32>
    %436 = vector.multi_reduction <add>, %435, %cst_90 [0] : vector<16x1xf32> to vector<1xf32>
    %437 = vector.shape_cast %436 : vector<1xf32> to vector<1x1xf32>
    %cst_91 = arith.constant dense<0.000000e+00> : vector<1xf32>
    %438 = vector.multi_reduction <add>, %434, %cst_91 [0] : vector<16x1xf32> to vector<1xf32>
    %439 = vector.shape_cast %438 : vector<1xf32> to vector<1x1xf32>
    %cst_92 = arith.constant 1.000000e+00 : f32
    %440 = vector.broadcast %cst_92 : f32 to vector<1x1xf32>
    %441 = arith.maximumf %439, %440 : vector<1x1xf32>
    %442 = arith.divf %437, %441 : vector<1x1xf32>
    %c0_93 = arith.constant 0 : index
    %c0_94 = arith.constant 0 : index
    %443 = vector.load %arg7[%c0_93, %c0_94] : memref<1x1xf32, #tpu.memory_space<vmem>>, vector<1x1xf32>
    tpu.vector_store %arg7[%c0_93, %c0_94], %442 {strides = array<i32>} : memref<1x1xf32, #tpu.memory_space<vmem>>, vector<1x1xf32>,
    %c0_95 = arith.constant 0 : index
    %c0_96 = arith.constant 0 : index
    %444 = vector.load %arg7[%c0_95, %c0_96] : memref<1x1xf32, #tpu.memory_space<vmem>>, vector<1x1xf32>
    %445 = vector.extract %444[0, 0] : f32 from vector<1x1xf32>
    %c0_97 = arith.constant 0 : index
    %c0_98 = arith.constant 0 : index
    %446 = memref.load %arg6[%c0_97, %c0_98] : memref<1x1xf32, #tpu.memory_space<smem>>
    memref.store %445, %arg6[%c0_97, %c0_98] : memref<1x1xf32, #tpu.memory_space<smem>>
    return
  }
}

</mosaic_0001>

<bundles_post_ra>
// kernel: qa_model_forward.1
= control target key start
LH: loop header
LB: loop body
LE: loop exit
PB: predicated region body
PF: predicated region fallthrough
CT: control target
= control target key end

     0   :  { %12 = vsyncpa [#allocation4], 0  ;;  %vm30_vm0 = vcmask 261120   ;;  %s5865_s0 = inlined_call_operand.vmem [shape: f32[32,32], index: 0, kind: input, shape index: {}]   ;;  %s5866_s1 = inlined_call_operand.vmem [shape: f32[3,8,8,8], index: 1, kind: input, shape index: {}]   ;;  %s5867_s2 = inlined_call_operand.vmem [shape: s32[16,1], index: 2, kind: input, shape index: {}]   ;;  %s5868_s3 = inlined_call_operand.vmem [shape: bf16[448,128], index: 3, kind: input, shape index: {}]   ;;  %s5869_s4 = inlined_call_operand.vmem [shape: f32[8,32], index: 4, kind: input, shape index: {}]   ;;  %s5870_s5 = inlined_call_operand.hbm [shape: f32[16,128], index: 5, kind: output, shape index: {0}]   ;;  %s5871_s6 = inlined_call_operand.hbm [shape: f32[1,1], index: 6, kind: output, shape index: {1}]  }
   0x1   :  { %v4864_v0 = vld [vmem:[%s5865_s0] sm:$0xff]  ;;  %v4869_v1 = vld [vmem:[%s5865_s0 + $0x8] sm:$0xff] }
   0x2   :  { %v28_v2 = vmul.f32 %v4864_v0, %v4864_v0  ;;  %v29_v3 = vmul.f32 %v4869_v1, %v4869_v1 }
   0x4   :  { %v31_v4 = vsel %vm30_vm0, %v28_v2, 0.0  ;;  %v34_v5 = vsel %vm30_vm0, %v29_v3, 0.0 }
   0x5   :  { %32 = vadd.xlane.f32.xlu0 %v31_v4 }
   0x9   :  { %35 = vadd.xlane.f32.xlu0 %v34_v5 }
   0xa   :  { %13 = vsyncpa [#allocation5], 0  ;;  %v4614_v6 = vld [vmem:[%s5868_s3] sm:$0xff]   ;;  %v4812_v7 = vmov 0.0   ;;  %vm4813_vm1 = vmmov 0   ;;  %v4615_v8 = vld [vmem:[%s5868_s3 + $0x8] sm:$0xff]  }
   0xb   :  { %4159 = vmatprep.subr.bf16.mxu0 %v4812_v7  ;;  %4163 = vmatprep.mubr.msk.bf16.mxu0 %vm4813_vm1, %v4812_v7  ;;  %v3910_v18 = vld [vmem:[%s5869_s4] ss:$0 sm:$0xff]  ;;  %s4814_s7 = smov 104   ;;  %s4815_s8 = smov 120   ;;  %vm152_vm2 = vcmask 64512   ;;  %v114_v2 = vld [vmem:[%s5866_s1 + $0x8] sm:$0xff] }
   0xc   :  { %4160 = vmatpush3.bf16.msra.mxu0 %v4614_v6  ;;  %4167 = vmatprep.subr.bf16.mxu1 %v4812_v7  ;;  %s4816_s9 = smov 112   ;;  %s4817_s10 = smov 96   ;;  %v113_v57 = vld [vmem:[%s5866_s1] sm:$0xff]  ;;  %vm643_vm3 = vcmask 1043456   ;;  %vm1036_vm4 = vcmask 130048   ;;  %vm1038_vm5 = vcmask 195584  }
   0xd   :  { %4161 = vmatprep.subr.bf16.mxu0 %v4812_v7  ;;  %4169 = vmatprep.mubr.msk.bf16.mxu1 %vm4813_vm1, %v4812_v7  ;;  %s4818_s27 = smov 64   ;;  %s4819_s28 = smov 8   ;;  %vm1237_vm6 = vcmask 523264  }
   0xe   :  { %s4820_s11 = smov 24   ;;  %s4821_s14 = smov 16  }
  0x10   :  { %4162 = vmatpush3.bf16.msra.mxu0 %v4615_v8  ;;  %v115_v8 = vld [vmem:[%s5866_s1 + $0x10] sm:$0xff] }
  0x11   :  { %4173 = vmatprep.subr.bf16.mxu0 %v4812_v7 }
  0x92   :  { %v33_v9 = vpop.xlane.xlu0 %32 }
  0x93   :  { %v38_v10 = vmul.f32 0.03125, %v33_v9 }
  0x95   :  { %v40_v11 = vadd.f32 1e-06, %v38_v10 }
  0x96   :  { %v36_v12 = vpop.xlane.xlu0 %35 }
  0x97   :  { %4642 = vrsqrt.f32 %v40_v11  ;;  %v39_v13 = vmul.f32 0.03125, %v36_v12 }
  0x99   :  { %v41_v14 = vadd.f32 1e-06, %v39_v13 }
  0x9b   :  { %4644 = vrsqrt.f32 %v41_v14 }
  0xa1   :  { %v4643_v15 = vpop.eup %4642 }
  0xa2   :  { %v44_v16 = vmul.f32 %v4643_v15, %v4864_v0  ;;  %v116_v15 = vld [vmem:[%s5866_s1 + $0x18] sm:$0xff] }
  0xa4   :  { %v50_v20 = vmul.f32 %v3910_v18, %v44_v16 }
  0xa5   :  { %v4645_v17 = vpop.eup %4644 }
  0xa6   :  { %v45_v19 = vmul.f32 %v4645_v17, %v4869_v1 }
  0xa8   :  { %v51_v21 = vmul.f32 %v3910_v18, %v45_v19 }
  0xaa   :  { %v56_v22 = vpack.c.bf16 %v51_v21, %v50_v20 }
  0xac   :  { %4164 = vmatmul.mubr.msk.bf16.vlgmr.msra.gmra.mrb[0].mxu0 %vm30_vm0, %v56_v22  ;;  %v117_v22 = vld [vmem:[%s5866_s1 + $0x20] sm:$0xff] }
  0xad   :  { %4175 = vmatprep.mubr.msk.bf16.mxu0 %vm4813_vm1, %v4812_v7 }
 0x17f   :  { %v106_v23 = vpop.f32.mrb[0].mxu0 }
 0x180   :  { %128 = vrot.lane.b32.xlu0 %v106_v23, %s4814_s7  ;;  %122 = vrot.lane.b32.xlu1 %v106_v23, %s4815_s8  ;;  %v4165_v24 = vpop.f32.mrb[1].mxu0  ;;  %v4905_v27 = vpack.c.bf16 %v106_v23, %v106_v23 }
 0x181   :  { %v109_v25 = vpop.f32.mrb[2].mxu0 }
 0x182   :  { %v4166_v26 = vpop.f32.mrb[3].mxu0  ;;  %v4923_v36 = vpack.c.bf16 %v109_v25, %v109_v25 }
 0x184   :  { %125 = vrot.lane.b32.xlu1 %v106_v23, %s4816_s9 }
 0x188   :  { %132 = vrot.lane.b32.xlu1 %v109_v25, %s4815_s8 }
 0x18c   :  { %135 = vrot.lane.b32.xlu1 %v109_v25, %s4816_s9 }
 0x190   :  { %138 = vrot.lane.b32.xlu1 %v109_v25, %s4814_s7 }
 0x194   :  { %150 = vrot.lane.b32.xlu1 %v4905_v27, %s4817_s10 }
 0x1f2   :  { %v129_v28 = vpop.permute.xlu0 %128  ;;  %v123_v29 = vpop.permute.xlu1 %122 }
 0x1f3   :  { %v4909_v30 = vpack.c.bf16 %v129_v28, %v129_v28  ;;  %v4911_v31 = vpack.c.bf16 %v123_v29, %v123_v29 }
 0x1f5   :  { %298 = vrot.lane.b32.xlu0 %v4909_v30, %s4817_s10  ;;  %200 = vrot.lane.b32.xlu1 %v4911_v31, %s4817_s10 }
 0x1f6   :  { %v126_v32 = vpop.permute.xlu1 %125 }
 0x1f7   :  { %v4917_v33 = vpack.c.bf16 %v126_v32, %v126_v32  ;;  %v118_v32 = vld [vmem:[%s5866_s1 + $0x28] sm:$0xff] }
 0x1f9   :  { %249 = vrot.lane.b32.xlu1 %v4917_v33, %s4817_s10 }
 0x1fa   :  { %v133_v34 = vpop.permute.xlu1 %132 }
 0x1fb   :  { %v4921_v35 = vpack.c.bf16 %v133_v34, %v133_v34 }
 0x1fd   :  { %396 = vrot.lane.b32.xlu0 %v4921_v35, %s4817_s10  ;;  %347 = vrot.lane.b32.xlu1 %v4923_v36, %s4817_s10 }
 0x1fe   :  { %v136_v37 = vpop.permute.xlu1 %135 }
 0x1ff   :  { %v4929_v38 = vpack.c.bf16 %v136_v37, %v136_v37 }
 0x201   :  { %445 = vrot.lane.b32.xlu1 %v4929_v38, %s4817_s10 }
 0x202   :  { %v139_v39 = vpop.permute.xlu1 %138 }
 0x203   :  { %v4933_v40 = vpack.c.bf16 %v139_v39, %v139_v39 }
 0x205   :  { %494 = vrot.lane.b32.xlu0 %v4933_v40, %s4817_s10 }
 0x206   :  { %v151_v41 = vpop.permute.xlu1 %150 }
 0x207   :  { %v157_v42 = vsel %vm152_vm2, %v151_v41, 0 }
 0x208   :  { %4168 = vmatpush3.bf16.xpose.msra.mxu1 %v157_v42 }
 0x209   :  { %4179 = vmatprep.subr.bf16.mxu1 %v4812_v7 }
 0x20f   :  { %4170 = vmatmul.mubr.msk.bf16.vlgmr.msra.gmra.mrb[0].mxu1 %vm152_vm2, %v4905_v27 }
 0x210   :  { %4181 = vmatprep.mubr.msk.bf16.mxu1 %vm4813_vm1, %v4812_v7 }
 0x267   :  { %v201_v43 = vpop.permute.xlu1 %200  ;;  %v299_v47 = vpop.permute.xlu0 %298 }
 0x268   :  { %v206_v44 = vsel %vm152_vm2, %v201_v43, 0  ;;  %v304_v48 = vsel %vm152_vm2, %v299_v47, 0 }
 0x269   :  { %4174 = vmatpush3.bf16.xpose.msra.mxu0 %v206_v44  ;;  %v119_v44 = vld [vmem:[%s5866_s1 + $0x30] sm:$0xff] }
 0x26a   :  { %4185 = vmatprep.subr.bf16.mxu0 %v4812_v7 }
 0x26b   :  { %v250_v45 = vpop.permute.xlu1 %249 }
 0x26c   :  { %v255_v46 = vsel %vm152_vm2, %v250_v45, 0 }
 0x26d   :  { %4180 = vmatpush3.bf16.xpose.msra.mxu1 %v255_v46 }
 0x26e   :  { %4191 = vmatprep.subr.bf16.mxu1 %v4812_v7 }
 0x26f   :  { %v348_v49 = vpop.permute.xlu1 %347  ;;  %v397_v51 = vpop.permute.xlu0 %396 }
 0x270   :  { %4176 = vmatmul.mubr.msk.bf16.vlgmr.msra.gmra.mrb[4].mxu0 %vm152_vm2, %v4911_v31  ;;  %v353_v50 = vsel %vm152_vm2, %v348_v49, 0  ;;  %v402_v52 = vsel %vm152_vm2, %v397_v51, 0  ;;  %v120_v51 = vld [vmem:[%s5866_s1 + $0x38] sm:$0xff] }
 0x271   :  { %4186 = vmatpush3.bf16.xpose.msra.mxu0 %v304_v48  ;;  %4187 = vmatprep.mubr.msk.bf16.mxu0 %vm4813_vm1, %v4812_v7 }
 0x272   :  { %4197 = vmatprep.subr.bf16.mxu0 %v4812_v7 }
 0x273   :  { %v446_v53 = vpop.permute.xlu1 %445 }
 0x274   :  { %4182 = vmatmul.mubr.msk.bf16.vlgmr.msra.gmra.mrb[4].mxu1 %vm152_vm2, %v4917_v33  ;;  %v451_v54 = vsel %vm152_vm2, %v446_v53, 0 }
 0x275   :  { %4192 = vmatpush3.bf16.xpose.msra.mxu1 %v353_v50  ;;  %4193 = vmatprep.mubr.msk.bf16.mxu1 %vm4813_vm1, %v4812_v7 }
 0x276   :  { %4203 = vmatprep.subr.bf16.mxu1 %v4812_v7 }
 0x277   :  { %v495_v55 = vpop.permute.xlu0 %494 }
 0x278   :  { %4188 = vmatmul.mubr.msk.bf16.vlgmr.msra.gmra.mrb[8].mxu0 %vm152_vm2, %v4909_v30  ;;  %v500_v56 = vsel %vm152_vm2, %v495_v55, 0 }
 0x279   :  { %4198 = vmatpush3.bf16.xpose.msra.mxu0 %v402_v52  ;;  %4199 = vmatprep.mubr.msk.bf16.mxu0 %vm4813_vm1, %v4812_v7 }
 0x27a   :  { %4209 = vmatprep.subr.bf16.mxu0 %v4812_v7 }
 0x27c   :  { %4194 = vmatmul.mubr.msk.bf16.vlgmr.msra.gmra.mrb[8].mxu1 %vm152_vm2, %v4923_v36 }
 0x27d   :  { %4204 = vmatpush3.bf16.xpose.msra.mxu1 %v451_v54  ;;  %4205 = vmatprep.mubr.msk.bf16.mxu1 %vm4813_vm1, %v4812_v7 }
 0x27e   :  { %4215 = vmatprep.subr.bf16.mxu1 %v4812_v7 }
 0x280   :  { %4200 = vmatmul.mubr.msk.bf16.vlgmr.msra.gmra.mrb[12].mxu0 %vm152_vm2, %v4921_v35 }
 0x281   :  { %4210 = vmatpush3.bf16.xpose.msra.mxu0 %v500_v56  ;;  %4211 = vmatprep.mubr.msk.bf16.mxu0 %vm4813_vm1, %v4812_v7 }
 0x282   :  { %4221 = vmatprep.subr.bf16.mxu0 %v4812_v7 }
 0x284   :  { %4206 = vmatmul.mubr.msk.bf16.vlgmr.msra.gmra.mrb[12].mxu1 %vm152_vm2, %v4929_v38 }
 0x285   :  { %4217 = vmatprep.mubr.msk.bf16.mxu1 %vm4813_vm1, %v4812_v7 }
 0x288   :  { %4212 = vmatmul.mubr.msk.bf16.vlgmr.msra.gmra.mrb[16].mxu0 %vm152_vm2, %v4933_v40 }
 0x289   :  { %4223 = vmatprep.mubr.msk.bf16.mxu0 %vm4813_vm1, %v4812_v7 }
 0x2e2   :  { %v193_v58 = vpop.f32.mrb[0].mxu1 }
 0x2e3   :  { %v4988_v59 = vadd.f32 %v193_v58, %v113_v57  ;;  %v4171_v60 = vpop.f32.mrb[1].mxu1 }
 0x2e4   :  { %v196_v61 = vpop.f32.mrb[2].mxu1 }
 0x2e5   :  { %v4172_v62 = vpop.f32.mrb[3].mxu1  ;;  %v542_v63 = vsel %vm152_vm2, %v4988_v59, -inf }
 0x2e6   :  { %543 = vmax.xlane.f32.xlu1 %v542_v63 }
 0x343   :  { %v242_v3 = vpop.f32.mrb[4].mxu0 }
 0x344   :  { %v4995_v4 = vadd.f32 %v242_v3, %v114_v2  ;;  %v4177_v5 = vpop.f32.mrb[5].mxu0 }
 0x345   :  { %v245_v6 = vpop.f32.mrb[6].mxu0 }
 0x346   :  { %v4178_v9 = vpop.f32.mrb[7].mxu0  ;;  %v545_v10 = vsel %vm152_vm2, %v4995_v4, -inf }
 0x347   :  { %v291_v11 = vpop.f32.mrb[4].mxu1  ;;  %546 = vmax.xlane.f32.xlu0 %v545_v10 }
 0x348   :  { %v5002_v12 = vadd.f32 %v291_v11, %v115_v8  ;;  %v4183_v13 = vpop.f32.mrb[5].mxu1 }
 0x349   :  { %v294_v14 = vpop.f32.mrb[6].mxu1 }
 0x34a   :  { %v4184_v16 = vpop.f32.mrb[7].mxu1  ;;  %v548_v17 = vsel %vm152_vm2, %v5002_v12, -inf }
 0x34b   :  { %549 = vmax.xlane.f32.xlu0 %v548_v17  ;;  %v340_v18 = vpop.f32.mrb[8].mxu0 }
 0x34c   :  { %v341_v19 = vadd.f32 %v340_v18, %v116_v15  ;;  %v4189_v20 = vpop.f32.mrb[9].mxu0 }
 0x34d   :  { %v343_v21 = vpop.f32.mrb[10].mxu0 }
 0x34e   :  { %v4190_v23 = vpop.f32.mrb[11].mxu0  ;;  %v551_v24 = vsel %vm152_vm2, %v341_v19, -inf }
 0x34f   :  { %v389_v25 = vpop.f32.mrb[8].mxu1  ;;  %552 = vmax.xlane.f32.xlu1 %v551_v24 }
 0x350   :  { %v5013_v26 = vadd.f32 %v389_v25, %v117_v22  ;;  %v4195_v28 = vpop.f32.mrb[9].mxu1 }
 0x351   :  { %v392_v29 = vpop.f32.mrb[10].mxu1 }
 0x352   :  { %v4196_v34 = vpop.f32.mrb[11].mxu1  ;;  %v554_v37 = vsel %vm152_vm2, %v5013_v26, -inf }
 0x353   :  { %555 = vmax.xlane.f32.xlu0 %v554_v37  ;;  %v438_v39 = vpop.f32.mrb[12].mxu0 }
 0x354   :  { %v439_v41 = vadd.f32 %v438_v39, %v118_v32  ;;  %v4201_v42 = vpop.f32.mrb[13].mxu0 }
 0x355   :  { %v441_v43 = vpop.f32.mrb[14].mxu0 }
 0x356   :  { %v4202_v45 = vpop.f32.mrb[15].mxu0  ;;  %v557_v46 = vsel %vm152_vm2, %v439_v41, -inf }
 0x357   :  { %v487_v47 = vpop.f32.mrb[12].mxu1  ;;  %558 = vmax.xlane.f32.xlu1 %v557_v46 }
 0x358   :  { %v5024_v48 = vadd.f32 %v487_v47, %v119_v44  ;;  %v4207_v49 = vpop.f32.mrb[13].mxu1 }
 0x359   :  { %v490_v50 = vpop.f32.mrb[14].mxu1 }
 0x35a   :  { %v4208_v52 = vpop.f32.mrb[15].mxu1  ;;  %v560_v53 = vsel %vm152_vm2, %v5024_v48, -inf }
 0x35b   :  { %561 = vmax.xlane.f32.xlu0 %v560_v53  ;;  %v536_v54 = vpop.f32.mrb[16].mxu0 }
 0x35c   :  { %v537_v55 = vadd.f32 %v536_v54, %v120_v51  ;;  %v4213_v56 = vpop.f32.mrb[17].mxu0 }
 0x35d   :  { %v539_v57 = vpop.f32.mrb[18].mxu0 }
 0x35e   :  { %v4214_v58 = vpop.f32.mrb[19].mxu0  ;;  %v563_v60 = vsel %vm152_vm2, %v537_v55, -inf }
 0x35f   :  { %564 = vmax.xlane.f32.xlu1 %v563_v60 }
 0x370   :  { %687 = vrot.lane.b32.xlu1 %v4911_v31, %s4818_s27 }
 0x371   :  { %638 = vrot.lane.b32.xlu0 %v4905_v27, %s4818_s27 }
 0x373   :  { %v544_v61 = vpop.xlane.xlu1 %543 }
 0x374   :  { %735 = vrot.lane.b32.xlu1 %v4917_v33, %s4818_s27  ;;  %v566_v62 = vsub.f32 %v4988_v59, %v544_v61 }
 0x375   :  { %783 = vrot.lane.b32.xlu0 %v4909_v30, %s4818_s27 }
 0x376   :  { %v574_v63 = vmul.f32 1.442695, %v566_v62 }
 0x378   :  { %831 = vrot.lane.b32.xlu1 %v4923_v36, %s4818_s27  ;;  %4646 = vpow2.f32 %v574_v63 }
 0x382   :  { %v5043_v2 = vpop.eup %4646 }
 0x383   :  { %v590_v31 = vsel %vm152_vm2, %v5043_v2, 0.0 }
 0x394   :  { %591 = vadd.xlane.f32.xlu0 %v590_v31 }
 0x3d4   :  { %v547_v27 = vpop.xlane.xlu0 %546 }
 0x3d5   :  { %v567_v33 = vsub.f32 %v4995_v4, %v547_v27 }
 0x3d7   :  { %v576_v3 = vmul.f32 1.442695, %v567_v33 }
 0x3d8   :  { %v550_v5 = vpop.xlane.xlu0 %549 }
 0x3d9   :  { %4648 = vpow2.f32 %v576_v3  ;;  %v568_v30 = vsub.f32 %v5002_v12, %v550_v5 }
 0x3db   :  { %v578_v36 = vmul.f32 1.442695, %v568_v30 }
 0x3dc   :  { %v553_v6 = vpop.xlane.xlu1 %552 }
 0x3dd   :  { %4650 = vpow2.f32 %v578_v36  ;;  %v569_v59 = vsub.f32 %v341_v19, %v553_v6 }
 0x3df   :  { %v580_v8 = vmul.f32 1.442695, %v569_v59 }
 0x3e0   :  { %v556_v10 = vpop.xlane.xlu0 %555 }
 0x3e1   :  { %4652 = vpow2.f32 %v580_v8  ;;  %v570_v37 = vsub.f32 %v5013_v26, %v556_v10 }
 0x3e3   :  { %v5049_v9 = vpop.eup %4648  ;;  %v582_v39 = vmul.f32 1.442695, %v570_v37 }
 0x3e4   :  { %v559_v11 = vpop.xlane.xlu1 %558  ;;  %v593_v13 = vsel %vm152_vm2, %v5049_v9, 0.0 }
 0x3e5   :  { %v571_v14 = vsub.f32 %v439_v41, %v559_v11  ;;  %594 = vadd.xlane.f32.xlu1 %v593_v13 }
 0x3e7   :  { %v5053_v4 = vpop.eup %4650  ;;  %v584_v15 = vmul.f32 1.442695, %v571_v14 }
 0x3e8   :  { %v562_v16 = vpop.xlane.xlu0 %561  ;;  %v596_v12 = vsel %vm152_vm2, %v5053_v4, 0.0 }
 0x3e9   :  { %4654 = vpow2.f32 %v584_v15  ;;  %597 = vadd.xlane.f32.xlu0 %v596_v12  ;;  %v572_v41 = vsub.f32 %v5024_v48, %v562_v16 }
 0x3eb   :  { %v5057_v17 = vpop.eup %4652  ;;  %v586_v42 = vmul.f32 1.442695, %v572_v41 }
 0x3ec   :  { %v639_v18 = vpop.permute.xlu0 %638  ;;  %v565_v19 = vpop.xlane.xlu1 %564  ;;  %v599_v20 = vsel %vm152_vm2, %v5057_v17, 0.0 }
 0x3ed   :  { %v645_v21 = vsel %vm643_vm3, %v639_v18, 0  ;;  %v573_v22 = vsub.f32 %v537_v55, %v565_v19  ;;  %600 = vadd.xlane.f32.xlu1 %v599_v20 }
 0x3ee   :  { %4216 = vmatpush3.bf16.msra.mxu1 %v645_v21 }
 0x3ef   :  { %v588_v23 = vmul.f32 1.442695, %v573_v22  ;;  %4227 = vmatprep.subr.bf16.mxu1 %v4812_v7 }
 0x3f0   :  { %v688_v24 = vpop.permute.xlu1 %687  ;;  %v784_v44 = vpop.permute.xlu0 %783 }
 0x3f1   :  { %4656 = vpow2.f32 %v588_v23  ;;  %v693_v25 = vsel %vm643_vm3, %v688_v24, 0  ;;  %v789_v60 = vsel %vm643_vm3, %v784_v44, 0 }
 0x3f2   :  { %4222 = vmatpush3.bf16.msra.mxu0 %v693_v25  ;;  %4658 = vpow2.f32 %v582_v39 }
 0x3f3   :  { %v5064_v28 = vpop.eup %4654  ;;  %4233 = vmatprep.subr.bf16.mxu0 %v4812_v7  ;;  %4660 = vpow2.f32 %v586_v42 }
 0x3f4   :  { %v605_v29 = vsel %vm152_vm2, %v5064_v28, 0.0  ;;  %v736_v48 = vpop.permute.xlu1 %735 }
 0x3f5   :  { %606 = vadd.xlane.f32.xlu1 %v605_v29  ;;  %v741_v50 = vsel %vm643_vm3, %v736_v48, 0  ;;  %v4616_v48 = vld [vmem:[%s5868_s3 + $0x10] sm:$0xff]  }
 0x3f8   :  { %v832_v51 = vpop.permute.xlu1 %831 }
 0x3fb   :  { %v5069_v32 = vpop.eup %4656 }
 0x3fc   :  { %v611_v34 = vsel %vm152_vm2, %v5069_v32, 0.0  ;;  %v5079_v43 = vpop.eup %4658 }
 0x3fd   :  { %612 = vadd.xlane.f32.xlu1 %v611_v34  ;;  %v602_v45 = vsel %vm152_vm2, %v5079_v43, 0.0  ;;  %v5083_v46 = vpop.eup %4660 }
 0x3fe   :  { %v608_v26 = vsel %vm152_vm2, %v5083_v46, 0.0 }
 0x3ff   :  { %879 = vrot.lane.b32.xlu0 %v4921_v35, %s4818_s27 }
 0x40e   :  { %927 = vrot.lane.b32.xlu1 %v4929_v38, %s4818_s27 }
 0x41e   :  { %603 = vadd.xlane.f32.xlu0 %v602_v45 }
 0x421   :  { %v592_v35 = vpop.xlane.xlu0 %591 }
 0x422   :  { %4662 = vrcp.f32 %v592_v35  ;;  %609 = vadd.xlane.f32.xlu0 %v608_v26 }
 0x42c   :  { %v4663_v47 = vpop.eup %4662 }
 0x42d   :  { %v615_v38 = vmul.f32 %v4663_v47, %v5043_v2  ;;  %v837_v2 = vsel %vm643_vm3, %v832_v51, 0 }
 0x42f   :  { %v630_v49 = vpack.c.bf16 %v615_v38, %v615_v38 }
 0x431   :  { %4218 = vmatmul.mubr.msk.bf16.vlgmr.msra.gmra.mrb[16].mxu1 %vm152_vm2, %v630_v49 }
 0x432   :  { %4228 = vmatpush3.bf16.msra.mxu1 %v741_v50  ;;  %4229 = vmatprep.mubr.msk.bf16.mxu1 %vm4813_vm1, %v4812_v7 }
 0x433   :  { %4239 = vmatprep.subr.bf16.mxu1 %v4812_v7 }
 0x438   :  { %975 = vrot.lane.b32.xlu0 %v4933_v40, %s4818_s27 }
 0x472   :  { %v595_v52 = vpop.xlane.xlu1 %594 }
 0x473   :  { %4664 = vrcp.f32 %v595_v52 }
 0x476   :  { %v598_v53 = vpop.xlane.xlu0 %597 }
 0x477   :  { %4666 = vrcp.f32 %v598_v53 }
 0x47a   :  { %v601_v54 = vpop.xlane.xlu1 %600  ;;  %v880_v27 = vpop.permute.xlu0 %879 }
 0x47b   :  { %4668 = vrcp.f32 %v601_v54  ;;  %v885_v3 = vsel %vm643_vm3, %v880_v27, 0 }
 0x47d   :  { %v4665_v55 = vpop.eup %4664 }
 0x47e   :  { %v617_v56 = vmul.f32 %v4665_v55, %v5049_v9  ;;  %v4617_v55 = vld [vmem:[%s5868_s3 + $0x18] sm:$0xff]  }
 0x480   :  { %v631_v57 = vpack.c.bf16 %v617_v56, %v617_v56 }
 0x481   :  { %v4667_v58 = vpop.eup %4666 }
 0x482   :  { %4224 = vmatmul.mubr.msk.bf16.vlgmr.msra.gmra.mrb[20].mxu0 %vm152_vm2, %v631_v57  ;;  %v607_v61 = vpop.xlane.xlu1 %606  ;;  %v619_v62 = vmul.f32 %v4667_v58, %v5053_v4 }
 0x483   :  { %4234 = vmatpush3.bf16.msra.mxu0 %v789_v60  ;;  %4670 = vrcp.f32 %v607_v61  ;;  %4235 = vmatprep.mubr.msk.bf16.mxu0 %vm4813_vm1, %v4812_v7 }
 0x484   :  { %v632_v40 = vpack.c.bf16 %v619_v62, %v619_v62  ;;  %4245 = vmatprep.subr.bf16.mxu0 %v4812_v7 }
 0x485   :  { %v4669_v63 = vpop.eup %4668 }
 0x486   :  { %4230 = vmatmul.mubr.msk.bf16.vlgmr.msra.gmra.mrb[20].mxu1 %vm152_vm2, %v632_v40  ;;  %v621_v31 = vmul.f32 %v4669_v63, %v5057_v17 }
 0x487   :  { %4240 = vmatpush3.bf16.msra.mxu1 %v837_v2  ;;  %4241 = vmatprep.mubr.msk.bf16.mxu1 %vm4813_vm1, %v4812_v7 }
 0x488   :  { %v633_v33 = vpack.c.bf16 %v621_v31, %v621_v31  ;;  %4251 = vmatprep.subr.bf16.mxu1 %v4812_v7 }
 0x48a   :  { %4236 = vmatmul.mubr.msk.bf16.vlgmr.msra.gmra.mrb[24].mxu0 %vm152_vm2, %v633_v33  ;;  %v613_v6 = vpop.xlane.xlu1 %612 }
 0x48b   :  { %4246 = vmatpush3.bf16.msra.mxu0 %v885_v3  ;;  %4247 = vmatprep.mubr.msk.bf16.mxu0 %vm4813_vm1, %v4812_v7  ;;  %4672 = vrcp.f32 %v613_v6 }
 0x48c   :  { %4257 = vmatprep.subr.bf16.mxu0 %v4812_v7 }
 0x48d   :  { %v4671_v5 = vpop.eup %4670 }
 0x48e   :  { %v625_v30 = vmul.f32 %v4671_v5, %v5064_v28  ;;  %v928_v16 = vpop.permute.xlu1 %927 }
 0x48f   :  { %v933_v18 = vsel %vm643_vm3, %v928_v16, 0 }
 0x490   :  { %v635_v36 = vpack.c.bf16 %v625_v30, %v625_v30 }
 0x492   :  { %4248 = vmatmul.mubr.msk.bf16.vlgmr.msra.gmra.mrb[28].mxu0 %vm152_vm2, %v635_v36 }
 0x493   :  { %4259 = vmatprep.mubr.msk.bf16.mxu0 %vm4813_vm1, %v4812_v7 }
 0x495   :  { %v4673_v8 = vpop.eup %4672 }
 0x496   :  { %v629_v10 = vmul.f32 %v4673_v8, %v5069_v32 }
 0x498   :  { %v637_v4 = vpack.c.bf16 %v629_v10, %v629_v10 }
 0x4ab   :  { %v604_v59 = vpop.xlane.xlu0 %603 }
 0x4ac   :  { %4674 = vrcp.f32 %v604_v59 }
 0x4af   :  { %v610_v9 = vpop.xlane.xlu0 %609 }
 0x4b0   :  { %4676 = vrcp.f32 %v610_v9 }
 0x4b3   :  { %v976_v11 = vpop.permute.xlu0 %975 }
 0x4b4   :  { %v981_v13 = vsel %vm643_vm3, %v976_v11, 0 }
 0x4b5   :  { %4258 = vmatpush3.bf16.msra.mxu0 %v981_v13 }
 0x4b6   :  { %v4675_v14 = vpop.eup %4674  ;;  %4271 = vmatprep.subr.bf16.mxu0 %v4812_v7 }
 0x4b7   :  { %v623_v15 = vmul.f32 %v4675_v14, %v5079_v43 }
 0x4b8   :  { %4260 = vmatmul.mubr.msk.bf16.vlgmr.msra.gmra.mrb[32].mxu0 %vm152_vm2, %v637_v4 }
 0x4b9   :  { %v634_v12 = vpack.c.bf16 %v623_v15, %v623_v15  ;;  %4275 = vmatprep.mubr.msk.bf16.mxu0 %vm4813_vm1, %v4812_v7  ;;  %v5156_v15 = vld [vmem:[%s5865_s0 + $0x10] sm:$0xff] }
 0x4ba   :  { %v4677_v17 = vpop.eup %4676 }
 0x4bb   :  { %4242 = vmatmul.mubr.msk.bf16.vlgmr.msra.gmra.mrb[24].mxu1 %vm152_vm2, %v634_v12  ;;  %v627_v19 = vmul.f32 %v4677_v17, %v5083_v46 }
 0x4bc   :  { %4252 = vmatpush3.bf16.msra.mxu1 %v933_v18  ;;  %4253 = vmatprep.mubr.msk.bf16.mxu1 %vm4813_vm1, %v4812_v7 }
 0x4bd   :  { %4263 = vmatprep.subr.bf16.mxu1 %v4812_v7  ;;  %v636_v20 = vpack.c.bf16 %v627_v19, %v627_v19 }
 0x4c3   :  { %4254 = vmatmul.mubr.msk.bf16.vlgmr.msra.gmra.mrb[28].mxu1 %vm152_vm2, %v636_v20 }
 0x4c4   :  { %4267 = vmatprep.mubr.msk.bf16.mxu1 %vm4813_vm1, %v4812_v7  ;;  %4264 = vmatpush3.bf16.msra.mxu1 %v4616_v48 }
 0x4c5   :  { %4265 = vmatprep.subr.bf16.mxu1 %v4812_v7 }
 0x4c8   :  { %4266 = vmatpush3.bf16.msra.mxu1 %v4617_v55 }
 0x4c9   :  { %4279 = vmatprep.subr.bf16.mxu1 %v4812_v7 }
 0x504   :  { %v681_v21 = vpop.f32.mrb[16].mxu1 }
 0x505   :  { %v4219_v22 = vpop.f32.mrb[17].mxu1 }
 0x506   :  { %v684_v23 = vpop.f32.mrb[18].mxu1  ;;  %v5171_v22 = vld [vmem:[%s5865_s0 + $0x18] sm:$0xff] }
 0x507   :  { %v4220_v24 = vpop.f32.mrb[19].mxu1 }
 0x555   :  { %v729_v25 = vpop.f32.mrb[20].mxu0 }
 0x556   :  { %v4225_v28 = vpop.f32.mrb[21].mxu0 }
 0x557   :  { %v732_v29 = vpop.f32.mrb[22].mxu0 }
 0x558   :  { %v4226_v32 = vpop.f32.mrb[23].mxu0  ;;  %v4618_v29 = vld [vmem:[%s5868_s3 + $0x20] sm:$0xff]  }
 0x559   :  { %v777_v34 = vpop.f32.mrb[20].mxu1  ;;  %4272 = vmatpush3.bf16.msra.mxu0 %v4618_v29  ;;  %v4619_v32 = vld [vmem:[%s5868_s3 + $0x28] sm:$0xff]  }
 0x55a   :  { %v4231_v37 = vpop.f32.mrb[21].mxu1  ;;  %4273 = vmatprep.subr.bf16.mxu0 %v4812_v7 }
 0x55b   :  { %v780_v39 = vpop.f32.mrb[22].mxu1  ;;  %v4623_v37 = vld [vmem:[%s5868_s3 + $0x38] sm:$0xff]  }
 0x55c   :  { %v4232_v41 = vpop.f32.mrb[23].mxu1 }
 0x55d   :  { %v825_v42 = vpop.f32.mrb[24].mxu0  ;;  %4274 = vmatpush3.bf16.msra.mxu0 %v4619_v32 }
 0x55e   :  { %v4237_v43 = vpop.f32.mrb[25].mxu0  ;;  %4291 = vmatprep.subr.bf16.mxu0 %v4812_v7 }
 0x55f   :  { %v828_v44 = vpop.f32.mrb[26].mxu0 }
 0x560   :  { %v4238_v45 = vpop.f32.mrb[27].mxu0 }
 0x565   :  { %v921_v46 = vpop.f32.mrb[28].mxu0 }
 0x566   :  { %v4567_v35 = vpack.i.bf16 %v921_v46, %v729_v25  ;;  %v4249_v26 = vpop.f32.mrb[29].mxu0  ;;  %v1311_v25 = vmul.f32 %v5171_v22, %v5171_v22 }
 0x567   :  { %v924_v47 = vpop.f32.mrb[30].mxu0 }
 0x568   :  { %4568 = vrot.lane.b32.xlu1 %v4567_v35, %s4819_s28  ;;  %v4250_v38 = vpop.f32.mrb[31].mxu0  ;;  %v1315_v28 = vsel %vm30_vm0, %v1311_v25, 0.0 }
 0x58b   :  { %v1017_v49 = vpop.f32.mrb[32].mxu0 }
 0x58c   :  { %v4577_v50 = vpack.i.bf16 %v1017_v49, %v825_v42  ;;  %v4261_v51 = vpop.f32.mrb[33].mxu0 }
 0x58d   :  { %v1020_v52 = vpop.f32.mrb[34].mxu0 }
 0x58e   :  { %v873_v53 = vpop.f32.mrb[24].mxu1  ;;  %4578 = vrot.lane.b32.xlu1 %v4577_v50, %s4820_s11  ;;  %v4262_v54 = vpop.f32.mrb[35].mxu0  ;;  %v3933_v52 = vld [vmem:[%s5869_s4 + $0x1] ss:$0 sm:$0xff] }
 0x58f   :  { %v4243_v56 = vpop.f32.mrb[25].mxu1 }
 0x590   :  { %v876_v57 = vpop.f32.mrb[26].mxu1 }
 0x591   :  { %v4244_v58 = vpop.f32.mrb[27].mxu1  ;;  %v4620_v57 = vld [vmem:[%s5868_s3 + $0x50] sm:$0xff]  }
 0x596   :  { %v969_v60 = vpop.f32.mrb[28].mxu1 }
 0x597   :  { %v4572_v61 = vpack.i.bf16 %v969_v60, %v777_v34  ;;  %v4255_v62 = vpop.f32.mrb[29].mxu1  ;;  %v4622_v34 = vld [vmem:[%s5868_s3 + $0x30] sm:$0xff]  }
 0x598   :  { %v972_v40 = vpop.f32.mrb[30].mxu1 }
 0x599   :  { %4573 = vrot.lane.b32.xlu0 %v4572_v61, %s4821_s14  ;;  %v4256_v63 = vpop.f32.mrb[31].mxu1  ;;  %v4621_v40 = vld [vmem:[%s5868_s3 + $0x58] sm:$0xff]  }
 0x59a   :  { %v3943_v63 = vld [vmem:[%s5869_s4 + $0x3] ss:$0 sm:$0xff] }
 0x5da   :  { %v4569_v2 = vpop.permute.xlu1 %4568 }
 0x5db   :  { %v4571_v31 = vunpack.i.h.bf16 %v4569_v2  ;;  %v4570_v27 = vunpack.i.l.bf16 %v4569_v2 }
 0x5dd   :  { %v1052_v36 = vsel %vm152_vm2, %v873_v53, %v4571_v31  ;;  %v1035_v6 = vsel %vm152_vm2, %v681_v21, %v4570_v27  ;;  %v1310_v21 = vmul.f32 %v5156_v15, %v5156_v15 }
 0x5df   :  { %v1312_v24 = vsel %vm30_vm0, %v1310_v21, 0.0 }
 0x600   :  { %v4579_v33 = vpop.permute.xlu1 %4578 }
 0x601   :  { %v4581_v59 = vunpack.i.h.bf16 %v4579_v33  ;;  %v4580_v8 = vunpack.i.l.bf16 %v4579_v33  ;;  %v4624_v33 = vld [vmem:[%s5868_s3 + $0x40] sm:$0xff]  }
 0x60b   :  { %v4574_v3 = vpop.permute.xlu0 %4573 }
 0x60c   :  { %v4576_v5 = vunpack.i.h.bf16 %v4574_v3  ;;  %v4575_v30 = vunpack.i.l.bf16 %v4574_v3  ;;  %v4625_v3 = vld [vmem:[%s5868_s3 + $0x48] sm:$0xff]  }
 0x60e   :  { %v1037_v9 = vsel %vm1036_vm4, %v1035_v6, %v4575_v30  ;;  %v1053_v10 = vsel %vm1036_vm4, %v1052_v36, %v4576_v5 }
 0x60f   :  { %v1039_v11 = vsel %vm1038_vm5, %v1037_v9, %v4580_v8  ;;  %v1054_v13 = vsel %vm1038_vm5, %v1053_v10, %v4581_v59 }
 0x610   :  { %v1059_v14 = vpack.c.bf16 %v1054_v13, %v1039_v11 }
 0x612   :  { %4268 = vmatmul.mubr.msk.bf16.vlgmr.msra.gmra.mrb[32].mxu1 %vm30_vm0, %v1059_v14 }
 0x613   :  { %4287 = vmatprep.mubr.msk.bf16.mxu1 %vm4813_vm1, %v4812_v7  ;;  %4280 = vmatpush3.bf16.msra.mxu1 %v4622_v34 }
 0x614   :  { %4281 = vmatprep.subr.bf16.mxu1 %v4812_v7 }
 0x617   :  { %4282 = vmatpush3.bf16.msra.mxu1 %v4623_v37 }
 0x618   :  { %4283 = vmatprep.subr.bf16.mxu1 %v4812_v7 }
 0x61b   :  { %4284 = vmatpush3.bf16.msra.mxu1 %v4624_v33 }
 0x61c   :  { %4285 = vmatprep.subr.bf16.mxu1 %v4812_v7 }
 0x61f   :  { %4286 = vmatpush3.bf16.msra.mxu1 %v4625_v3 }
 0x620   :  { %4305 = vmatprep.subr.bf16.mxu1 %v4812_v7 }
 0x6e5   :  { %v1109_v4 = vpop.f32.mrb[32].mxu1 }
 0x6e6   :  { %v5159_v16 = vadd.f32 %v1109_v4, %v4864_v0  ;;  %v4269_v12 = vpop.f32.mrb[33].mxu1 }
 0x6e7   :  { %v1112_v17 = vpop.f32.mrb[34].mxu1 }
 0x6e8   :  { %v5162_v18 = vadd.f32 %v1112_v17, %v4869_v1  ;;  %v4270_v19 = vpop.f32.mrb[35].mxu1  ;;  %v1119_v20 = vmul.f32 %v5159_v16, %v5159_v16 }
 0x6ea   :  { %v1121_v0 = vsel %vm30_vm0, %v1119_v20, 0.0  ;;  %v1120_v23 = vmul.f32 %v5162_v18, %v5162_v18 }
 0x6eb   :  { %1122 = vadd.xlane.f32.xlu0 %v1121_v0 }
 0x6ec   :  { %v1124_v1 = vsel %vm30_vm0, %v1120_v23, 0.0 }
 0x6ed   :  { %1125 = vadd.xlane.f32.xlu1 %v1124_v1 }
 0x6ef   :  { %1313 = vadd.xlane.f32.xlu0 %v1312_v24 }
 0x6f3   :  { %1316 = vadd.xlane.f32.xlu0 %v1315_v28 }
 0x778   :  { %v1123_v39 = vpop.xlane.xlu0 %1122 }
 0x779   :  { %v1127_v41 = vmul.f32 0.03125, %v1123_v39 }
 0x77a   :  { %v1126_v42 = vpop.xlane.xlu1 %1125 }
 0x77b   :  { %v1129_v43 = vadd.f32 1e-06, %v1127_v41  ;;  %v1128_v44 = vmul.f32 0.03125, %v1126_v42 }
 0x77c   :  { %v1314_v45 = vpop.xlane.xlu0 %1313 }
 0x77d   :  { %4678 = vrsqrt.f32 %v1129_v43  ;;  %v1130_v46 = vadd.f32 1e-06, %v1128_v44  ;;  %v1318_v35 = vmul.f32 0.03125, %v1314_v45 }
 0x77f   :  { %4680 = vrsqrt.f32 %v1130_v46  ;;  %v1320_v26 = vadd.f32 1e-06, %v1318_v35 }
 0x780   :  { %v1317_v47 = vpop.xlane.xlu0 %1316 }
 0x781   :  { %v1319_v38 = vmul.f32 0.03125, %v1317_v47  ;;  %4682 = vrsqrt.f32 %v1320_v26 }
 0x783   :  { %v1321_v48 = vadd.f32 1e-06, %v1319_v38 }
 0x785   :  { %4684 = vrsqrt.f32 %v1321_v48 }
 0x787   :  { %v4679_v49 = vpop.eup %4678 }
 0x788   :  { %v1133_v50 = vmul.f32 %v4679_v49, %v5159_v16 }
 0x789   :  { %v4681_v51 = vpop.eup %4680 }
 0x78a   :  { %v1134_v53 = vmul.f32 %v4681_v51, %v5162_v18  ;;  %v1139_v54 = vmul.f32 %v3933_v52, %v1133_v50 }
 0x78b   :  { %v4683_v56 = vpop.eup %4682 }
 0x78c   :  { %v1140_v55 = vmul.f32 %v3933_v52, %v1134_v53  ;;  %v1324_v61 = vmul.f32 %v4683_v56, %v5156_v15 }
 0x78e   :  { %v1145_v58 = vpack.c.bf16 %v1140_v55, %v1139_v54  ;;  %v1330_v31 = vmul.f32 %v3943_v63, %v1324_v61 }
 0x78f   :  { %v4685_v60 = vpop.eup %4684 }
 0x790   :  { %v1325_v62 = vmul.f32 %v4685_v60, %v5171_v22  ;;  %4276 = vmatmul.mubr.msk.bf16.vlgmr.msra.gmra.mrb[36].mxu0 %vm30_vm0, %v1145_v58 }
 0x791   :  { %4292 = vmatpush3.bf16.msra.mxu0 %v4620_v57  ;;  %4295 = vmatprep.mubr.msk.bf16.mxu0 %vm4813_vm1, %v4812_v7  ;;  %v3947_v57 = vld [vmem:[%s5866_s1 + $0x40] sm:$0xff] }
 0x792   :  { %4293 = vmatprep.subr.bf16.mxu0 %v4812_v7  ;;  %v1331_v2 = vmul.f32 %v3943_v63, %v1325_v62 }
 0x794   :  { %v1336_v27 = vpack.c.bf16 %v1331_v2, %v1330_v31  ;;  %v3948_v2 = vld [vmem:[%s5866_s1 + $0x48] sm:$0xff]  ;;  %v3949_v31 = vld [vmem:[%s5866_s1 + $0x50] sm:$0xff] }
 0x795   :  { %4294 = vmatpush3.bf16.msra.mxu0 %v4621_v40 }
 0x796   :  { %4299 = vmatprep.subr.bf16.mxu0 %v4812_v7 }
 0x798   :  { %4296 = vmatmul.mubr.msk.bf16.vlgmr.msra.gmra.mrb[40].mxu0 %vm30_vm0, %v1336_v27 }
 0x799   :  { %4301 = vmatprep.mubr.msk.bf16.mxu0 %vm4813_vm1, %v4812_v7 }
 0x863   :  { %v1195_v5 = vpop.f32.mrb[36].mxu0 }
 0x864   :  { %v4277_v30 = vpop.f32.mrb[37].mxu0  ;;  %v1202_v6 = vmax.f32 %v1195_v5, 0.0 }
 0x865   :  { %v1198_v36 = vpop.f32.mrb[38].mxu0 }
 0x866   :  { %v1203_v59 = vmax.f32 %v1198_v36, 0.0  ;;  %v4278_v8 = vpop.f32.mrb[39].mxu0 }
 0x868   :  { %v1212_v9 = vpack.c.bf16 %v1203_v59, %v1202_v6 }
 0x86a   :  { %4288 = vmatmul.mubr.msk.bf16.vlgmr.msra.gmra.mrb[36].mxu1 %vm1237_vm6, %v1212_v9 }
 0x86b   :  { %v1386_v10 = vpop.f32.mrb[40].mxu0  ;;  %4307 = vmatprep.mubr.msk.bf16.mxu1 %vm4813_vm1, %v4812_v7 }
 0x86c   :  { %1406 = vrot.lane.b32.xlu0 %v1386_v10, %s4816_s9  ;;  %1403 = vrot.lane.b32.xlu1 %v1386_v10, %s4815_s8  ;;  %v4297_v11 = vpop.f32.mrb[41].mxu0  ;;  %v1422_v4 = vpack.c.bf16 %v1386_v10, %v1386_v10 }
 0x86d   :  { %v1389_v13 = vpop.f32.mrb[42].mxu0 }
 0x86e   :  { %v4298_v14 = vpop.f32.mrb[43].mxu0  ;;  %v5249_v1 = vpack.c.bf16 %v1389_v13, %v1389_v13 }
 0x86f   :  { %v3951_v14 = vld [vmem:[%s5866_s1 + $0x60] sm:$0xff] }
 0x870   :  { %1409 = vrot.lane.b32.xlu1 %v1386_v10, %s4814_s7  ;;  %1416 = vrot.lane.b32.xlu0 %v1389_v13, %s4816_s9 }
 0x874   :  { %1431 = vrot.lane.b32.xlu0 %v1422_v4, %s4817_s10  ;;  %1413 = vrot.lane.b32.xlu1 %v1389_v13, %s4815_s8 }
 0x878   :  { %1419 = vrot.lane.b32.xlu1 %v1389_v13, %s4814_s7  ;;  %v3950_v13 = vld [vmem:[%s5866_s1 + $0x58] sm:$0xff] }
 0x8de   :  { %v1407_v12 = vpop.permute.xlu0 %1406  ;;  %v1404_v17 = vpop.permute.xlu1 %1403 }
 0x8df   :  { %v5239_v19 = vpack.c.bf16 %v1407_v12, %v1407_v12  ;;  %v5241_v20 = vpack.c.bf16 %v1404_v17, %v1404_v17 }
 0x8e1   :  { %1529 = vrot.lane.b32.xlu0 %v5239_v19, %s4817_s10  ;;  %1480 = vrot.lane.b32.xlu1 %v5241_v20, %s4817_s10 }
 0x8e2   :  { %v1410_v21 = vpop.permute.xlu1 %1409  ;;  %v1417_v0 = vpop.permute.xlu0 %1416 }
 0x8e3   :  { %v5247_v23 = vpack.c.bf16 %v1410_v21, %v1410_v21  ;;  %v5255_v28 = vpack.c.bf16 %v1417_v0, %v1417_v0 }
 0x8e5   :  { %1578 = vrot.lane.b32.xlu1 %v5247_v23, %s4817_s10  ;;  %1627 = vrot.lane.b32.xlu0 %v5249_v1, %s4817_s10 }
 0x8e6   :  { %v1432_v24 = vpop.permute.xlu0 %1431  ;;  %v1414_v25 = vpop.permute.xlu1 %1413 }
 0x8e7   :  { %v1437_v29 = vsel %vm152_vm2, %v1432_v24, 0  ;;  %v5258_v32 = vpack.c.bf16 %v1414_v25, %v1414_v25 }
 0x8e8   :  { %4300 = vmatpush3.bf16.xpose.msra.mxu0 %v1437_v29 }
 0x8e9   :  { %1676 = vrot.lane.b32.xlu1 %v5258_v32, %s4817_s10  ;;  %1725 = vrot.lane.b32.xlu0 %v5255_v28, %s4817_s10 }
 0x8ea   :  { %v1420_v34 = vpop.permute.xlu1 %1419  ;;  %4311 = vmatprep.subr.bf16.mxu0 %v4812_v7 }
 0x8eb   :  { %v5265_v37 = vpack.c.bf16 %v1420_v34, %v1420_v34 }
 0x8ed   :  { %1774 = vrot.lane.b32.xlu1 %v5265_v37, %s4817_s10 }
 0x8ef   :  { %4302 = vmatmul.mubr.msk.bf16.vlgmr.msra.gmra.mrb[44].mxu0 %vm152_vm2, %v1422_v4 }
 0x8f0   :  { %4313 = vmatprep.mubr.msk.bf16.mxu0 %vm4813_vm1, %v4812_v7 }
 0x8f1   :  { %1918 = vrot.lane.b32.xlu1 %v1422_v4, %s4818_s27 }
 0x93d   :  { %v5273_v39 = vpop.f32.mrb[36].mxu1 }
 0x93e   :  { %v4289_v41 = vpop.f32.mrb[37].mxu1 }
 0x93f   :  { %v5275_v42 = vpop.f32.mrb[38].mxu1 }
 0x940   :  { %v4290_v43 = vpop.f32.mrb[39].mxu1 }
 0x953   :  { %v1530_v44 = vpop.permute.xlu0 %1529  ;;  %v1481_v45 = vpop.permute.xlu1 %1480 }
 0x954   :  { %v1535_v46 = vsel %vm152_vm2, %v1530_v44, 0  ;;  %v1486_v35 = vsel %vm152_vm2, %v1481_v45, 0  ;;  %v3952_v45 = vld [vmem:[%s5866_s1 + $0x68] sm:$0xff] }
 0x955   :  { %4306 = vmatpush3.bf16.xpose.msra.mxu1 %v1486_v35  ;;  %4312 = vmatpush3.bf16.xpose.msra.mxu0 %v1535_v46  ;;  %v3953_v46 = vld [vmem:[%s5866_s1 + $0x70] sm:$0xff] }
 0x956   :  { %4317 = vmatprep.subr.bf16.mxu1 %v4812_v7  ;;  %4323 = vmatprep.subr.bf16.mxu0 %v4812_v7 }
 0x957   :  { %v1579_v26 = vpop.permute.xlu1 %1578  ;;  %v1628_v47 = vpop.permute.xlu0 %1627 }
 0x958   :  { %v1584_v38 = vsel %vm152_vm2, %v1579_v26, 0  ;;  %v1633_v48 = vsel %vm152_vm2, %v1628_v47, 0 }
 0x95b   :  { %v1677_v49 = vpop.permute.xlu1 %1676  ;;  %v1726_v50 = vpop.permute.xlu0 %1725 }
 0x95c   :  { %4308 = vmatmul.mubr.msk.bf16.vlgmr.msra.gmra.mrb[40].mxu1 %vm152_vm2, %v5241_v20  ;;  %4314 = vmatmul.mubr.msk.bf16.vlgmr.msra.gmra.mrb[48].mxu0 %vm152_vm2, %v5239_v19  ;;  %v1682_v52 = vsel %vm152_vm2, %v1677_v49, 0  ;;  %v1731_v53 = vsel %vm152_vm2, %v1726_v50, 0 }
 0x95d   :  { %4318 = vmatpush3.bf16.xpose.msra.mxu1 %v1584_v38  ;;  %4324 = vmatpush3.bf16.xpose.msra.mxu0 %v1633_v48 }
 0x95e   :  { %4319 = vmatprep.mubr.msk.bf16.mxu1 %vm4813_vm1, %v4812_v7  ;;  %4325 = vmatprep.mubr.msk.bf16.mxu0 %vm4813_vm1, %v4812_v7 }
 0x95f   :  { %4329 = vmatprep.subr.bf16.mxu1 %v4812_v7  ;;  %4335 = vmatprep.subr.bf16.mxu0 %v4812_v7  ;;  %v1775_v51 = vpop.permute.xlu1 %1774 }
 0x960   :  { %v1780_v55 = vsel %vm152_vm2, %v1775_v51, 0 }
 0x963   :  { %v1919_v54 = vpop.permute.xlu1 %1918 }
 0x964   :  { %4320 = vmatmul.mubr.msk.bf16.vlgmr.msra.gmra.mrb[44].mxu1 %vm152_vm2, %v5247_v23  ;;  %4326 = vmatmul.mubr.msk.bf16.vlgmr.msra.gmra.mrb[52].mxu0 %vm152_vm2, %v5249_v1  ;;  %v1924_v56 = vsel %vm643_vm3, %v1919_v54, 0 }
 0x965   :  { %4330 = vmatpush3.bf16.xpose.msra.mxu1 %v1682_v52  ;;  %4336 = vmatpush3.bf16.xpose.msra.mxu0 %v1731_v53 }
 0x966   :  { %4331 = vmatprep.mubr.msk.bf16.mxu1 %vm4813_vm1, %v4812_v7  ;;  %4337 = vmatprep.mubr.msk.bf16.mxu0 %vm4813_vm1, %v4812_v7 }
 0x967   :  { %4341 = vmatprep.subr.bf16.mxu1 %v4812_v7  ;;  %4347 = vmatprep.subr.bf16.mxu0 %v4812_v7 }
 0x96c   :  { %4332 = vmatmul.mubr.msk.bf16.vlgmr.msra.gmra.mrb[48].mxu1 %vm152_vm2, %v5258_v32  ;;  %4338 = vmatmul.mubr.msk.bf16.vlgmr.msra.gmra.mrb[56].mxu0 %vm152_vm2, %v5255_v28 }
 0x96d   :  { %4342 = vmatpush3.bf16.xpose.msra.mxu1 %v1780_v55  ;;  %4348 = vmatpush3.bf16.msra.mxu0 %v1924_v56  ;;  %v3954_v56 = vld [vmem:[%s5866_s1 + $0x78] sm:$0xff] }
 0x96e   :  { %4343 = vmatprep.mubr.msk.bf16.mxu1 %vm4813_vm1, %v4812_v7  ;;  %4353 = vmatprep.subr.bf16.mxu1 %v4812_v7 }
 0x96f   :  { %4349 = vmatprep.mubr.msk.bf16.mxu0 %vm4813_vm1, %v4812_v7  ;;  %4359 = vmatprep.subr.bf16.mxu0 %v4812_v7 }
 0x974   :  { %4344 = vmatmul.mubr.msk.bf16.vlgmr.msra.gmra.mrb[52].mxu1 %vm152_vm2, %v5265_v37 }
 0x975   :  { %4355 = vmatprep.mubr.msk.bf16.mxu1 %vm4813_vm1, %v4812_v7 }
 0x9c2   :  { %v1473_v58 = vpop.f32.mrb[44].mxu0 }
 0x9c3   :  { %v5324_v60 = vadd.f32 %v3947_v57, %v1473_v58  ;;  %v4303_v61 = vpop.f32.mrb[45].mxu0 }
 0x9c4   :  { %v1476_v62 = vpop.f32.mrb[46].mxu0 }
 0x9c5   :  { %v4304_v40 = vpop.f32.mrb[47].mxu0  ;;  %v1822_v63 = vsel %vm152_vm2, %v5324_v60, -inf }
 0x9c6   :  { %1823 = vmax.xlane.f32.xlu0 %v1822_v63 }
 0xa2f   :  { %v1522_v27 = vpop.f32.mrb[40].mxu1  ;;  %v1571_v33 = vpop.f32.mrb[48].mxu0 }
 0xa30   :  { %v5334_v3 = vadd.f32 %v3948_v2, %v1522_v27  ;;  %v5336_v5 = vadd.f32 %v3949_v31, %v1571_v33  ;;  %v4309_v30 = vpop.f32.mrb[41].mxu1  ;;  %v4315_v36 = vpop.f32.mrb[49].mxu0 }
 0xa31   :  { %v1525_v6 = vpop.f32.mrb[42].mxu1  ;;  %v1574_v59 = vpop.f32.mrb[50].mxu0 }
 0xa32   :  { %v4310_v8 = vpop.f32.mrb[43].mxu1  ;;  %v4316_v9 = vpop.f32.mrb[51].mxu0  ;;  %v1825_v10 = vsel %vm152_vm2, %v5334_v3, -inf  ;;  %v1828_v11 = vsel %vm152_vm2, %v5336_v5, -inf }
 0xa33   :  { %1826 = vmax.xlane.f32.xlu1 %v1825_v10  ;;  %1829 = vmax.xlane.f32.xlu0 %v1828_v11 }
 0xa37   :  { %v1620_v4 = vpop.f32.mrb[44].mxu1  ;;  %v1669_v12 = vpop.f32.mrb[52].mxu0 }
 0xa38   :  { %v1621_v17 = vadd.f32 %v3950_v13, %v1620_v4  ;;  %v5348_v21 = vadd.f32 %v3951_v14, %v1669_v12  ;;  %v4321_v0 = vpop.f32.mrb[45].mxu1  ;;  %v4327_v24 = vpop.f32.mrb[53].mxu0 }
 0xa39   :  { %v1623_v25 = vpop.f32.mrb[46].mxu1  ;;  %v1672_v29 = vpop.f32.mrb[54].mxu0 }
 0xa3a   :  { %v4322_v34 = vpop.f32.mrb[47].mxu1  ;;  %v4328_v41 = vpop.f32.mrb[55].mxu0  ;;  %v1831_v43 = vsel %vm152_vm2, %v1621_v17, -inf  ;;  %v1834_v44 = vsel %vm152_vm2, %v5348_v21, -inf }
 0xa3b   :  { %1832 = vmax.xlane.f32.xlu0 %v1831_v43  ;;  %1835 = vmax.xlane.f32.xlu1 %v1834_v44 }
 0xa3f   :  { %v1718_v35 = vpop.f32.mrb[48].mxu1  ;;  %v1767_v26 = vpop.f32.mrb[56].mxu0 }
 0xa40   :  { %v5359_v47 = vadd.f32 %v3952_v45, %v1718_v35  ;;  %v5361_v38 = vadd.f32 %v3953_v46, %v1767_v26  ;;  %v4333_v48 = vpop.f32.mrb[49].mxu1  ;;  %v4339_v49 = vpop.f32.mrb[57].mxu0 }
 0xa41   :  { %v1721_v50 = vpop.f32.mrb[50].mxu1  ;;  %v1770_v51 = vpop.f32.mrb[58].mxu0 }
 0xa42   :  { %v4334_v52 = vpop.f32.mrb[51].mxu1  ;;  %v4340_v53 = vpop.f32.mrb[59].mxu0  ;;  %v1837_v54 = vsel %vm152_vm2, %v5359_v47, -inf  ;;  %v1840_v55 = vsel %vm152_vm2, %v5361_v38, -inf }
 0xa43   :  { %1838 = vmax.xlane.f32.xlu0 %v1837_v54  ;;  %1841 = vmax.xlane.f32.xlu1 %v1840_v55 }
 0xa47   :  { %v1816_v57 = vpop.f32.mrb[52].mxu1 }
 0xa48   :  { %v1817_v58 = vadd.f32 %v3954_v56, %v1816_v57  ;;  %v4345_v61 = vpop.f32.mrb[53].mxu1 }
 0xa49   :  { %v1819_v62 = vpop.f32.mrb[54].mxu1 }
 0xa4a   :  { %v4346_v40 = vpop.f32.mrb[55].mxu1  ;;  %v1843_v63 = vsel %vm152_vm2, %v1817_v58, -inf }
 0xa4b   :  { %1844 = vmax.xlane.f32.xlu0 %v1843_v63 }
 0xa53   :  { %v1824_v2 = vpop.xlane.xlu0 %1823 }
 0xa54   :  { %2014 = vrot.lane.b32.xlu1 %v5239_v19, %s4818_s27  ;;  %v1846_v31 = vsub.f32 %v5324_v60, %v1824_v2 }
 0xa56   :  { %v1854_v27 = vmul.f32 1.442695, %v1846_v31 }
 0xa58   :  { %2062 = vrot.lane.b32.xlu1 %v5247_v23, %s4818_s27  ;;  %4686 = vpow2.f32 %v1854_v27 }
 0xa61   :  { %1966 = vrot.lane.b32.xlu0 %v5241_v20, %s4818_s27 }
 0xa62   :  { %v5378_v33 = vpop.eup %4686 }
 0xa63   :  { %v1870_v30 = vsel %vm152_vm2, %v5378_v33, 0.0 }
 0xa7c   :  { %1871 = vadd.xlane.f32.xlu1 %v1870_v30 }
 0xac0   :  { %v1827_v36 = vpop.xlane.xlu1 %1826  ;;  %v1830_v6 = vpop.xlane.xlu0 %1829 }
 0xac1   :  { %v1847_v19 = vsub.f32 %v5334_v3, %v1827_v36  ;;  %v1848_v23 = vsub.f32 %v5336_v5, %v1830_v6 }
 0xac3   :  { %v1856_v59 = vmul.f32 1.442695, %v1847_v19  ;;  %v1858_v8 = vmul.f32 1.442695, %v1848_v23 }
 0xac5   :  { %4688 = vpow2.f32 %v1856_v59 }
 0xac6   :  { %4690 = vpow2.f32 %v1858_v8 }
 0xac8   :  { %v1833_v20 = vpop.xlane.xlu0 %1832  ;;  %v1836_v24 = vpop.xlane.xlu1 %1835 }
 0xac9   :  { %v1849_v60 = vsub.f32 %v1621_v17, %v1833_v20  ;;  %v1850_v25 = vsub.f32 %v5348_v21, %v1836_v24 }
 0xacb   :  { %v1860_v9 = vmul.f32 1.442695, %v1849_v60  ;;  %v1862_v34 = vmul.f32 1.442695, %v1850_v25 }
 0xacd   :  { %4692 = vpow2.f32 %v1860_v9 }
 0xace   :  { %4694 = vpow2.f32 %v1862_v34 }
 0xacf   :  { %v5384_v10 = vpop.eup %4688 }
 0xad0   :  { %v5386_v11 = vpop.eup %4690  ;;  %v1873_v13 = vsel %vm152_vm2, %v5384_v10, 0.0  ;;  %v1839_v5 = vpop.xlane.xlu0 %1838 }
 0xad1   :  { %1874 = vadd.xlane.f32.xlu0 %v1873_v13  ;;  %v1876_v3 = vsel %vm152_vm2, %v5386_v11, 0.0  ;;  %v1842_v29 = vpop.xlane.xlu1 %1841  ;;  %v1851_v43 = vsub.f32 %v5359_v47, %v1839_v5 }
 0xad2   :  { %1877 = vadd.xlane.f32.xlu1 %v1876_v3  ;;  %v1852_v41 = vsub.f32 %v5361_v38, %v1842_v29 }
 0xad3   :  { %v1864_v45 = vmul.f32 1.442695, %v1851_v43 }
 0xad4   :  { %v1866_v44 = vmul.f32 1.442695, %v1852_v41 }
 0xad5   :  { %v2015_v35 = vpop.permute.xlu1 %2014 }
 0xad6   :  { %4696 = vpow2.f32 %v1866_v44  ;;  %v2020_v56 = vsel %vm643_vm3, %v2015_v35, 0 }
 0xad7   :  { %v5392_v14 = vpop.eup %4692  ;;  %4698 = vpow2.f32 %v1864_v45 }
 0xad8   :  { %v1845_v4 = vpop.xlane.xlu0 %1844  ;;  %v1879_v12 = vsel %vm152_vm2, %v5392_v14, 0.0  ;;  %v5405_v26 = vpop.eup %4694 }
 0xad9   :  { %1880 = vadd.xlane.f32.xlu0 %v1879_v12  ;;  %v1853_v46 = vsub.f32 %v1817_v58, %v1845_v4  ;;  %v1882_v21 = vsel %vm152_vm2, %v5405_v26, 0.0 }
 0xadc   :  { %v1967_v17 = vpop.permute.xlu0 %1966 }
 0xadd   :  { %v1972_v0 = vsel %vm643_vm3, %v1967_v17, 0 }
 0xade   :  { %4354 = vmatpush3.bf16.msra.mxu1 %v1972_v0 }
 0xadf   :  { %4365 = vmatprep.subr.bf16.mxu1 %v4812_v7 }
 0xae0   :  { %v5409_v48 = vpop.eup %4696 }
 0xae1   :  { %v5411_v47 = vpop.eup %4698  ;;  %v1888_v49 = vsel %vm152_vm2, %v5409_v48, 0.0 }
 0xae2   :  { %v1885_v50 = vsel %vm152_vm2, %v5411_v47, 0.0 }
 0xae3   :  { %2158 = vrot.lane.b32.xlu1 %v5258_v32, %s4818_s27  ;;  %v1868_v32 = vmul.f32 1.442695, %v1853_v46 }
 0xae5   :  { %4700 = vpow2.f32 %v1868_v32 }
 0xaef   :  { %2110 = vrot.lane.b32.xlu0 %v5249_v1, %s4818_s27  ;;  %v2063_v1 = vpop.permute.xlu1 %2062  ;;  %v5417_v51 = vpop.eup %4700 }
 0xaf0   :  { %v1891_v52 = vsel %vm152_vm2, %v5417_v51, 0.0 }
 0xb07   :  { %1883 = vadd.xlane.f32.xlu1 %v1882_v21 }
 0xb09   :  { %v1872_v38 = vpop.xlane.xlu1 %1871 }
 0xb0a   :  { %4702 = vrcp.f32 %v1872_v38 }
 0xb0b   :  { %1889 = vadd.xlane.f32.xlu1 %v1888_v49 }
 0xb0e   :  { %1886 = vadd.xlane.f32.xlu0 %v1885_v50 }
 0xb12   :  { %1892 = vadd.xlane.f32.xlu0 %v1891_v52 }
 0xb14   :  { %v4703_v53 = vpop.eup %4702 }
 0xb15   :  { %v1895_v54 = vmul.f32 %v4703_v53, %v5378_v33 }
 0xb17   :  { %v1910_v55 = vpack.c.bf16 %v1895_v54, %v1895_v54  ;;  %v4626_v54 = vld [vmem:[%s5868_s3 + $0x60] sm:$0xff]  }
 0xb19   :  { %4350 = vmatmul.mubr.msk.bf16.vlgmr.msra.gmra.mrb[60].mxu0 %vm152_vm2, %v1910_v55 }
 0xb1a   :  { %4360 = vmatpush3.bf16.msra.mxu0 %v2020_v56  ;;  %4361 = vmatprep.mubr.msk.bf16.mxu0 %vm4813_vm1, %v4812_v7 }
 0xb1b   :  { %4371 = vmatprep.subr.bf16.mxu0 %v4812_v7 }
 0xb1c   :  { %2254 = vrot.lane.b32.xlu1 %v5265_v37, %s4818_s27  ;;  %v2068_v37 = vsel %vm643_vm3, %v2063_v1, 0 }
 0xb28   :  { %2206 = vrot.lane.b32.xlu0 %v5255_v28, %s4818_s27 }
 0xb5e   :  { %v1875_v57 = vpop.xlane.xlu0 %1874 }
 0xb5f   :  { %4704 = vrcp.f32 %v1875_v57  ;;  %v1878_v58 = vpop.xlane.xlu1 %1877 }
 0xb60   :  { %4706 = vrcp.f32 %v1878_v58 }
 0xb63   :  { %v2159_v6 = vpop.permute.xlu1 %2158 }
 0xb64   :  { %v2164_v23 = vsel %vm643_vm3, %v2159_v6, 0 }
 0xb66   :  { %v1881_v61 = vpop.xlane.xlu0 %1880 }
 0xb67   :  { %4708 = vrcp.f32 %v1881_v61  ;;  %v4627_v61 = vld [vmem:[%s5868_s3 + $0x68] sm:$0xff]  }
 0xb69   :  { %v4705_v62 = vpop.eup %4704 }
 0xb6a   :  { %v4707_v40 = vpop.eup %4706  ;;  %v1897_v63 = vmul.f32 %v4705_v62, %v5384_v10  ;;  %v2111_v31 = vpop.permute.xlu0 %2110 }
 0xb6b   :  { %v1899_v2 = vmul.f32 %v4707_v40, %v5386_v11  ;;  %v2116_v28 = vsel %vm643_vm3, %v2111_v31, 0 }
 0xb6c   :  { %v1911_v27 = vpack.c.bf16 %v1897_v63, %v1897_v63 }
 0xb6d   :  { %v1912_v33 = vpack.c.bf16 %v1899_v2, %v1899_v2 }
 0xb6e   :  { %4356 = vmatmul.mubr.msk.bf16.vlgmr.msra.gmra.mrb[56].mxu1 %vm152_vm2, %v1911_v27 }
 0xb6f   :  { %4362 = vmatmul.mubr.msk.bf16.vlgmr.msra.gmra.mrb[64].mxu0 %vm152_vm2, %v1912_v33  ;;  %4366 = vmatpush3.bf16.msra.mxu1 %v2068_v37 }
 0xb70   :  { %4372 = vmatpush3.bf16.msra.mxu0 %v2116_v28  ;;  %4367 = vmatprep.mubr.msk.bf16.mxu1 %vm4813_vm1, %v4812_v7 }
 0xb71   :  { %v4709_v30 = vpop.eup %4708  ;;  %4377 = vmatprep.subr.bf16.mxu1 %v4812_v7  ;;  %4373 = vmatprep.mubr.msk.bf16.mxu0 %vm4813_vm1, %v4812_v7 }
 0xb72   :  { %v1901_v36 = vmul.f32 %v4709_v30, %v5392_v14  ;;  %4383 = vmatprep.subr.bf16.mxu0 %v4812_v7 }
 0xb74   :  { %v1913_v19 = vpack.c.bf16 %v1901_v36, %v1901_v36 }
 0xb76   :  { %4368 = vmatmul.mubr.msk.bf16.vlgmr.msra.gmra.mrb[60].mxu1 %vm152_vm2, %v1913_v19 }
 0xb77   :  { %4378 = vmatpush3.bf16.msra.mxu1 %v2164_v23  ;;  %4379 = vmatprep.mubr.msk.bf16.mxu1 %vm4813_vm1, %v4812_v7 }
 0xb78   :  { %4389 = vmatprep.subr.bf16.mxu1 %v4812_v7 }
 0xb94   :  { %v1884_v59 = vpop.xlane.xlu1 %1883 }
 0xb95   :  { %4710 = vrcp.f32 %v1884_v59  ;;  %v1282_v59 = vadd.f32 %v5273_v39, %v5159_v16 }
 0xb98   :  { %v1890_v8 = vpop.xlane.xlu1 %1889 }
 0xb99   :  { %4712 = vrcp.f32 %v1890_v8  ;;  %v1283_v8 = vadd.f32 %v5275_v42, %v5162_v18 }
 0xb9b   :  { %v1887_v20 = vpop.xlane.xlu0 %1886 }
 0xb9c   :  { %4714 = vrcp.f32 %v1887_v20  ;;  %v2255_v17 = vpop.permute.xlu1 %2254  ;;  %v1285_v20 = vmul.f32 %v1282_v59, %v1282_v59 }
 0xb9d   :  { %v2260_v29 = vsel %vm643_vm3, %v2255_v17, 0 }
 0xb9f   :  { %v4711_v60 = vpop.eup %4710  ;;  %v1893_v9 = vpop.xlane.xlu0 %1892 }
 0xba0   :  { %v1903_v10 = vmul.f32 %v4711_v60, %v5405_v26  ;;  %4716 = vrcp.f32 %v1893_v9  ;;  %v1286_v60 = vmul.f32 %v1283_v8, %v1283_v8  ;;  %v1287_v9 = vsel %vm30_vm0, %v1285_v20, 0.0 }
 0xba2   :  { %v1914_v11 = vpack.c.bf16 %v1903_v10, %v1903_v10  ;;  %v1290_v10 = vsel %vm30_vm0, %v1286_v60, 0.0 }
 0xba3   :  { %v4713_v13 = vpop.eup %4712  ;;  %v2207_v3 = vpop.permute.xlu0 %2206 }
 0xba4   :  { %v2212_v5 = vsel %vm643_vm3, %v2207_v3, 0  ;;  %4374 = vmatmul.mubr.msk.bf16.vlgmr.msra.gmra.mrb[68].mxu0 %vm152_vm2, %v1914_v11  ;;  %v1907_v4 = vmul.f32 %v4713_v13, %v5409_v48 }
 0xba5   :  { %4384 = vmatpush3.bf16.msra.mxu0 %v2212_v5  ;;  %4385 = vmatprep.mubr.msk.bf16.mxu0 %vm4813_vm1, %v4812_v7 }
 0xba6   :  { %v4715_v14 = vpop.eup %4714  ;;  %4395 = vmatprep.subr.bf16.mxu0 %v4812_v7  ;;  %v1916_v25 = vpack.c.bf16 %v1907_v4, %v1907_v4 }
 0xba7   :  { %v1905_v12 = vmul.f32 %v4715_v14, %v5411_v47 }
 0xba9   :  { %v1915_v0 = vpack.c.bf16 %v1905_v12, %v1905_v12 }
 0xbaa   :  { %v4717_v24 = vpop.eup %4716 }
 0xbab   :  { %4380 = vmatmul.mubr.msk.bf16.vlgmr.msra.gmra.mrb[64].mxu1 %vm152_vm2, %v1915_v0  ;;  %v1909_v34 = vmul.f32 %v4717_v24, %v5417_v51 }
 0xbac   :  { %4386 = vmatmul.mubr.msk.bf16.vlgmr.msra.gmra.mrb[72].mxu0 %vm152_vm2, %v1916_v25  ;;  %4390 = vmatpush3.bf16.msra.mxu1 %v2260_v29  ;;  %v4628_v29 = vld [vmem:[%s5868_s3 + $0x80] sm:$0xff]  }
 0xbad   :  { %4391 = vmatprep.mubr.msk.bf16.mxu1 %vm4813_vm1, %v4812_v7  ;;  %4399 = vmatprep.mubr.msk.bf16.mxu0 %vm4813_vm1, %v4812_v7  ;;  %v1917_v41 = vpack.c.bf16 %v1909_v34, %v1909_v34 }
 0xbae   :  { %4403 = vmatprep.subr.bf16.mxu1 %v4812_v7  ;;  %4396 = vmatpush3.bf16.msra.mxu0 %v4626_v54 }
 0xbaf   :  { %4397 = vmatprep.subr.bf16.mxu0 %v4812_v7 }
 0xbb2   :  { %4398 = vmatpush3.bf16.msra.mxu0 %v4627_v61 }
 0xbb3   :  { %4392 = vmatmul.mubr.msk.bf16.vlgmr.msra.gmra.mrb[68].mxu1 %vm152_vm2, %v1917_v41  ;;  %4411 = vmatprep.subr.bf16.mxu0 %v4812_v7  ;;  %v4629_v41 = vld [vmem:[%s5868_s3 + $0x88] sm:$0xff]  }
 0xbb4   :  { %4407 = vmatprep.mubr.msk.bf16.mxu1 %vm4813_vm1, %v4812_v7 }
 0xbec   :  { %v1960_v43 = vpop.f32.mrb[60].mxu0 }
 0xbed   :  { %v4351_v44 = vpop.f32.mrb[61].mxu0 }
 0xbee   :  { %v1963_v45 = vpop.f32.mrb[62].mxu0 }
 0xbef   :  { %v4352_v46 = vpop.f32.mrb[63].mxu0 }
 0xc41   :  { %v2008_v35 = vpop.f32.mrb[56].mxu1 }
 0xc42   :  { %v2056_v32 = vpop.f32.mrb[64].mxu0  ;;  %v4357_v26 = vpop.f32.mrb[57].mxu1 }
 0xc43   :  { %v4363_v1 = vpop.f32.mrb[65].mxu0  ;;  %v2011_v21 = vpop.f32.mrb[58].mxu1 }
 0xc44   :  { %v2059_v48 = vpop.f32.mrb[66].mxu0  ;;  %v4358_v38 = vpop.f32.mrb[59].mxu1 }
 0xc45   :  { %v4364_v47 = vpop.f32.mrb[67].mxu0  ;;  %v3942_v48 = vld [vmem:[%s5869_s4 + $0x2] ss:$0 sm:$0xff] }
 0xc49   :  { %v2104_v49 = vpop.f32.mrb[60].mxu1 }
 0xc4a   :  { %v4369_v50 = vpop.f32.mrb[61].mxu1 }
 0xc4b   :  { %v2107_v51 = vpop.f32.mrb[62].mxu1 }
 0xc4c   :  { %v4370_v52 = vpop.f32.mrb[63].mxu1 }
 0xc77   :  { %v2152_v53 = vpop.f32.mrb[68].mxu0 }
 0xc78   :  { %v4375_v55 = vpop.f32.mrb[69].mxu0 }
 0xc79   :  { %v2155_v56 = vpop.f32.mrb[70].mxu0 }
 0xc7a   :  { %v4376_v57 = vpop.f32.mrb[71].mxu0 }
 0xc7e   :  { %v2200_v58 = vpop.f32.mrb[64].mxu1 }
 0xc7f   :  { %v4582_v62 = vpack.i.bf16 %v2200_v58, %v2008_v35  ;;  %v2248_v40 = vpop.f32.mrb[72].mxu0  ;;  %v4381_v63 = vpop.f32.mrb[65].mxu1 }
 0xc80   :  { %v4587_v2 = vpack.i.bf16 %v2248_v40, %v2056_v32  ;;  %v4387_v31 = vpop.f32.mrb[73].mxu0  ;;  %v2203_v27 = vpop.f32.mrb[66].mxu1 }
 0xc81   :  { %v2251_v33 = vpop.f32.mrb[74].mxu0  ;;  %4583 = vrot.lane.b32.xlu0 %v4582_v62, %s4819_s28  ;;  %v4382_v37 = vpop.f32.mrb[67].mxu1 }
 0xc82   :  { %4588 = vrot.lane.b32.xlu1 %v4587_v2, %s4821_s14  ;;  %v4388_v28 = vpop.f32.mrb[75].mxu0 }
 0xc86   :  { %v2296_v30 = vpop.f32.mrb[68].mxu1 }
 0xc87   :  { %v4592_v36 = vpack.i.bf16 %v2296_v30, %v2104_v49  ;;  %v4393_v6 = vpop.f32.mrb[69].mxu1 }
 0xc88   :  { %v2299_v19 = vpop.f32.mrb[70].mxu1 }
 0xc89   :  { %4593 = vrot.lane.b32.xlu0 %v4592_v36, %s4820_s11  ;;  %v4394_v23 = vpop.f32.mrb[71].mxu1 }
 0xca6   :  { %1288 = vadd.xlane.f32.xlu1 %v1287_v9 }
 0xca8   :  { %1291 = vadd.xlane.f32.xlu0 %v1290_v10 }
 0xcf3   :  { %v4584_v11 = vpop.permute.xlu0 %4583 }
 0xcf4   :  { %v4586_v13 = vunpack.i.h.bf16 %v4584_v11  ;;  %v4585_v3 = vunpack.i.l.bf16 %v4584_v11  ;;  %v4589_v5 = vpop.permute.xlu1 %4588 }
 0xcf5   :  { %v4591_v14 = vunpack.i.h.bf16 %v4589_v5  ;;  %v4590_v4 = vunpack.i.l.bf16 %v4589_v5 }
 0xcf6   :  { %v2314_v12 = vsel %vm152_vm2, %v1960_v43, %v4585_v3  ;;  %v2329_v16 = vsel %vm152_vm2, %v2152_v53, %v4586_v13 }
 0xcf7   :  { %v2330_v17 = vsel %vm1036_vm4, %v2329_v16, %v4591_v14  ;;  %v2315_v0 = vsel %vm1036_vm4, %v2314_v12, %v4590_v4 }
 0xcfb   :  { %v4594_v39 = vpop.permute.xlu0 %4593 }
 0xcfc   :  { %v4596_v18 = vunpack.i.h.bf16 %v4594_v39  ;;  %v4595_v42 = vunpack.i.l.bf16 %v4594_v39 }
 0xcfe   :  { %v2316_v24 = vsel %vm1038_vm5, %v2315_v0, %v4595_v42  ;;  %v2331_v25 = vsel %vm1038_vm5, %v2330_v17, %v4596_v18 }
 0xcff   :  { %v2336_v34 = vpack.c.bf16 %v2331_v25, %v2316_v24 }
 0xd01   :  { %4400 = vmatmul.mubr.msk.bf16.vlgmr.msra.gmra.mrb[76].mxu0 %vm30_vm0, %v2336_v34 }
 0xd02   :  { %4412 = vmatpush3.bf16.msra.mxu0 %v4628_v29  ;;  %4415 = vmatprep.mubr.msk.bf16.mxu0 %vm4813_vm1, %v4812_v7 }
 0xd03   :  { %4413 = vmatprep.subr.bf16.mxu0 %v4812_v7 }
 0xd06   :  { %4414 = vmatpush3.bf16.msra.mxu0 %v4629_v41 }
 0xd07   :  { %4425 = vmatprep.subr.bf16.mxu0 %v4812_v7 }
 0xd33   :  { %v1289_v43 = vpop.xlane.xlu1 %1288 }
 0xd34   :  { %v1293_v44 = vmul.f32 0.03125, %v1289_v43 }
 0xd35   :  { %v1292_v45 = vpop.xlane.xlu0 %1291 }
 0xd36   :  { %v1295_v46 = vadd.f32 1e-06, %v1293_v44  ;;  %v1294_v35 = vmul.f32 0.03125, %v1292_v45 }
 0xd38   :  { %4718 = vrsqrt.f32 %v1295_v46  ;;  %v1296_v32 = vadd.f32 1e-06, %v1294_v35 }
 0xd3a   :  { %4720 = vrsqrt.f32 %v1296_v32 }
 0xd42   :  { %v4719_v26 = vpop.eup %4718 }
 0xd43   :  { %v1299_v1 = vmul.f32 %v4719_v26, %v1282_v59  ;;  %v3974_v59 = vld [vmem:[%s5869_s4 + $0x4] ss:$0 sm:$0xff] }
 0xd44   :  { %v4721_v21 = vpop.eup %4720 }
 0xd45   :  { %v1300_v38 = vmul.f32 %v4721_v21, %v1283_v8  ;;  %v1305_v47 = vmul.f32 %v3942_v48, %v1299_v1 }
 0xd47   :  { %v1306_v49 = vmul.f32 %v3942_v48, %v1300_v38 }
 0xd49   :  { %v2483_v50 = vpack.c.bf16 %v1306_v49, %v1305_v47 }
 0xd4b   :  { %4416 = vmatmul.mubr.msk.bf16.vlgmr.msra.gmra.mrb[80].mxu0 %vm30_vm0, %v2483_v50 }
 0xd4c   :  { %4427 = vmatprep.mubr.msk.bf16.mxu0 %vm4813_vm1, %v4812_v7 }
 0xdd4   :  { %v2386_v51 = vpop.f32.mrb[76].mxu0 }
 0xdd5   :  { %v5510_v52 = vadd.f32 %v2386_v51, %v5156_v15  ;;  %v4401_v53 = vpop.f32.mrb[77].mxu0  ;;  %v4630_v15 = vld [vmem:[%s5868_s3 + $0x70] sm:$0xff]  }
 0xdd6   :  { %v2389_v54 = vpop.f32.mrb[78].mxu0  ;;  %4404 = vmatpush3.bf16.msra.mxu1 %v4630_v15 }
 0xdd7   :  { %v5513_v55 = vadd.f32 %v2389_v54, %v5171_v22  ;;  %v4402_v56 = vpop.f32.mrb[79].mxu0  ;;  %v2396_v57 = vmul.f32 %v5510_v52, %v5510_v52  ;;  %4405 = vmatprep.subr.bf16.mxu1 %v4812_v7  ;;  %v4631_v22 = vld [vmem:[%s5868_s3 + $0x78] sm:$0xff]  }
 0xdd9   :  { %v2398_v58 = vsel %vm30_vm0, %v2396_v57, 0.0  ;;  %v2397_v61 = vmul.f32 %v5513_v55, %v5513_v55 }
 0xdda   :  { %2399 = vadd.xlane.f32.xlu0 %v2398_v58  ;;  %4406 = vmatpush3.bf16.msra.mxu1 %v4631_v22 }
 0xddb   :  { %v2401_v62 = vsel %vm30_vm0, %v2397_v61, 0.0  ;;  %4419 = vmatprep.subr.bf16.mxu1 %v4812_v7 }
 0xddc   :  { %2402 = vadd.xlane.f32.xlu1 %v2401_v62  ;;  %v3981_v62 = vld [vmem:[%s5866_s1 + $0x80] sm:$0xff] }
 0xe1e   :  { %v2533_v40 = vpop.f32.mrb[80].mxu0 }
 0xe1f   :  { %2581 = vrot.lane.b32.xlu1 %v2533_v40, %s4816_s9  ;;  %2578 = vrot.lane.b32.xlu0 %v2533_v40, %s4815_s8  ;;  %v4417_v63 = vpop.f32.mrb[81].mxu0  ;;  %v5537_v9 = vpack.c.bf16 %v2533_v40, %v2533_v40 }
 0xe20   :  { %v2536_v2 = vpop.f32.mrb[82].mxu0 }
 0xe21   :  { %v4418_v31 = vpop.f32.mrb[83].mxu0  ;;  %v2609_v11 = vsel %vm152_vm2, %v5537_v9, 0  ;;  %v5572_v43 = vpack.c.bf16 %v2536_v2, %v2536_v2 }
 0xe23   :  { %2584 = vrot.lane.b32.xlu0 %v2533_v40, %s4814_s7  ;;  %v2793_v35 = vsel %vm152_vm2, %v5572_v43, 0 }
 0xe67   :  { %v2400_v27 = vpop.xlane.xlu0 %2399 }
 0xe68   :  { %v2404_v33 = vmul.f32 0.03125, %v2400_v27  ;;  %v3982_v27 = vld [vmem:[%s5866_s1 + $0x88] sm:$0xff] }
 0xe69   :  { %v2403_v37 = vpop.xlane.xlu1 %2402 }
 0xe6a   :  { %v2406_v28 = vadd.f32 1e-06, %v2404_v33  ;;  %v2405_v30 = vmul.f32 0.03125, %v2403_v37 }
 0xe6c   :  { %4722 = vrsqrt.f32 %v2406_v28  ;;  %v2407_v36 = vadd.f32 1e-06, %v2405_v30 }
 0xe6e   :  { %4724 = vrsqrt.f32 %v2407_v36  ;;  %v3983_v36 = vld [vmem:[%s5866_s1 + $0x90] sm:$0xff] }
 0xe76   :  { %v4723_v6 = vpop.eup %4722 }
 0xe77   :  { %v2410_v19 = vmul.f32 %v4723_v6, %v5510_v52 }
 0xe78   :  { %v4725_v23 = vpop.eup %4724 }
 0xe79   :  { %v2411_v8 = vmul.f32 %v4725_v23, %v5513_v55  ;;  %v2416_v20 = vmul.f32 %v3974_v59, %v2410_v19 }
 0xe7b   :  { %v2417_v60 = vmul.f32 %v3974_v59, %v2411_v8 }
 0xe7d   :  { %v2422_v10 = vpack.c.bf16 %v2417_v60, %v2416_v20  ;;  %v3984_v60 = vld [vmem:[%s5866_s1 + $0x98] sm:$0xff] }
 0xe7f   :  { %4408 = vmatmul.mubr.msk.bf16.vlgmr.msra.gmra.mrb[72].mxu1 %vm30_vm0, %v2422_v10 }
 0xe80   :  { %4420 = vmatpush3.bf16.xpose.msra.mxu1 %v2609_v11  ;;  %4421 = vmatprep.mubr.msk.bf16.mxu1 %vm4813_vm1, %v4812_v7 }
 0xe81   :  { %4431 = vmatprep.subr.bf16.mxu1 %v4812_v7 }
 0xe91   :  { %v2579_v13 = vpop.permute.xlu0 %2578  ;;  %v2582_v14 = vpop.permute.xlu1 %2581 }
 0xe92   :  { %v5545_v3 = vpack.c.bf16 %v2579_v13, %v2579_v13  ;;  %v5550_v4 = vpack.c.bf16 %v2582_v14, %v2582_v14 }
 0xe94   :  { %v2655_v5 = vsel %vm152_vm2, %v5545_v3, 0  ;;  %v2701_v42 = vsel %vm152_vm2, %v5550_v4, 0 }
 0xe95   :  { %4426 = vmatpush3.bf16.xpose.msra.mxu0 %v2655_v5  ;;  %v2585_v0 = vpop.permute.xlu0 %2584 }
 0xe96   :  { %4437 = vmatprep.subr.bf16.mxu0 %v4812_v7  ;;  %v5567_v24 = vpack.c.bf16 %v2585_v0, %v2585_v0 }
 0xe98   :  { %v2747_v41 = vsel %vm152_vm2, %v5567_v24, 0 }
 0xf52   :  { %v2472_v12 = vpop.f32.mrb[72].mxu1 }
 0xf53   :  { %v2569_v16 = vpack.c.bf16 %v2472_v12, %v2472_v12  ;;  %v4409_v39 = vpop.f32.mrb[73].mxu1  ;;  %2550 = vrot.lane.b32.xlu1 %v2472_v12, %s4815_s8  ;;  %2556 = vrot.lane.b32.xlu0 %v2472_v12, %s4814_s7 }
 0xf54   :  { %v2475_v18 = vpop.f32.mrb[74].mxu1 }
 0xf55   :  { %v4410_v17 = vpop.f32.mrb[75].mxu1  ;;  %4422 = vmatmul.mubr.msk.bf16.vlgmr.msra.gmra.mrb[76].mxu1 %vm152_vm2, %v2569_v16  ;;  %v2573_v49 = vpack.c.bf16 %v2475_v18, %v2475_v18  ;;  %v3985_v16 = vld [vmem:[%s5866_s1 + $0xa0] sm:$0xff] }
 0xf56   :  { %4432 = vmatpush3.bf16.xpose.msra.mxu1 %v2701_v42  ;;  %4433 = vmatprep.mubr.msk.bf16.mxu1 %vm4813_vm1, %v4812_v7 }
 0xf57   :  { %2553 = vrot.lane.b32.xlu1 %v2472_v12, %s4816_s9  ;;  %2591 = vrot.lane.b32.xlu0 %v2536_v2, %s4816_s9 }
 0xf58   :  { %4443 = vmatprep.subr.bf16.mxu1 %v4812_v7 }
 0xf5b   :  { %2594 = vrot.lane.b32.xlu0 %v2536_v2, %s4814_s7  ;;  %2588 = vrot.lane.b32.xlu1 %v2536_v2, %s4815_s8 }
 0xf5f   :  { %2566 = vrot.lane.b32.xlu0 %v2475_v18, %s4814_s7  ;;  %2560 = vrot.lane.b32.xlu1 %v2475_v18, %s4815_s8 }
 0xf63   :  { %2563 = vrot.lane.b32.xlu1 %v2475_v18, %s4816_s9 }
 0xfc5   :  { %v2551_v25 = vpop.permute.xlu1 %2550  ;;  %v2557_v29 = vpop.permute.xlu0 %2556 }
 0xfc6   :  { %v2570_v34 = vpack.c.bf16 %v2551_v25, %v2551_v25  ;;  %v2572_v26 = vpack.c.bf16 %v2557_v29, %v2557_v29  ;;  %v3986_v29 = vld [vmem:[%s5866_s1 + $0xa8] sm:$0xff] }
 0xfc8   :  { %4428 = vmatmul.mubr.msk.bf16.vlgmr.msra.gmra.mrb[84].mxu0 %vm152_vm2, %v2570_v34 }
 0xfc9   :  { %4438 = vmatpush3.bf16.xpose.msra.mxu0 %v2747_v41  ;;  %v2554_v44 = vpop.permute.xlu1 %2553  ;;  %4439 = vmatprep.mubr.msk.bf16.mxu0 %vm4813_vm1, %v4812_v7  ;;  %v2592_v46 = vpop.permute.xlu0 %2591 }
 0xfca   :  { %v2571_v45 = vpack.c.bf16 %v2554_v44, %v2554_v44  ;;  %4449 = vmatprep.subr.bf16.mxu0 %v4812_v7  ;;  %v5585_v21 = vpack.c.bf16 %v2592_v46, %v2592_v46 }
 0xfcc   :  { %4434 = vmatmul.mubr.msk.bf16.vlgmr.msra.gmra.mrb[80].mxu1 %vm152_vm2, %v2571_v45  ;;  %v2885_v50 = vsel %vm152_vm2, %v5585_v21, 0 }
 0xfcd   :  { %4444 = vmatpush3.bf16.xpose.msra.mxu1 %v2793_v35  ;;  %v2589_v32 = vpop.permute.xlu1 %2588  ;;  %4445 = vmatprep.mubr.msk.bf16.mxu1 %vm4813_vm1, %v4812_v7  ;;  %v2595_v38 = vpop.permute.xlu0 %2594 }
 0xfce   :  { %v5582_v1 = vpack.c.bf16 %v2589_v32, %v2589_v32  ;;  %4455 = vmatprep.subr.bf16.mxu1 %v4812_v7  ;;  %v5595_v51 = vpack.c.bf16 %v2595_v38, %v2595_v38  ;;  %v3987_v32 = vld [vmem:[%s5866_s1 + $0xb0] sm:$0xff] }
 0xfd0   :  { %v2839_v48 = vsel %vm152_vm2, %v5582_v1, 0  ;;  %4440 = vmatmul.mubr.msk.bf16.vlgmr.msra.gmra.mrb[88].mxu0 %vm152_vm2, %v2572_v26  ;;  %v2931_v56 = vsel %vm152_vm2, %v5595_v51, 0 }
 0xfd1   :  { %4450 = vmatpush3.bf16.xpose.msra.mxu0 %v2839_v48  ;;  %v2561_v47 = vpop.permute.xlu1 %2560  ;;  %4451 = vmatprep.mubr.msk.bf16.mxu0 %vm4813_vm1, %v4812_v7  ;;  %v2567_v58 = vpop.permute.xlu0 %2566 }
 0xfd2   :  { %4461 = vmatprep.subr.bf16.mxu0 %v4812_v7  ;;  %v2574_v53 = vpack.c.bf16 %v2561_v47, %v2561_v47  ;;  %v2576_v61 = vpack.c.bf16 %v2567_v58, %v2567_v58 }
 0xfd4   :  { %4446 = vmatmul.mubr.msk.bf16.vlgmr.msra.gmra.mrb[84].mxu1 %vm152_vm2, %v2573_v49 }
 0xfd5   :  { %4456 = vmatpush3.bf16.xpose.msra.mxu1 %v2885_v50  ;;  %4457 = vmatprep.mubr.msk.bf16.mxu1 %vm4813_vm1, %v4812_v7  ;;  %v2564_v54 = vpop.permute.xlu1 %2563 }
 0xfd6   :  { %4467 = vmatprep.subr.bf16.mxu1 %v4812_v7  ;;  %v2575_v57 = vpack.c.bf16 %v2564_v54, %v2564_v54 }
 0xfd8   :  { %4452 = vmatmul.mubr.msk.bf16.vlgmr.msra.gmra.mrb[92].mxu0 %vm152_vm2, %v2574_v53  ;;  %v3988_v53 = vld [vmem:[%s5866_s1 + $0xb8] sm:$0xff] }
 0xfd9   :  { %4462 = vmatpush3.bf16.xpose.msra.mxu0 %v2931_v56  ;;  %4463 = vmatprep.mubr.msk.bf16.mxu0 %vm4813_vm1, %v4812_v7 }
 0xfda   :  { %4473 = vmatprep.subr.bf16.mxu0 %v4812_v7 }
 0xfdc   :  { %4458 = vmatmul.mubr.msk.bf16.vlgmr.msra.gmra.mrb[88].mxu1 %vm152_vm2, %v2575_v57 }
 0xfdd   :  { %4469 = vmatprep.mubr.msk.bf16.mxu1 %vm4813_vm1, %v4812_v7 }
 0xfe0   :  { %4464 = vmatmul.mubr.msk.bf16.vlgmr.msra.gmra.mrb[96].mxu0 %vm152_vm2, %v2576_v61 }
 0xfe1   :  { %4475 = vmatprep.mubr.msk.bf16.mxu0 %vm4813_vm1, %v4812_v7 }
0x1028   :  { %v2645_v15 = vpop.f32.mrb[76].mxu1 }
0x1029   :  { %v5616_v22 = vadd.f32 %v3981_v62, %v2645_v15  ;;  %v4423_v40 = vpop.f32.mrb[77].mxu1 }
0x102a   :  { %v2648_v63 = vpop.f32.mrb[78].mxu1 }
0x102b   :  { %v4424_v2 = vpop.f32.mrb[79].mxu1  ;;  %v2973_v31 = vsel %vm152_vm2, %v5616_v22, -inf }
0x102c   :  { %2974 = vmax.xlane.f32.xlu1 %v2973_v31 }
0x109b   :  { %v2691_v33 = vpop.f32.mrb[84].mxu0 }
0x109c   :  { %v5623_v37 = vadd.f32 %v3982_v27, %v2691_v33  ;;  %v4429_v28 = vpop.f32.mrb[85].mxu0 }
0x109d   :  { %v2694_v30 = vpop.f32.mrb[86].mxu0 }
0x109e   :  { %v4430_v6 = vpop.f32.mrb[87].mxu0  ;;  %v2976_v19 = vsel %vm152_vm2, %v5623_v37, -inf }
0x109f   :  { %v2737_v23 = vpop.f32.mrb[80].mxu1  ;;  %2977 = vmax.xlane.f32.xlu0 %v2976_v19 }
0x10a0   :  { %v5630_v59 = vadd.f32 %v3983_v36, %v2737_v23  ;;  %v4435_v8 = vpop.f32.mrb[81].mxu1 }
0x10a1   :  { %v2740_v20 = vpop.f32.mrb[82].mxu1 }
0x10a2   :  { %v4436_v10 = vpop.f32.mrb[83].mxu1  ;;  %v2979_v11 = vsel %vm152_vm2, %v5630_v59, -inf }
0x10a3   :  { %2980 = vmax.xlane.f32.xlu0 %v2979_v11  ;;  %v2783_v13 = vpop.f32.mrb[88].mxu0 }
0x10a4   :  { %v2784_v5 = vadd.f32 %v3984_v60, %v2783_v13  ;;  %v4441_v14 = vpop.f32.mrb[89].mxu0 }
0x10a5   :  { %v2786_v12 = vpop.f32.mrb[90].mxu0 }
0x10a6   :  { %v4442_v39 = vpop.f32.mrb[91].mxu0  ;;  %v2982_v18 = vsel %vm152_vm2, %v2784_v5, -inf }
0x10a7   :  { %v2829_v42 = vpop.f32.mrb[84].mxu1  ;;  %2983 = vmax.xlane.f32.xlu1 %v2982_v18 }
0x10a8   :  { %v5641_v17 = vadd.f32 %v3985_v16, %v2829_v42  ;;  %v4447_v0 = vpop.f32.mrb[85].mxu1 }
0x10a9   :  { %v2832_v25 = vpop.f32.mrb[86].mxu1 }
0x10aa   :  { %v4448_v34 = vpop.f32.mrb[87].mxu1  ;;  %v2985_v41 = vsel %vm152_vm2, %v5641_v17, -inf }
0x10ab   :  { %2986 = vmax.xlane.f32.xlu0 %v2985_v41  ;;  %v2875_v44 = vpop.f32.mrb[92].mxu0 }
0x10ac   :  { %v2876_v45 = vadd.f32 %v3986_v29, %v2875_v44  ;;  %v4453_v46 = vpop.f32.mrb[93].mxu0 }
0x10ad   :  { %v2878_v35 = vpop.f32.mrb[94].mxu0 }
0x10ae   :  { %v4454_v26 = vpop.f32.mrb[95].mxu0  ;;  %v2988_v48 = vsel %vm152_vm2, %v2876_v45, -inf }
0x10af   :  { %v2921_v38 = vpop.f32.mrb[88].mxu1  ;;  %2989 = vmax.xlane.f32.xlu1 %v2988_v48 }
0x10b0   :  { %v5652_v47 = vadd.f32 %v3987_v32, %v2921_v38  ;;  %v4459_v49 = vpop.f32.mrb[89].mxu1 }
0x10b1   :  { %v2924_v50 = vpop.f32.mrb[90].mxu1 }
0x10b2   :  { %v4460_v54 = vpop.f32.mrb[91].mxu1  ;;  %v2991_v56 = vsel %vm152_vm2, %v5652_v47, -inf }
0x10b3   :  { %2992 = vmax.xlane.f32.xlu0 %v2991_v56  ;;  %v2967_v57 = vpop.f32.mrb[96].mxu0 }
0x10b4   :  { %v2968_v58 = vadd.f32 %v3988_v53, %v2967_v57  ;;  %v4465_v61 = vpop.f32.mrb[97].mxu0 }
0x10b5   :  { %v2970_v62 = vpop.f32.mrb[98].mxu0 }
0x10b6   :  { %v4466_v15 = vpop.f32.mrb[99].mxu0  ;;  %v2994_v40 = vsel %vm152_vm2, %v2968_v58, -inf }
0x10b7   :  { %2995 = vmax.xlane.f32.xlu1 %v2994_v40 }
0x10b9   :  { %v2975_v63 = vpop.xlane.xlu1 %2974 }
0x10ba   :  { %v2997_v2 = vsub.f32 %v5616_v22, %v2975_v63 }
0x10bc   :  { %v3005_v31 = vmul.f32 1.442695, %v2997_v2 }
0x10be   :  { %4726 = vpow2.f32 %v3005_v31 }
0x10c8   :  { %3119 = vrot.lane.b32.xlu1 %v5545_v3, %s4817_s10  ;;  %v5671_v27 = vpop.eup %4726 }
0x10c9   :  { %3070 = vrot.lane.b32.xlu0 %v5537_v9, %s4817_s10  ;;  %v3021_v3 = vsel %vm152_vm2, %v5671_v27, 0.0 }
0x10cc   :  { %3168 = vrot.lane.b32.xlu1 %v5550_v4, %s4817_s10 }
0x10cd   :  { %3217 = vrot.lane.b32.xlu0 %v5567_v24, %s4817_s10 }
0x10d0   :  { %3266 = vrot.lane.b32.xlu1 %v5572_v43, %s4817_s10 }
0x10ec   :  { %3022 = vadd.xlane.f32.xlu0 %v3021_v3 }
0x112c   :  { %v2978_v9 = vpop.xlane.xlu0 %2977 }
0x112d   :  { %v2998_v4 = vsub.f32 %v5623_v37, %v2978_v9 }
0x112f   :  { %v3007_v33 = vmul.f32 1.442695, %v2998_v4 }
0x1130   :  { %v2981_v28 = vpop.xlane.xlu0 %2980 }
0x1131   :  { %4728 = vpow2.f32 %v3007_v33  ;;  %v2999_v24 = vsub.f32 %v5630_v59, %v2981_v28 }
0x1133   :  { %v3009_v43 = vmul.f32 1.442695, %v2999_v24 }
0x1134   :  { %v2984_v30 = vpop.xlane.xlu1 %2983 }
0x1135   :  { %4730 = vpow2.f32 %v3009_v43  ;;  %v3000_v22 = vsub.f32 %v2784_v5, %v2984_v30 }
0x1137   :  { %v3011_v36 = vmul.f32 1.442695, %v3000_v22 }
0x1138   :  { %v2987_v19 = vpop.xlane.xlu0 %2986 }
0x1139   :  { %4732 = vpow2.f32 %v3011_v36  ;;  %v3001_v41 = vsub.f32 %v5641_v17, %v2987_v19 }
0x113b   :  { %v5677_v6 = vpop.eup %4728  ;;  %v3013_v44 = vmul.f32 1.442695, %v3001_v41 }
0x113c   :  { %v2990_v23 = vpop.xlane.xlu1 %2989  ;;  %v3024_v8 = vsel %vm152_vm2, %v5677_v6, 0.0 }
0x113d   :  { %v3002_v20 = vsub.f32 %v2876_v45, %v2990_v23  ;;  %3025 = vadd.xlane.f32.xlu1 %v3024_v8 }
0x113f   :  { %v5681_v37 = vpop.eup %4730  ;;  %v3015_v60 = vmul.f32 1.442695, %v3002_v20 }
0x1140   :  { %v2993_v10 = vpop.xlane.xlu0 %2992  ;;  %v3027_v59 = vsel %vm152_vm2, %v5681_v37, 0.0 }
0x1141   :  { %4734 = vpow2.f32 %v3015_v60  ;;  %3028 = vadd.xlane.f32.xlu0 %v3027_v59  ;;  %v3003_v45 = vsub.f32 %v5652_v47, %v2993_v10 }
0x1143   :  { %v5685_v11 = vpop.eup %4732  ;;  %v3017_v46 = vmul.f32 1.442695, %v3003_v45 }
0x1144   :  { %v3071_v13 = vpop.permute.xlu0 %3070  ;;  %v2996_v5 = vpop.xlane.xlu1 %2995  ;;  %v3030_v14 = vsel %vm152_vm2, %v5685_v11, 0.0 }
0x1145   :  { %v3076_v12 = vsel %vm643_vm3, %v3071_v13, 0  ;;  %v3004_v16 = vsub.f32 %v2968_v58, %v2996_v5  ;;  %3031 = vadd.xlane.f32.xlu1 %v3030_v14 }
0x1146   :  { %4468 = vmatpush3.bf16.msra.mxu1 %v3076_v12 }
0x1147   :  { %v3019_v39 = vmul.f32 1.442695, %v3004_v16  ;;  %4479 = vmatprep.subr.bf16.mxu1 %v4812_v7 }
0x1148   :  { %v3120_v18 = vpop.permute.xlu1 %3119  ;;  %v3218_v32 = vpop.permute.xlu0 %3217 }
0x1149   :  { %4736 = vpow2.f32 %v3019_v39  ;;  %v3125_v42 = vsel %vm643_vm3, %v3120_v18, 0  ;;  %v3223_v40 = vsel %vm643_vm3, %v3218_v32, 0 }
0x114a   :  { %4474 = vmatpush3.bf16.msra.mxu0 %v3125_v42  ;;  %4738 = vpow2.f32 %v3013_v44 }
0x114b   :  { %v5692_v0 = vpop.eup %4734  ;;  %4485 = vmatprep.subr.bf16.mxu0 %v4812_v7  ;;  %4740 = vpow2.f32 %v3017_v46 }
0x114c   :  { %v3036_v25 = vsel %vm152_vm2, %v5692_v0, 0.0  ;;  %v3169_v47 = vpop.permute.xlu1 %3168 }
0x114d   :  { %3037 = vadd.xlane.f32.xlu1 %v3036_v25  ;;  %v3174_v50 = vsel %vm643_vm3, %v3169_v47, 0  ;;  %v4632_v47 = vld [vmem:[%s5868_s3 + $0x90] sm:$0xff]  }
0x1150   :  { %v3267_v53 = vpop.permute.xlu1 %3266 }
0x1153   :  { %v5697_v29 = vpop.eup %4736 }
0x1154   :  { %v3042_v34 = vsel %vm152_vm2, %v5697_v29, 0.0  ;;  %v5707_v35 = vpop.eup %4738 }
0x1155   :  { %3043 = vadd.xlane.f32.xlu1 %v3042_v34  ;;  %v3033_v26 = vsel %vm152_vm2, %v5707_v35, 0.0  ;;  %v5711_v48 = vpop.eup %4740 }
0x1156   :  { %v3039_v17 = vsel %vm152_vm2, %v5711_v48, 0.0 }
0x1157   :  { %3315 = vrot.lane.b32.xlu0 %v5582_v1, %s4817_s10 }
0x1166   :  { %3364 = vrot.lane.b32.xlu1 %v5585_v21, %s4817_s10 }
0x1176   :  { %3034 = vadd.xlane.f32.xlu0 %v3033_v26 }
0x1179   :  { %v3023_v1 = vpop.xlane.xlu0 %3022 }
0x117a   :  { %4742 = vrcp.f32 %v3023_v1  ;;  %3040 = vadd.xlane.f32.xlu0 %v3039_v17 }
0x1184   :  { %v4743_v38 = vpop.eup %4742 }
0x1185   :  { %v3046_v21 = vmul.f32 %v4743_v38, %v5671_v27  ;;  %v3272_v27 = vsel %vm643_vm3, %v3267_v53, 0 }
0x1187   :  { %v3061_v49 = vpack.c.bf16 %v3046_v21, %v3046_v21 }
0x1189   :  { %4470 = vmatmul.mubr.msk.bf16.vlgmr.msra.gmra.mrb[92].mxu1 %vm152_vm2, %v3061_v49 }
0x118a   :  { %4480 = vmatpush3.bf16.msra.mxu1 %v3174_v50  ;;  %4481 = vmatprep.mubr.msk.bf16.mxu1 %vm4813_vm1, %v4812_v7 }
0x118b   :  { %4491 = vmatprep.subr.bf16.mxu1 %v4812_v7 }
0x1190   :  { %3413 = vrot.lane.b32.xlu0 %v5595_v51, %s4817_s10 }
0x11ca   :  { %v3026_v54 = vpop.xlane.xlu1 %3025 }
0x11cb   :  { %4744 = vrcp.f32 %v3026_v54 }
0x11ce   :  { %v3029_v56 = vpop.xlane.xlu0 %3028 }
0x11cf   :  { %4746 = vrcp.f32 %v3029_v56 }
0x11d2   :  { %v3032_v57 = vpop.xlane.xlu1 %3031  ;;  %v3316_v9 = vpop.permute.xlu0 %3315 }
0x11d3   :  { %4748 = vrcp.f32 %v3032_v57  ;;  %v3321_v33 = vsel %vm643_vm3, %v3316_v9, 0 }
0x11d5   :  { %v4745_v58 = vpop.eup %4744 }
0x11d6   :  { %v3048_v61 = vmul.f32 %v4745_v58, %v5677_v6 }
0x11d8   :  { %v3062_v62 = vpack.c.bf16 %v3048_v61, %v3048_v61  ;;  %v4633_v61 = vld [vmem:[%s5868_s3 + $0x98] sm:$0xff]  }
0x11d9   :  { %v4747_v15 = vpop.eup %4746 }
0x11da   :  { %v3050_v63 = vmul.f32 %v4747_v15, %v5681_v37  ;;  %4476 = vmatmul.mubr.msk.bf16.vlgmr.msra.gmra.mrb[100].mxu0 %vm152_vm2, %v3062_v62  ;;  %v3038_v2 = vpop.xlane.xlu1 %3037 }
0x11db   :  { %4486 = vmatpush3.bf16.msra.mxu0 %v3223_v40  ;;  %4750 = vrcp.f32 %v3038_v2  ;;  %4487 = vmatprep.mubr.msk.bf16.mxu0 %vm4813_vm1, %v4812_v7 }
0x11dc   :  { %v3063_v51 = vpack.c.bf16 %v3050_v63, %v3050_v63  ;;  %4497 = vmatprep.subr.bf16.mxu0 %v4812_v7 }
0x11dd   :  { %v4749_v31 = vpop.eup %4748 }
0x11de   :  { %v3052_v3 = vmul.f32 %v4749_v31, %v5685_v11  ;;  %4482 = vmatmul.mubr.msk.bf16.vlgmr.msra.gmra.mrb[96].mxu1 %vm152_vm2, %v3063_v51 }
0x11df   :  { %4492 = vmatpush3.bf16.msra.mxu1 %v3272_v27  ;;  %4493 = vmatprep.mubr.msk.bf16.mxu1 %vm4813_vm1, %v4812_v7 }
0x11e0   :  { %v3064_v4 = vpack.c.bf16 %v3052_v3, %v3052_v3  ;;  %4503 = vmatprep.subr.bf16.mxu1 %v4812_v7 }
0x11e2   :  { %4488 = vmatmul.mubr.msk.bf16.vlgmr.msra.gmra.mrb[104].mxu0 %vm152_vm2, %v3064_v4  ;;  %v3044_v30 = vpop.xlane.xlu1 %3043 }
0x11e3   :  { %4498 = vmatpush3.bf16.msra.mxu0 %v3321_v33  ;;  %4499 = vmatprep.mubr.msk.bf16.mxu0 %vm4813_vm1, %v4812_v7  ;;  %4752 = vrcp.f32 %v3044_v30 }
0x11e4   :  { %4509 = vmatprep.subr.bf16.mxu0 %v4812_v7 }
0x11e5   :  { %v4751_v28 = vpop.eup %4750 }
0x11e6   :  { %v3056_v24 = vmul.f32 %v4751_v28, %v5692_v0  ;;  %v3365_v10 = vpop.permute.xlu1 %3364 }
0x11e7   :  { %v3370_v13 = vsel %vm643_vm3, %v3365_v10, 0 }
0x11e8   :  { %v3066_v43 = vpack.c.bf16 %v3056_v24, %v3056_v24 }
0x11ea   :  { %4500 = vmatmul.mubr.msk.bf16.vlgmr.msra.gmra.mrb[108].mxu0 %vm152_vm2, %v3066_v43 }
0x11eb   :  { %4511 = vmatprep.mubr.msk.bf16.mxu0 %vm4813_vm1, %v4812_v7 }
0x11ed   :  { %v4753_v36 = vpop.eup %4752 }
0x11ee   :  { %v3060_v19 = vmul.f32 %v4753_v36, %v5697_v29 }
0x11f0   :  { %v3068_v37 = vpack.c.bf16 %v3060_v19, %v3060_v19 }
0x1203   :  { %v3035_v22 = vpop.xlane.xlu0 %3034 }
0x1204   :  { %4754 = vrcp.f32 %v3035_v22 }
0x1207   :  { %v3041_v6 = vpop.xlane.xlu0 %3040 }
0x1208   :  { %4756 = vrcp.f32 %v3041_v6 }
0x120b   :  { %v3414_v23 = vpop.permute.xlu0 %3413 }
0x120c   :  { %v3419_v8 = vsel %vm643_vm3, %v3414_v23, 0 }
0x120d   :  { %4510 = vmatpush3.bf16.msra.mxu0 %v3419_v8 }
0x120e   :  { %v4755_v20 = vpop.eup %4754  ;;  %4523 = vmatprep.subr.bf16.mxu0 %v4812_v7 }
0x120f   :  { %v3054_v60 = vmul.f32 %v4755_v20, %v5707_v35 }
0x1210   :  { %4512 = vmatmul.mubr.msk.bf16.vlgmr.msra.gmra.mrb[112].mxu0 %vm152_vm2, %v3068_v37 }
0x1211   :  { %v3065_v59 = vpack.c.bf16 %v3054_v60, %v3054_v60  ;;  %4527 = vmatprep.mubr.msk.bf16.mxu0 %vm4813_vm1, %v4812_v7 }
0x1212   :  { %v4757_v11 = vpop.eup %4756 }
0x1213   :  { %4494 = vmatmul.mubr.msk.bf16.vlgmr.msra.gmra.mrb[100].mxu1 %vm152_vm2, %v3065_v59  ;;  %v3058_v5 = vmul.f32 %v4757_v11, %v5711_v48 }
0x1214   :  { %4504 = vmatpush3.bf16.msra.mxu1 %v3370_v13  ;;  %4505 = vmatprep.mubr.msk.bf16.mxu1 %vm4813_vm1, %v4812_v7 }
0x1215   :  { %4515 = vmatprep.subr.bf16.mxu1 %v4812_v7  ;;  %v3067_v14 = vpack.c.bf16 %v3058_v5, %v3058_v5 }
0x121b   :  { %4506 = vmatmul.mubr.msk.bf16.vlgmr.msra.gmra.mrb[104].mxu1 %vm152_vm2, %v3067_v14 }
0x121c   :  { %4519 = vmatprep.mubr.msk.bf16.mxu1 %vm4813_vm1, %v4812_v7  ;;  %4516 = vmatpush3.bf16.msra.mxu1 %v4632_v47 }
0x121d   :  { %4517 = vmatprep.subr.bf16.mxu1 %v4812_v7 }
0x1220   :  { %4518 = vmatpush3.bf16.msra.mxu1 %v4633_v61 }
0x1221   :  { %4531 = vmatprep.subr.bf16.mxu1 %v4812_v7 }
0x125c   :  { %v3112_v12 = vpop.f32.mrb[92].mxu1 }
0x125d   :  { %v4471_v16 = vpop.f32.mrb[93].mxu1 }
0x125e   :  { %v3115_v39 = vpop.f32.mrb[94].mxu1 }
0x125f   :  { %v4472_v18 = vpop.f32.mrb[95].mxu1  ;;  %v4634_v39 = vld [vmem:[%s5868_s3 + $0xa0] sm:$0xff]  }
0x1260   :  { %4524 = vmatpush3.bf16.msra.mxu0 %v4634_v39  ;;  %v4637_v18 = vld [vmem:[%s5868_s3 + $0xb8] sm:$0xff]  }
0x1261   :  { %4525 = vmatprep.subr.bf16.mxu0 %v4812_v7 }
0x12ad   :  { %v3161_v42 = vpop.f32.mrb[100].mxu0 }
0x12ae   :  { %v4477_v0 = vpop.f32.mrb[101].mxu0 }
0x12af   :  { %v3164_v25 = vpop.f32.mrb[102].mxu0 }
0x12b0   :  { %v4478_v29 = vpop.f32.mrb[103].mxu0 }
0x12b1   :  { %v3210_v34 = vpop.f32.mrb[96].mxu1 }
0x12b2   :  { %v4483_v41 = vpop.f32.mrb[97].mxu1 }
0x12b3   :  { %v3213_v44 = vpop.f32.mrb[98].mxu1 }
0x12b4   :  { %v4484_v45 = vpop.f32.mrb[99].mxu1 }
0x12b5   :  { %v3259_v46 = vpop.f32.mrb[104].mxu0 }
0x12b6   :  { %v4489_v35 = vpop.f32.mrb[105].mxu0 }
0x12b7   :  { %v3262_v32 = vpop.f32.mrb[106].mxu0  ;;  %v4008_v35 = vld [vmem:[%s5869_s4 + $0x5] ss:$0 sm:$0xff] }
0x12b8   :  { %v4490_v26 = vpop.f32.mrb[107].mxu0 }
0x12bd   :  { %v3357_v48 = vpop.f32.mrb[108].mxu0 }
0x12be   :  { %v4597_v1 = vpack.i.bf16 %v3357_v48, %v3161_v42  ;;  %v4501_v17 = vpop.f32.mrb[109].mxu0 }
0x12bf   :  { %v3360_v38 = vpop.f32.mrb[110].mxu0  ;;  %v4638_v17 = vld [vmem:[%s5868_s3 + $0xc0] sm:$0xff]  }
0x12c0   :  { %4598 = vrot.lane.b32.xlu1 %v4597_v1, %s4819_s28  ;;  %v4502_v21 = vpop.f32.mrb[111].mxu0  ;;  %v4639_v38 = vld [vmem:[%s5868_s3 + $0xc8] sm:$0xff]  }
0x12e3   :  { %v3455_v49 = vpop.f32.mrb[112].mxu0 }
0x12e4   :  { %v4607_v50 = vpack.i.bf16 %v3455_v49, %v3259_v46  ;;  %v4513_v53 = vpop.f32.mrb[113].mxu0 }
0x12e5   :  { %v3458_v54 = vpop.f32.mrb[114].mxu0 }
0x12e6   :  { %v3308_v56 = vpop.f32.mrb[100].mxu1  ;;  %4608 = vrot.lane.b32.xlu1 %v4607_v50, %s4820_s11  ;;  %v4514_v57 = vpop.f32.mrb[115].mxu0 }
0x12e7   :  { %v4495_v58 = vpop.f32.mrb[101].mxu1 }
0x12e8   :  { %v3311_v62 = vpop.f32.mrb[102].mxu1 }
0x12e9   :  { %v4496_v15 = vpop.f32.mrb[103].mxu1 }
0x12ee   :  { %v3406_v40 = vpop.f32.mrb[104].mxu1 }
0x12ef   :  { %v4602_v63 = vpack.i.bf16 %v3406_v40, %v3210_v34  ;;  %v4507_v2 = vpop.f32.mrb[105].mxu1 }
0x12f0   :  { %v3409_v51 = vpop.f32.mrb[106].mxu1 }
0x12f1   :  { %4603 = vrot.lane.b32.xlu0 %v4602_v63, %s4821_s14  ;;  %v4508_v31 = vpop.f32.mrb[107].mxu1 }
0x1332   :  { %v4599_v27 = vpop.permute.xlu1 %4598 }
0x1333   :  { %v4601_v3 = vunpack.i.h.bf16 %v4599_v27  ;;  %v4600_v9 = vunpack.i.l.bf16 %v4599_v27  ;;  %v4640_v27 = vld [vmem:[%s5868_s3 + $0xd0] sm:$0xff]  }
0x1335   :  { %v3488_v43 = vsel %vm152_vm2, %v3308_v56, %v4601_v3  ;;  %v3473_v30 = vsel %vm152_vm2, %v3112_v12, %v4600_v9  ;;  %v4641_v3 = vld [vmem:[%s5868_s3 + $0xd8] sm:$0xff]  }
0x1358   :  { %v4609_v4 = vpop.permute.xlu1 %4608 }
0x1359   :  { %v4611_v22 = vunpack.i.h.bf16 %v4609_v4  ;;  %v4610_v36 = vunpack.i.l.bf16 %v4609_v4 }
0x1363   :  { %v4604_v33 = vpop.permute.xlu0 %4603 }
0x1364   :  { %v4606_v28 = vunpack.i.h.bf16 %v4604_v33  ;;  %v4605_v24 = vunpack.i.l.bf16 %v4604_v33 }
0x1366   :  { %v3474_v6 = vsel %vm1036_vm4, %v3473_v30, %v4605_v24  ;;  %v3489_v19 = vsel %vm1036_vm4, %v3488_v43, %v4606_v28 }
0x1367   :  { %v3475_v23 = vsel %vm1038_vm5, %v3474_v6, %v4610_v36  ;;  %v3490_v8 = vsel %vm1038_vm5, %v3489_v19, %v4611_v22  ;;  %v4017_v6 = vld [vmem:[%s5869_s4 + $0x6] ss:$0 sm:$0xff] }
0x1368   :  { %v3495_v20 = vpack.c.bf16 %v3490_v8, %v3475_v23 }
0x136a   :  { %4520 = vmatmul.mubr.msk.bf16.vlgmr.msra.gmra.mrb[108].mxu1 %vm30_vm0, %v3495_v20 }
0x136b   :  { %4539 = vmatprep.mubr.msk.bf16.mxu1 %vm4813_vm1, %v4812_v7 }
0x143d   :  { %v3545_v37 = vpop.f32.mrb[108].mxu1 }
0x143e   :  { %v3552_v60 = vadd.f32 %v3545_v37, %v5510_v52  ;;  %v4521_v10 = vpop.f32.mrb[109].mxu1  ;;  %v4635_v52 = vld [vmem:[%s5868_s3 + $0xa8] sm:$0xff]  }
0x143f   :  { %v3548_v59 = vpop.f32.mrb[110].mxu1  ;;  %4526 = vmatpush3.bf16.msra.mxu0 %v4635_v52 }
0x1440   :  { %v3553_v11 = vadd.f32 %v3548_v59, %v5513_v55  ;;  %v4522_v13 = vpop.f32.mrb[111].mxu1  ;;  %v3555_v5 = vmul.f32 %v3552_v60, %v3552_v60  ;;  %v4636_v55 = vld [vmem:[%s5868_s3 + $0xb0] sm:$0xff]   ;;  %4543 = vmatprep.subr.bf16.mxu0 %v4812_v7 }
0x1441   :  { %4532 = vmatpush3.bf16.msra.mxu1 %v4636_v55 }
0x1442   :  { %v3557_v14 = vsel %vm30_vm0, %v3555_v5, 0.0  ;;  %v3556_v12 = vmul.f32 %v3553_v11, %v3553_v11  ;;  %4533 = vmatprep.subr.bf16.mxu1 %v4812_v7 }
0x1443   :  { %3558 = vadd.xlane.f32.xlu0 %v3557_v14 }
0x1444   :  { %v3560_v16 = vsel %vm30_vm0, %v3556_v12, 0.0 }
0x1445   :  { %3561 = vadd.xlane.f32.xlu1 %v3560_v16  ;;  %4534 = vmatpush3.bf16.msra.mxu1 %v4637_v18  ;;  %v3805_v18 = vld [vmem:[%s5867_s2] sm:$0xff] }
0x1446   :  { %4535 = vmatprep.subr.bf16.mxu1 %v4812_v7 }
0x1449   :  { %4536 = vmatpush3.bf16.msra.mxu1 %v4638_v17 }
0x144a   :  { %4537 = vmatprep.subr.bf16.mxu1 %v4812_v7 }
0x144d   :  { %4538 = vmatpush3.bf16.msra.mxu1 %v4639_v38 }
0x14d0   :  { %v3559_v42 = vpop.xlane.xlu0 %3558 }
0x14d1   :  { %v3563_v0 = vmul.f32 0.03125, %v3559_v42  ;;  %v3806_v42 = vld [vmem:[%s5867_s2 + $0x8] sm:$0xff]  ;;  %s4823_s2 = smov [#allocation3]  }
0x14d2   :  { %v3562_v25 = vpop.xlane.xlu1 %3561  ;;  %s3886_s10 = sshll.u32 %s4823_s2, 4  ;;  %s3887_s10 = int_to_ptr.vmem [resolvable:$true] %s3886_s10 }
0x14d3   :  { %v3565_v29 = vadd.f32 1e-06, %v3563_v0  ;;  %v3564_v34 = vmul.f32 0.03125, %v3562_v25  ;;  %s4776_s13 = scalar_lea.vmem %s3887_s10, 256  ;;  %p4781_p1 = scmp.lt.s32.totalorder %s3887_s10, %s3887_s10 }
0x14d4   :  { %p4777_p0 = scmp.ne.s32.totalorder %s3887_s10, %s4776_s13  ;;  %p4782_p2 = scmp.lt.s32.totalorder %s4776_s13, %s4776_s13 }
0x14d5   :  { %4758 = vrsqrt.f32 %v3565_v29  ;;  %v3566_v41 = vadd.f32 1e-06, %v3564_v34  ;;  %v3827_v29 = vlaneseq }
0x14d6   :  { %p4783_p3 = por %p4782_p2, %p4781_p1 }
0x14d7   :  { %4760 = vrsqrt.f32 %v3566_v41  ;;  %v3828_v34 = vand.u32 127, %v3827_v29 }
0x14d8   :  { %p4784_p4 = pnand %p4783_p3, %p4777_p0 }
0x14df   :  { %v4759_v44 = vpop.eup %4758 }
0x14e0   :  { %v3569_v45 = vmul.f32 %v4759_v44, %v3552_v60 }
0x14e1   :  { %v4761_v46 = vpop.eup %4760 }
0x14e2   :  { %v3570_v32 = vmul.f32 %v4761_v46, %v3553_v11  ;;  %v3575_v26 = vmul.f32 %v4008_v35, %v3569_v45 }
0x14e4   :  { %v3576_v48 = vmul.f32 %v4008_v35, %v3570_v32 }
0x14e6   :  { %v3581_v1 = vpack.c.bf16 %v3576_v48, %v3575_v26 }
0x14e8   :  { %4528 = vmatmul.mubr.msk.bf16.vlgmr.msra.gmra.mrb[116].mxu0 %vm30_vm0, %v3581_v1 }
0x14e9   :  { %4547 = vmatprep.mubr.msk.bf16.mxu0 %vm4813_vm1, %v4812_v7  ;;  %4544 = vmatpush3.bf16.msra.mxu0 %v4640_v27 }
0x14ea   :  { %4545 = vmatprep.subr.bf16.mxu0 %v4812_v7 }
0x14ed   :  { %4546 = vmatpush3.bf16.msra.mxu0 %v4641_v3 }
0x15bb   :  { %v3631_v21 = vpop.f32.mrb[116].mxu0 }
0x15bc   :  { %v4529_v47 = vpop.f32.mrb[117].mxu0  ;;  %v3638_v50 = vmax.f32 %v3631_v21, 0.0 }
0x15bd   :  { %v3634_v49 = vpop.f32.mrb[118].mxu0 }
0x15be   :  { %v3639_v53 = vmax.f32 %v3634_v49, 0.0  ;;  %v4530_v54 = vpop.f32.mrb[119].mxu0 }
0x15c0   :  { %v3648_v56 = vpack.c.bf16 %v3639_v53, %v3638_v50 }
0x15c2   :  { %4540 = vmatmul.mubr.msk.bf16.vlgmr.msra.gmra.mrb[112].mxu1 %vm1237_vm6, %v3648_v56 }
0x1695   :  { %v3710_v57 = vpop.f32.mrb[112].mxu1 }
0x1696   :  { %v3717_v58 = vadd.f32 %v3710_v57, %v3552_v60  ;;  %v4541_v61 = vpop.f32.mrb[113].mxu1 }
0x1697   :  { %v3713_v62 = vpop.f32.mrb[114].mxu1 }
0x1698   :  { %v3720_v15 = vmul.f32 %v3717_v58, %v3717_v58  ;;  %v3718_v40 = vadd.f32 %v3713_v62, %v3553_v11  ;;  %v4542_v63 = vpop.f32.mrb[115].mxu1  ;;  %v4822_v11 = vmov 0  }
0x1699   :  { %4612 = vset.pattern.permute.xlu1 %v4822_v11  ;;  %4613 = vset.pattern.permute.xlu0 %v4822_v11 }
0x169a   :  { %v3721_v2 = vmul.f32 %v3718_v40, %v3718_v40  ;;  %v3722_v51 = vsel %vm30_vm0, %v3720_v15, 0.0 }
0x169b   :  { %3723 = vadd.xlane.f32.xlu0 %v3722_v51 }
0x169c   :  { %v3725_v31 = vsel %vm30_vm0, %v3721_v2, 0.0 }
0x169f   :  { %3726 = vadd.xlane.f32.xlu0 %v3725_v31 }
0x1728   :  { %v3724_v9 = vpop.xlane.xlu0 %3723 }
0x1729   :  { %v3728_v4 = vmul.f32 0.03125, %v3724_v9 }
0x172b   :  { %v3730_v33 = vadd.f32 1e-06, %v3728_v4 }
0x172c   :  { %v3727_v28 = vpop.xlane.xlu0 %3726 }
0x172d   :  { %4762 = vrsqrt.f32 %v3730_v33  ;;  %v3729_v24 = vmul.f32 0.03125, %v3727_v28 }
0x172f   :  { %v3731_v43 = vadd.f32 1e-06, %v3729_v24 }
0x1731   :  { %4764 = vrsqrt.f32 %v3731_v43 }
0x1737   :  { %v4763_v30 = vpop.eup %4762 }
0x1738   :  { %v3734_v22 = vmul.f32 %v4763_v30, %v3717_v58 }
0x173a   :  { %v3740_v23 = vmul.f32 %v4017_v6, %v3734_v22 }
0x173b   :  { %v4765_v36 = vpop.eup %4764 }
0x173c   :  { %v3735_v19 = vmul.f32 %v4765_v36, %v3718_v40 }
0x173e   :  { %v3741_v8 = vmul.f32 %v4017_v6, %v3735_v19 }
0x1740   :  { %v3746_v20 = vpack.c.bf16 %v3741_v8, %v3740_v23 }
0x1742   :  { %4548 = vmatmul.mubr.msk.bf16.vlgmr.msra.gmra.mrb[120].mxu0 %vm30_vm0, %v3746_v20 }
0x1815   :  { %v3796_v37 = vpop.f32.mrb[120].mxu0 }
0x1816   :  { %3803 = vst [vmem:[#allocation3] sm:$0xff] %v3796_v37  ;;  %3807 = vmax.xlane.f32.xlu1 %v3796_v37  ;;  %v4549_v60 = vpop.f32.mrb[121].mxu0 }
0x1817   :  { %v3799_v10 = vpop.f32.mrb[122].mxu0 }
0x1818   :  { %3804 = vst [vmem:[#allocation3 + $0x8] sm:$0xff] %v3799_v10  ;;  %3809 = vmax.xlane.f32.xlu0 %v3799_v10  ;;  %v4550_v59 = vpop.f32.mrb[123].mxu0 }
0x18a3   :  { %v3808_v13 = vpop.xlane.xlu1 %3807 }
0x18a4   :  { %v3811_v5 = vsub.f32 %v3796_v37, %v3808_v13 }
0x18a5   :  { %v3810_v14 = vpop.xlane.xlu0 %3809 }
0x18a6   :  { %v3813_v12 = vmul.f32 1.442695, %v3811_v5  ;;  %v3812_v16 = vsub.f32 %v3799_v10, %v3810_v14 }
0x18a8   :  { %4766 = vpow2.f32 %v3813_v12  ;;  %v3815_v39 = vmul.f32 1.442695, %v3812_v16 }
0x18aa   :  { %4768 = vpow2.f32 %v3815_v39 }
0x18b2   :  { %v4767_v52 = vpop.eup %4766 }
0x18b3   :  { %3817 = vadd.xlane.f32.xlu1 %v4767_v52 }
0x18b4   :  { %v4769_v55 = vpop.eup %4768 }
0x18b5   :  { %3819 = vadd.xlane.f32.xlu0 %v4769_v55 }
0x18c4   :  { %3830 = vperm.xlu1 %4612, %v3805_v18  }
0x18cb   :  { %3833 = vperm.xlu0 %4613, %v3806_v42  }
0x1940   :  { %v3818_v0 = vpop.xlane.xlu1 %3817 }
0x1941   :  { %4770 = vlog2.f32 %v3818_v0 }
0x1942   :  { %v3820_v25 = vpop.xlane.xlu0 %3819 }
0x1943   :  { %4772 = vlog2.f32 %v3820_v25 }
0x1944   :  { %v3831_v41 = vpop.permute.xlu1 %3830 }
0x1945   :  { %vm3835_vm7 = vcmp.eq.s32.totalorder %v3828_v34, %v3831_v41 }
0x194a   :  { %v3834_v46 = vpop.permute.xlu0 %3833 }
0x194b   :  { %v4771_v44 = vpop.eup %4770  ;;  %vm3836_vm8 = vcmp.eq.s32.totalorder %v3828_v34, %v3834_v46 }
0x194c   :  { %v3822_v45 = vmul.f32 0.6931472, %v4771_v44 }
0x194d   :  { %v4773_v35 = vpop.eup %4772 }
0x194e   :  { %v3824_v32 = vmul.f32 0.6931472, %v4773_v35  ;;  %v3825_v26 = vsub.f32 %v3811_v5, %v3822_v45 }
0x1950   :  { %v3837_v48 = vsel %vm3835_vm7, %v3825_v26, 0.0  ;;  %v3826_v1 = vsub.f32 %v3812_v16, %v3824_v32 }
0x1951   :  { %3839 = vadd.xlane.f32.xlu1 %v3837_v48 }
0x1952   :  { %v3838_v17 = vsel %vm3836_vm8, %v3826_v1, 0.0 }
0x1953   :  { %3841 = vadd.xlane.f32.xlu0 %v3838_v17 }
0x1954   :  { %4787 = shalt.err (!%p4784_p4)
}
0x1955   :  { %s4788_s14 = scalar_lea.hbm %s5870_s5, 256 }
0x1956   :  { %p4789_p5 = scmp.ne.s32.totalorder %s5870_s5, %s4788_s14  ;;  %p4792_p6 = scmp.lt.u32.totalorder %s4788_s14, %s5870_s5 }
0x1958   :  { %p4794_p7 = pnand %p4792_p6, %p4789_p5 }
0x195a   :  { %4797 = shalt.err (!%p4794_p7)
}
0x195b   :  { %s4824_s8 = smov 128   ;;  %vm3845_vm9 = vcmp.ne.s32.totalorder %v3805_v18, 4294967196  ;;  %vm3846_vm10 = vcmp.ne.s32.totalorder %v3806_v42, 4294967196  ;;  %vm3853_vm11 = vcmask 7168   ;;  %vm3875_vm12 = vcmask 0   ;;  %s4798_s27 = scalar_lea.hbm %s5871_s6, 16 }
0x195c   :  { %3892 = dma.vmem_to_hbm [thread:$0]  %s3887_s10, 256, %s5870_s5, [#allocation4], %s4824_s8, %s4824_s8, %s4819_s28   ;;  %v4021_v38 = vsel %vm3845_vm9, 1.0, %v4812_v7  ;;  %v4022_v21 = vsel %vm3846_vm10, 1.0, %v4812_v7 }
0x195d   :  { %v3863_v47 = vsel %vm3853_vm11, %v4021_v38, 0.0  ;;  %v3864_v49 = vsel %vm3853_vm11, %v4022_v21, 0.0  ;;  %p4799_p8 = scmp.ne.s32.totalorder %s5871_s6, %s4798_s27  ;;  %p4802_p9 = scmp.lt.u32.totalorder %s4798_s27, %s5871_s6 }
0x195e   :  { %v3865_v50 = vadd.f32 %v3864_v49, %v3863_v47 }
0x195f   :  { %p4804_p10 = pnand %p4802_p9, %p4799_p8 }
0x1960   :  { %v3866_v53 = vrot.slane %v3865_v50, 4 }
0x1962   :  { %v3867_v54 = vadd.f32 %v3866_v53, %v3865_v50 }
0x1964   :  { %v3868_v56 = vrot.slane %v3867_v54, 2 }
0x1966   :  { %v3869_v57 = vadd.f32 %v3868_v56, %v3867_v54 }
0x1968   :  { %v3870_v58 = vrot.slane %v3869_v57, 1 }
0x196a   :  { %v3871_v15 = vadd.f32 %v3870_v58, %v3869_v57 }
0x196c   :  { %v3872_v51 = vmax.f32 %v3871_v15, 1.0 }
0x196e   :  { %4774 = vrcp.f32 %v3872_v51 }
0x1978   :  { %v4775_v43 = vpop.eup %4774 }
0x19de   :  { %v3840_v61 = vpop.xlane.xlu1 %3839 }
0x19df   :  { %v3843_v62 = vsub.f32 0.0, %v3840_v61 }
0x19e0   :  { %v3842_v40 = vpop.xlane.xlu0 %3841 }
0x19e1   :  { %v3851_v63 = vmul.f32 %v4021_v38, %v3843_v62  ;;  %v3844_v2 = vsub.f32 0.0, %v3842_v40 }
0x19e3   :  { %v3852_v31 = vmul.f32 %v4022_v21, %v3844_v2  ;;  %v3854_v7 = vsel %vm3853_vm11, %v3851_v63, 0.0 }
0x19e5   :  { %v3855_v27 = vsel %vm3853_vm11, %v3852_v31, 0.0 }
0x19e6   :  { %v3856_v3 = vadd.f32 %v3855_v27, %v3854_v7 }
0x19e8   :  { %v3857_v9 = vrot.slane %v3856_v3, 4 }
0x19ea   :  { %v3858_v4 = vadd.f32 %v3857_v9, %v3856_v3 }
0x19ec   :  { %v3859_v33 = vrot.slane %v3858_v4, 2 }
0x19ee   :  { %v3860_v28 = vadd.f32 %v3859_v33, %v3858_v4 }
0x19f0   :  { %v3861_v24 = vrot.slane %v3860_v28, 1 }
0x19f2   :  { %v3862_v30 = vadd.f32 %v3861_v24, %v3860_v28 }
0x19f4   :  { %v3874_v22 = vmul.f32 %v4775_v43, %v3862_v30 }
0x19f6   :  { %3876 = vst.msk [vmem:[#allocation2] sm:$0x1] %vm3875_vm12, %v3874_v22 }
0x19fd   :  { %v3877_v36 = vld [vmem:[#allocation2] sm:$0x1] }
0x19fe   :  { %4551 = vpush %v3877_v36 }
0x1a2f   :  { %s4552_s5 = spop %4551 }
0x1a30   :  { %3880 = sst [smem:[#allocation6]] %s4552_s5 }
0x1a31   :  { %4807 = shalt.err (!%p4804_p10)
}
0x1a32   :  { %s4825_s24 = smov [#allocation6]  }
0x1a33   :  { %3900 = dma.smem_to_hbm %s4825_s24, 16, %s5871_s6, [#allocation5]  }
0x1a34   :  { %4808 = dma.done.wait [#allocation4], 256  }
0x1a35   :  { %4809 = vsyncadd [#allocation4], 4294967040 }
0x1a36   :  { %4810 = dma.done.wait [#allocation5], 16  }
0x1a37   :  { %4811 = vsyncadd [#allocation5], 4294967280 }
0x1a38   :  { %3907 = sfence }
0x1a39   :  { %3908 = vsyncpa [#allocation4], 1 }
0x1a3a   :  { %3909 = vsyncpa [#allocation5], 1 }

</bundles_post_ra>
